<compile_context>
chip_gen: v5e
topology: v5e:2x2
jax: 0.10.0
libtpu: 0.0.40
codegen_flags: <defaults>
</compile_context>

<pallas_src>
import functools
import math

import jax
import jax.numpy as jnp
from jax.experimental import pallas as pl
from jax.experimental.pallas import tpu as pltpu

NEG_INF = -1e9  # finite stand-in for -inf additive masks (avoids NaN on fully-masked rows)
VMEM_LIMIT = 32 * 1024 * 1024  # explicit scoped-VMEM budget (safe on v5e/v6e/v7x)


def _round_up(x, m):
    return ((x + m - 1) // m) * m


def _pick_tm(M, cap=256):
    """bf16-friendly row tile (multiple of 16); >=2 row blocks when M >= 32 (v7x dual-TC)."""
    if M >= 32:
        tm = _round_up(max(M // 2, 16), 16)
    else:
        tm = _round_up(max(M, 1), 16)
    return min(cap, tm)


# ----------------------------------------------------------------------------
# Shared in-kernel helpers
# ----------------------------------------------------------------------------
def _layer_norm_rows(y, g, b):
    mu = jnp.mean(y, axis=-1, keepdims=True)
    var = jnp.mean(jnp.square(y - mu), axis=-1, keepdims=True)
    return (y - mu) * jax.lax.rsqrt(var + 1e-5) * g + b


def _one_head_attention(q_src, kv_src, wq, bq, wk, bk, wv, bv, *, scale, kpm_row, causal):
    """One head: (Lq, d) x per-head weights -> (Lq, dh) attention output. Pure 2-D ops."""
    q = (jnp.dot(q_src, wq, preferred_element_type=jnp.float32) + bq).astype(jnp.bfloat16)
    k = (jnp.dot(kv_src, wk, preferred_element_type=jnp.float32) + bk).astype(jnp.bfloat16)
    v = (jnp.dot(kv_src, wv, preferred_element_type=jnp.float32) + bv).astype(jnp.bfloat16)

    s = jax.lax.dot_general(q, k, (((1,), (1,)), ((), ())),
                            preferred_element_type=jnp.float32) * scale   # (Lq, Lk)
    if kpm_row is not None:
        s = s + kpm_row                                                   # (1, Lk) broadcast
    if causal:
        row = jax.lax.broadcasted_iota(jnp.int32, s.shape, 0)
        col = jax.lax.broadcasted_iota(jnp.int32, s.shape, 1)
        s = s + jnp.where(col > row, NEG_INF, 0.0).astype(jnp.float32)
    s = s - jnp.max(s, axis=-1, keepdims=True)
    p = jnp.exp(s)
    p = p * pl.reciprocal(jnp.sum(p, axis=-1, keepdims=True), approx=True)
    return jnp.dot(p.astype(jnp.bfloat16), v, preferred_element_type=jnp.float32)  # (Lq, dh)


# ----------------------------------------------------------------------------
# Pallas kernels
# ----------------------------------------------------------------------------
def _matmul_kernel(x_ref, w_ref, b_ref, o_ref, acc_ref, *, relu):
    @pl.when(pl.program_id(2) == 0)
    def _():
        acc_ref[...] = jnp.zeros_like(acc_ref)

    acc_ref[...] += jnp.dot(x_ref[...], w_ref[...], preferred_element_type=jnp.float32)

    @pl.when(pl.program_id(2) == pl.num_programs(2) - 1)
    def _():
        y = acc_ref[...] + b_ref[...]
        if relu:
            y = jnp.maximum(y, 0.0)
        o_ref[...] = y.astype(o_ref.dtype)


def linear(x, w, b, relu=False, out_dtype=jnp.bfloat16):
    """x: (M, K), w: (K, N), b: (N,) -> x @ w + b [+ relu], bf16 operands / f32 accumulation."""
    M, K = x.shape
    N = w.shape[1]
    tm = _pick_tm(M)
    tn = min(256, _round_up(N, 128))
    tk = min(512, K) if K % 128 == 0 else K   # full-K block when K is not 128-aligned
    M_pad, N_pad, K_pad = _round_up(M, tm), _round_up(N, tn), _round_up(K, tk)

    xb = x.astype(jnp.bfloat16)
    wb = w.astype(jnp.bfloat16)
    bf = b.reshape(1, N).astype(jnp.float32)
    if (M_pad, K_pad) != (M, K):
        xb = jnp.pad(xb, ((0, M_pad - M), (0, K_pad - K)))
    if (K_pad, N_pad) != (K, N):
        wb = jnp.pad(wb, ((0, K_pad - K), (0, N_pad - N)))
    if N_pad != N:
        bf = jnp.pad(bf, ((0, 0), (0, N_pad - N)))

    out = pl.pallas_call(
        functools.partial(_matmul_kernel, relu=relu),
        out_shape=jax.ShapeDtypeStruct((M_pad, N_pad), out_dtype),
        grid=(M_pad // tm, N_pad // tn, K_pad // tk),
        in_specs=[
            pl.BlockSpec((tm, tk), lambda i, j, k: (i, k)),
            pl.BlockSpec((tk, tn), lambda i, j, k: (k, j)),
            pl.BlockSpec((1, tn), lambda i, j, k: (0, j)),
        ],
        out_specs=pl.BlockSpec((tm, tn), lambda i, j, k: (i, j)),
        scratch_shapes=[pltpu.VMEM((tm, tn), jnp.float32)],
        compiler_params=pltpu.CompilerParams(
            dimension_semantics=("parallel", "parallel", "arbitrary"),
            vmem_limit_bytes=VMEM_LIMIT,
        ),
    )(xb, wb, bf)
    if (M_pad, N_pad) != (M, N):
        out = out[:M, :N]
    return out


def _self_attn_kernel(x_ref, wq_ref, bq_ref, wk_ref, bk_ref, wv_ref, bv_ref,
                      wo_ref, bo_ref, g_ref, beta_ref, *rest, scale, causal, has_kpm):
    if has_kpm:
        kpm_ref, o_ref, acc_ref = rest
        kpm_row = kpm_ref[0]          # (1, Lk) additive key-padding row
    else:
        o_ref, acc_ref = rest
        kpm_row = None

    h = pl.program_id(1)

    @pl.when(h == 0)
    def _():
        acc_ref[...] = jnp.zeros_like(acc_ref)

    x = x_ref[0]                      # (L, d) bf16
    oh = _one_head_attention(x, x, wq_ref[0], bq_ref[0], wk_ref[0], bk_ref[0],
                             wv_ref[0], bv_ref[0], scale=scale, kpm_row=kpm_row,
                             causal=causal)                               # (L, dh)
    # accumulate this head's slice of the output projection
    acc_ref[...] += jnp.dot(oh.astype(jnp.bfloat16), wo_ref[0],
                            preferred_element_type=jnp.float32)           # (L, d)

    @pl.when(h == pl.num_programs(1) - 1)
    def _():
        y = acc_ref[...] + bo_ref[...] + x.astype(jnp.float32)            # residual
        o_ref[0] = _layer_norm_rows(y, g_ref[...], beta_ref[...]).astype(o_ref.dtype)


def self_attention_ln(x, p, ln_g, ln_b, *, nhead, causal=False, kpm_add=None):
    """Fused self-attention block: LN(x + Wo·Attn(QKV(x)) + bo). x: (N, L, d) bf16."""
    N, L, d = x.shape
    dh = d // nhead
    scale = 1.0 / math.sqrt(dh)

    args = [x.astype(jnp.bfloat16),
            p["wq"].astype(jnp.bfloat16), p["bq"].astype(jnp.float32),
            p["wk"].astype(jnp.bfloat16), p["bk"].astype(jnp.float32),
            p["wv"].astype(jnp.bfloat16), p["bv"].astype(jnp.float32),
            p["wo"].astype(jnp.bfloat16), p["bo"].reshape(1, d).astype(jnp.float32),
            ln_g.reshape(1, d).astype(jnp.float32), ln_b.reshape(1, d).astype(jnp.float32)]
    in_specs = [
        pl.BlockSpec((1, L, d), lambda b, h: (b, 0, 0)),
        pl.BlockSpec((1, d, dh), lambda b, h: (h, 0, 0)),
        pl.BlockSpec((1, 1, dh), lambda b, h: (h, 0, 0)),
        pl.BlockSpec((1, d, dh), lambda b, h: (h, 0, 0)),
        pl.BlockSpec((1, 1, dh), lambda b, h: (h, 0, 0)),
        pl.BlockSpec((1, d, dh), lambda b, h: (h, 0, 0)),
        pl.BlockSpec((1, 1, dh), lambda b, h: (h, 0, 0)),
        pl.BlockSpec((1, dh, d), lambda b, h: (h, 0, 0)),
        pl.BlockSpec((1, d), lambda b, h: (0, 0)),
        pl.BlockSpec((1, d), lambda b, h: (0, 0)),
        pl.BlockSpec((1, d), lambda b, h: (0, 0)),
    ]
    has_kpm = kpm_add is not None
    if has_kpm:
        args.append(kpm_add.astype(jnp.float32))                          # (N, 1, L)
        in_specs.append(pl.BlockSpec((1, 1, L), lambda b, h: (b, 0, 0)))

    return pl.pallas_call(
        functools.partial(_self_attn_kernel, scale=scale, causal=causal, has_kpm=has_kpm),
        out_shape=jax.ShapeDtypeStruct((N, L, d), jnp.bfloat16),
        grid=(N, nhead),
        in_specs=in_specs,
        out_specs=pl.BlockSpec((1, L, d), lambda b, h: (b, 0, 0)),
        scratch_shapes=[pltpu.VMEM((L, d), jnp.float32)],
        compiler_params=pltpu.CompilerParams(
            dimension_semantics=("parallel", "arbitrary"),
            vmem_limit_bytes=VMEM_LIMIT,
        ),
    )(*args)


def _cross_attn_kernel(x_ref, mem_ref, wq_ref, bq_ref, wk_ref, bk_ref, wv_ref, bv_ref,
                       wo_ref, bo_ref, g_ref, beta_ref, o_ref, acc_ref, *, scale):
    h = pl.program_id(1)

    @pl.when(h == 0)
    def _():
        acc_ref[...] = jnp.zeros_like(acc_ref)

    x = x_ref[0]                      # (Lq, d) bf16 (queries / residual)
    m = mem_ref[0]                    # (Lk, d) bf16 (encoder memory)
    oh = _one_head_attention(x, m, wq_ref[0], bq_ref[0], wk_ref[0], bk_ref[0],
                             wv_ref[0], bv_ref[0], scale=scale, kpm_row=None,
                             causal=False)                                # (Lq, dh)
    acc_ref[...] += jnp.dot(oh.astype(jnp.bfloat16), wo_ref[0],
                            preferred_element_type=jnp.float32)

    @pl.when(h == pl.num_programs(1) - 1)
    def _():
        y = acc_ref[...] + bo_ref[...] + x.astype(jnp.float32)
        o_ref[0] = _layer_norm_rows(y, g_ref[...], beta_ref[...]).astype(o_ref.dtype)


def cross_attention_ln(x, mem, p, ln_g, ln_b, *, nhead):
    """Fused cross-attention block: LN(x + Wo·Attn(Q(x), KV(mem)) + bo)."""
    N, Lq, d = x.shape
    Lk = mem.shape[1]
    dh = d // nhead
    scale = 1.0 / math.sqrt(dh)

    args = [x.astype(jnp.bfloat16), mem.astype(jnp.bfloat16),
            p["wq"].astype(jnp.bfloat16), p["bq"].astype(jnp.float32),
            p["wk"].astype(jnp.bfloat16), p["bk"].astype(jnp.float32),
            p["wv"].astype(jnp.bfloat16), p["bv"].astype(jnp.float32),
            p["wo"].astype(jnp.bfloat16), p["bo"].reshape(1, d).astype(jnp.float32),
            ln_g.reshape(1, d).astype(jnp.float32), ln_b.reshape(1, d).astype(jnp.float32)]
    in_specs = [
        pl.BlockSpec((1, Lq, d), lambda b, h: (b, 0, 0)),
        pl.BlockSpec((1, Lk, d), lambda b, h: (b, 0, 0)),
        pl.BlockSpec((1, d, dh), lambda b, h: (h, 0, 0)),
        pl.BlockSpec((1, 1, dh), lambda b, h: (h, 0, 0)),
        pl.BlockSpec((1, d, dh), lambda b, h: (h, 0, 0)),
        pl.BlockSpec((1, 1, dh), lambda b, h: (h, 0, 0)),
        pl.BlockSpec((1, d, dh), lambda b, h: (h, 0, 0)),
        pl.BlockSpec((1, 1, dh), lambda b, h: (h, 0, 0)),
        pl.BlockSpec((1, dh, d), lambda b, h: (h, 0, 0)),
        pl.BlockSpec((1, d), lambda b, h: (0, 0)),
        pl.BlockSpec((1, d), lambda b, h: (0, 0)),
        pl.BlockSpec((1, d), lambda b, h: (0, 0)),
    ]
    return pl.pallas_call(
        functools.partial(_cross_attn_kernel, scale=scale),
        out_shape=jax.ShapeDtypeStruct((N, Lq, d), jnp.bfloat16),
        grid=(N, nhead),
        in_specs=in_specs,
        out_specs=pl.BlockSpec((1, Lq, d), lambda b, h: (b, 0, 0)),
        scratch_shapes=[pltpu.VMEM((Lq, d), jnp.float32)],
        compiler_params=pltpu.CompilerParams(
            dimension_semantics=("parallel", "arbitrary"),
            vmem_limit_bytes=VMEM_LIMIT,
        ),
    )(*args)


def _ffn_ln_kernel(x_ref, w1_ref, b1_ref, w2_ref, b2_ref, g_ref, beta_ref, o_ref, acc_ref):
    @pl.when(pl.program_id(1) == 0)
    def _():
        acc_ref[...] = jnp.zeros_like(acc_ref)

    hid = jnp.dot(x_ref[...], w1_ref[...], preferred_element_type=jnp.float32) + b1_ref[...]
    hid = jnp.maximum(hid, 0.0)
    acc_ref[...] += jnp.dot(hid.astype(jnp.bfloat16), w2_ref[...],
                            preferred_element_type=jnp.float32)

    @pl.when(pl.program_id(1) == pl.num_programs(1) - 1)
    def _():
        y = acc_ref[...] + b2_ref[...] + x_ref[...].astype(jnp.float32)   # residual
        o_ref[...] = _layer_norm_rows(y, g_ref[...], beta_ref[...]).astype(o_ref.dtype)


def ffn_ln(x, p, ln_g, ln_b):
    """Fused FFN block: LN(x + relu(x@w1+b1)@w2 + b2), dff tiled as a reduction grid axis."""
    N, L, d = x.shape
    M = N * L
    dff = p["w1"].shape[1]
    x2 = x.reshape(M, d).astype(jnp.bfloat16)

    tm = _pick_tm(M)
    M_pad = _round_up(M, tm)
    if M_pad != M:
        x2 = jnp.pad(x2, ((0, M_pad - M), (0, 0)))
    tdff = min(512, _round_up(dff, 128))
    dff_pad = _round_up(dff, tdff)

    w1 = p["w1"].astype(jnp.bfloat16)
    b1 = p["b1"].reshape(1, dff).astype(jnp.float32)
    w2 = p["w2"].astype(jnp.bfloat16)
    if dff_pad != dff:
        w1 = jnp.pad(w1, ((0, 0), (0, dff_pad - dff)))
        b1 = jnp.pad(b1, ((0, 0), (0, dff_pad - dff)))
        w2 = jnp.pad(w2, ((0, dff_pad - dff), (0, 0)))
    b2 = p["b2"].reshape(1, d).astype(jnp.float32)
    g = ln_g.reshape(1, d).astype(jnp.float32)
    beta = ln_b.reshape(1, d).astype(jnp.float32)

    out = pl.pallas_call(
        _ffn_ln_kernel,
        out_shape=jax.ShapeDtypeStruct((M_pad, d), jnp.bfloat16),
        grid=(M_pad // tm, dff_pad // tdff),
        in_specs=[
            pl.BlockSpec((tm, d), lambda i, j: (i, 0)),
            pl.BlockSpec((d, tdff), lambda i, j: (0, j)),
            pl.BlockSpec((1, tdff), lambda i, j: (0, j)),
            pl.BlockSpec((tdff, d), lambda i, j: (j, 0)),
            pl.BlockSpec((1, d), lambda i, j: (0, 0)),
            pl.BlockSpec((1, d), lambda i, j: (0, 0)),
            pl.BlockSpec((1, d), lambda i, j: (0, 0)),
        ],
        out_specs=pl.BlockSpec((tm, d), lambda i, j: (i, 0)),
        scratch_shapes=[pltpu.VMEM((tm, d), jnp.float32)],
        compiler_params=pltpu.CompilerParams(
            dimension_semantics=("parallel", "arbitrary"),
            vmem_limit_bytes=VMEM_LIMIT,
        ),
    )(x2, w1, b1, w2, b2, g, beta)
    if M_pad != M:
        out = out[:M]
    return out.reshape(N, L, d)


def _ln_kernel(x_ref, g_ref, b_ref, o_ref):
    x = x_ref[...].astype(jnp.float32)
    o_ref[...] = _layer_norm_rows(x, g_ref[...], b_ref[...]).astype(o_ref.dtype)


def layer_norm(x, g, b):
    """Standalone LayerNorm (final encoder/decoder norms). bf16 in -> f32 math -> bf16 out."""
    shape = x.shape
    d = shape[-1]
    x2 = x.reshape(-1, d)
    M = x2.shape[0]
    tm = _pick_tm(M)
    M_pad = _round_up(M, tm)
    if M_pad != M:
        x2 = jnp.pad(x2, ((0, M_pad - M), (0, 0)))

    out = pl.pallas_call(
        _ln_kernel,
        out_shape=jax.ShapeDtypeStruct((M_pad, d), x.dtype),
        grid=(M_pad // tm,),
        in_specs=[pl.BlockSpec((tm, d), lambda i: (i, 0)),
                  pl.BlockSpec((1, d), lambda i: (0, 0)),
                  pl.BlockSpec((1, d), lambda i: (0, 0))],
        out_specs=pl.BlockSpec((tm, d), lambda i: (i, 0)),
        compiler_params=pltpu.CompilerParams(
            dimension_semantics=("parallel",),
            vmem_limit_bytes=VMEM_LIMIT,
        ),
    )(x2, g.reshape(1, d).astype(jnp.float32), b.reshape(1, d).astype(jnp.float32))
    if M_pad != M:
        out = out[:M]
    return out.reshape(shape)


# ----------------------------------------------------------------------------
# Model building blocks (glue in JAX, compute in the Pallas kernels above)
# ----------------------------------------------------------------------------
def conv2d_3x3_relu(x_nhwc, w_oihw, b):
    # TODO(synk): 3x3 backbone convs use XLA's conv_general_dilated (reviewer-recommended);
    #             the 1x1 d_model projection goes through the Pallas tiled matmul.
    w = w_oihw.transpose(2, 3, 1, 0)  # OIHW -> HWIO
    y = jax.lax.conv_general_dilated(
        x_nhwc, w, window_strides=(1, 1), padding="SAME",
        dimension_numbers=("NHWC", "HWIO", "NHWC"))
    return jnp.maximum(y + b, 0.0)


def max_pool_2x2(x):
    N, H, W, C = x.shape
    return x.reshape(N, H // 2, 2, W // 2, 2, C).max(axis=(2, 4))


def sinusoid_pe(max_len, d):
    pos = jnp.arange(max_len, dtype=jnp.float32)[:, None]
    div = jnp.exp(jnp.arange(0, d, 2, dtype=jnp.float32) * (-math.log(10000.0) / d))
    pe = jnp.zeros((max_len, d), jnp.float32)
    pe = pe.at[:, 0::2].set(jnp.sin(pos * div))
    pe = pe.at[:, 1::2].set(jnp.cos(pos * div))
    return pe  # (max_len, d)


def encoder_layer(x, p, nhead):
    x = self_attention_ln(x, p["self_attn"], p["ln1_g"], p["ln1_b"], nhead=nhead)
    x = ffn_ln(x, p["ff"], p["ln2_g"], p["ln2_b"])
    return x


def decoder_layer(x, mem, p, kpm_add, nhead):
    x = self_attention_ln(x, p["self_attn"], p["ln1_g"], p["ln1_b"],
                          nhead=nhead, causal=True, kpm_add=kpm_add)
    x = cross_attention_ln(x, mem, p["cross_attn"], p["ln2_g"], p["ln2_b"], nhead=nhead)
    x = ffn_ln(x, p["ff"], p["ln3_g"], p["ln3_b"])
    return x


def vietocr_forward(params, image, tgt_input, tgt_key_padding_mask, *, d_model, nhead):
    # ---- CNN backbone (NHWC) ----
    x = image.transpose(0, 2, 3, 1)                                   # NCHW -> NHWC
    x = conv2d_3x3_relu(x, params["conv1_w"], params["conv1_b"])
    x = max_pool_2x2(x)
    x = conv2d_3x3_relu(x, params["conv2_w"], params["conv2_b"])
    x = max_pool_2x2(x)
    N, Hc, Wc, Cin = x.shape
    w3 = params["conv3_w"].reshape(d_model, Cin).T                    # 1x1 conv -> d_model
    feat = linear(x.reshape(N * Hc * Wc, Cin), w3, params["conv3_b"], out_dtype=jnp.bfloat16)
    # (n,c,h,w): transpose(-1,-2) -> flatten(2) -> permute(-1,0,1) gives (w*h, n, c);
    # we keep the equivalent batch-first (n, w*h, c) layout internally.
    feat = feat.reshape(N, Hc, Wc, d_model).transpose(0, 2, 1, 3).reshape(N, Wc * Hc, d_model)

    S = feat.shape[1]
    T = tgt_input.shape[0]
    pe = params["pe"]                                                 # (max_len, d) f32
    sqrt_d = math.sqrt(d_model)

    # ---- LanguageTransformer ----
    src = (feat.astype(jnp.float32) * sqrt_d + pe[None, :S]).astype(jnp.bfloat16)      # (N, S, d)
    tgt = jnp.take(params["embed"], tgt_input, axis=0) * sqrt_d + pe[:T, None, :]       # (T, N, d)
    tgt = tgt.transpose(1, 0, 2).astype(jnp.bfloat16)                                   # (N, T, d)

    # Only the tiny (N, 1, T) additive key-padding row is materialized; the causal mask is
    # built in-kernel and the all-zero encoder / cross masks are dropped entirely.
    kpm_add = jnp.where(tgt_key_padding_mask, NEG_INF, 0.0).astype(jnp.float32)[:, None, :]

    mem = src
    for lp in params["enc_layers"]:
        mem = encoder_layer(mem, lp, nhead)
    mem = layer_norm(mem, params["enc_norm_g"], params["enc_norm_b"])

    out = tgt
    for lp in params["dec_layers"]:
        out = decoder_layer(out, mem, lp, kpm_add, nhead)
    out = layer_norm(out, params["dec_norm_g"], params["dec_norm_b"])

    # decoder output is already batch-first (N, T, d); fc -> (N, T, vocab)
    NB, TT, dd = out.shape
    logits = linear(out.reshape(NB * TT, dd), params["fc_w"], params["fc_b"],
                    out_dtype=jnp.float32)
    return logits.reshape(NB, TT, -1)


# ----------------------------------------------------------------------------
# Deterministic parameter construction (attention weights stored per-head so the
# fused kernels can BlockSpec-slice them without any in-kernel lane slicing)
# ----------------------------------------------------------------------------
def init_params(key, *, vocab_size, d_model, nhead, n_enc, n_dec, dim_ff, max_len):
    assert d_model % nhead == 0
    dh = d_model // nhead
    keys = iter(jax.random.split(key, 512))

    def nrm(shape, scale=0.05):
        return scale * jax.random.normal(next(keys), shape, jnp.float32)

    def attn_p():
        return {"wq": nrm((nhead, d_model, dh)), "bq": jnp.zeros((nhead, 1, dh)),
                "wk": nrm((nhead, d_model, dh)), "bk": jnp.zeros((nhead, 1, dh)),
                "wv": nrm((nhead, d_model, dh)), "bv": jnp.zeros((nhead, 1, dh)),
                "wo": nrm((nhead, dh, d_model)), "bo": jnp.zeros((1, d_model))}

    def ff_p():
        return {"w1": nrm((d_model, dim_ff)), "b1": jnp.zeros((dim_ff,)),
                "w2": nrm((dim_ff, d_model)), "b2": jnp.zeros((d_model,))}

    def enc_p():
        return {"self_attn": attn_p(), "ff": ff_p(),
                "ln1_g": jnp.ones((d_model,)), "ln1_b": jnp.zeros((d_model,)),
                "ln2_g": jnp.ones((d_model,)), "ln2_b": jnp.zeros((d_model,))}

    def dec_p():
        return {"self_attn": attn_p(), "cross_attn": attn_p(), "ff": ff_p(),
                "ln1_g": jnp.ones((d_model,)), "ln1_b": jnp.zeros((d_model,)),
                "ln2_g": jnp.ones((d_model,)), "ln2_b": jnp.zeros((d_model,)),
                "ln3_g": jnp.ones((d_model,)), "ln3_b": jnp.zeros((d_model,))}

    return {
        "conv1_w": nrm((8, 3, 3, 3)), "conv1_b": jnp.zeros((8,)),
        "conv2_w": nrm((16, 8, 3, 3)), "conv2_b": jnp.zeros((16,)),
        "conv3_w": nrm((d_model, 16, 1, 1)), "conv3_b": jnp.zeros((d_model,)),
        "embed": nrm((vocab_size, d_model)),
        "pe": sinusoid_pe(max_len, d_model),
        "enc_layers": [enc_p() for _ in range(n_enc)],
        "enc_norm_g": jnp.ones((d_model,)), "enc_norm_b": jnp.zeros((d_model,)),
        "dec_layers": [dec_p() for _ in range(n_dec)],
        "dec_norm_g": jnp.ones((d_model,)), "dec_norm_b": jnp.zeros((d_model,)),
        "fc_w": nrm((d_model, vocab_size)), "fc_b": jnp.zeros((vocab_size,)),
    }


if __name__ == "__main__":
    vocab_size = 64
    d_model, nhead, n_enc, n_dec, dim_ff, max_len = 128, 4, 1, 1, 256, 128
    T, N = 8, 2

    key = jax.random.PRNGKey(0)
    kimg, ktgt, kparams = jax.random.split(key, 3)

    image = jax.random.normal(kimg, (N, 3, 16, 32), jnp.float32)          # NCHW
    tgt_input = jax.random.randint(ktgt, (T, N), 0, vocab_size)           # (T, N) seq-first
    tgt_key_padding_mask = jnp.array(
        [[False] * 6 + [True] * 2, [False] * 8], dtype=jnp.bool_)         # (N, T)

    params = init_params(kparams, vocab_size=vocab_size, d_model=d_model, nhead=nhead,
                         n_enc=n_enc, n_dec=n_dec, dim_ff=dim_ff, max_len=max_len)

    fwd = jax.jit(functools.partial(vietocr_forward, d_model=d_model, nhead=nhead))
    logits = fwd(params, image, tgt_input, tgt_key_padding_mask)
    jax.block_until_ready(logits)

    assert logits.shape == (N, T, vocab_size), logits.shape
    assert bool(jnp.all(jnp.isfinite(logits)))
    print("KERNEL_OK")
</pallas_src>

<mosaic_0001>
module attributes {stable_mosaic.version = 11 : i64} {
  func.func @_matmul_kernel(%arg0: i32, %arg1: i32, %arg2: i32, %arg3: memref<32x16xbf16, #tpu.memory_space<vmem>>, %arg4: memref<16x128xbf16, #tpu.memory_space<vmem>>, %arg5: memref<1x128xf32, #tpu.memory_space<vmem>>, %arg6: memref<32x128xbf16, #tpu.memory_space<vmem>>, %arg7: memref<32x128xf32, #tpu.memory_space<vmem>>) attributes {dimension_semantics = [#tpu.dimension_semantics<parallel>, #tpu.dimension_semantics<parallel>, #tpu.dimension_semantics<arbitrary>], iteration_bounds = array<i64: 2, 1, 1>, scalar_prefetch = 0 : i64, scratch_operands = 1 : i64, tpu.core_type = #tpu.core_type<tc>, window_params = [{transform_indices = @transform_0, window_bounds = array<i64: 32, 16>}, {transform_indices = @transform_1, window_bounds = array<i64: 16, 128>}, {transform_indices = @transform_2, window_bounds = array<i64: 1, 128>}, {transform_indices = @transform_3, window_bounds = array<i64: 32, 128>}]} {
    %c0_i32 = arith.constant 0 : i32
    %0 = arith.cmpi eq, %arg2, %c0_i32 : i32
    %1 = arith.extui %0 : i1 to i32
    %c0_i32_0 = arith.constant 0 : i32
    %2 = arith.cmpi ne, %1, %c0_i32_0 : i32
    scf.if %2 {
      %cst_10 = arith.constant 0.000000e+00 : f32
      %12 = vector.broadcast %cst_10 : f32 to vector<32x128xf32>
      %c0_11 = arith.constant 0 : index
      %c0_12 = arith.constant 0 : index
      %13 = vector.load %arg7[%c0_11, %c0_12] : memref<32x128xf32, #tpu.memory_space<vmem>>, vector<32x128xf32>
      tpu.vector_store %arg7[%c0_11, %c0_12], %12 {strides = array<i32>} : memref<32x128xf32, #tpu.memory_space<vmem>>, vector<32x128xf32>,
    } else {
    }
    %c0 = arith.constant 0 : index
    %c0_1 = arith.constant 0 : index
    %3 = vector.load %arg7[%c0, %c0_1] : memref<32x128xf32, #tpu.memory_space<vmem>>, vector<32x128xf32>
    %c0_2 = arith.constant 0 : index
    %c0_3 = arith.constant 0 : index
    %4 = vector.load %arg3[%c0_2, %c0_3] : memref<32x16xbf16, #tpu.memory_space<vmem>>, vector<32x16xbf16>
    %c0_4 = arith.constant 0 : index
    %c0_5 = arith.constant 0 : index
    %5 = vector.load %arg4[%c0_4, %c0_5] : memref<16x128xbf16, #tpu.memory_space<vmem>>, vector<16x128xbf16>
    %cst = arith.constant dense<0.000000e+00> : vector<32x128xf32>
    %6 = tpu.matmul %4, %5, %cst {dimension_numbers = #tpu.dot_dimension_numbers<[1], [0], [0], [1], [0, 0, 1, 1], [], []>} : vector<32x16xbf16>, vector<16x128xbf16>, vector<32x128xf32> -> vector<32x128xf32>
    %7 = arith.addf %3, %6 : vector<32x128xf32>
    %c0_6 = arith.constant 0 : index
    %c0_7 = arith.constant 0 : index
    %8 = vector.load %arg7[%c0_6, %c0_7] : memref<32x128xf32, #tpu.memory_space<vmem>>, vector<32x128xf32>
    tpu.vector_store %arg7[%c0_6, %c0_7], %7 {strides = array<i32>} : memref<32x128xf32, #tpu.memory_space<vmem>>, vector<32x128xf32>,
    %c0_i32_8 = arith.constant 0 : i32
    %9 = arith.cmpi eq, %arg2, %c0_i32_8 : i32
    %10 = arith.extui %9 : i1 to i32
    %c0_i32_9 = arith.constant 0 : i32
    %11 = arith.cmpi ne, %10, %c0_i32_9 : i32
    scf.if %11 {
      %c0_10 = arith.constant 0 : index
      %c0_11 = arith.constant 0 : index
      %12 = vector.load %arg7[%c0_10, %c0_11] : memref<32x128xf32, #tpu.memory_space<vmem>>, vector<32x128xf32>
      %c0_12 = arith.constant 0 : index
      %c0_13 = arith.constant 0 : index
      %13 = vector.load %arg5[%c0_12, %c0_13] : memref<1x128xf32, #tpu.memory_space<vmem>>, vector<1x128xf32>
      %14 = vector.broadcast %13 : vector<1x128xf32> to vector<32x128xf32>
      %15 = arith.addf %12, %14 : vector<32x128xf32>
      %16 = arith.truncf %15 : vector<32x128xf32> to vector<32x128xbf16>
      %c0_14 = arith.constant 0 : index
      %c0_15 = arith.constant 0 : index
      %17 = vector.load %arg6[%c0_14, %c0_15] : memref<32x128xbf16, #tpu.memory_space<vmem>>, vector<32x128xbf16>
      tpu.vector_store %arg6[%c0_14, %c0_15], %16 {strides = array<i32>} : memref<32x128xbf16, #tpu.memory_space<vmem>>, vector<32x128xbf16>,
    } else {
    }
    return
  }
  func.func @transform_0(%arg0: i32, %arg1: i32, %arg2: i32) -> (i32, i32) {
    %c0_i32 = arith.constant 0 : i32
    return %arg0, %arg2 : i32, i32
  }
  func.func @transform_1(%arg0: i32, %arg1: i32, %arg2: i32) -> (i32, i32) {
    %c0_i32 = arith.constant 0 : i32
    return %arg2, %arg1 : i32, i32
  }
  func.func @transform_2(%arg0: i32, %arg1: i32, %arg2: i32) -> (i32, i32) {
    %c0_i32 = arith.constant 0 : i32
    %c0_i32_0 = arith.constant 0 : i32
    return %c0_i32, %arg1 : i32, i32
  }
  func.func @transform_3(%arg0: i32, %arg1: i32, %arg2: i32) -> (i32, i32) {
    %c0_i32 = arith.constant 0 : i32
    return %arg0, %arg1 : i32, i32
  }
}

module attributes {stable_mosaic.version = 11 : i64} {
  func.func @_self_attn_kernel(%arg0: i32, %arg1: i32, %arg2: memref<1x32x128xbf16, #tpu.memory_space<vmem>>, %arg3: memref<1x128x32xbf16, #tpu.memory_space<vmem>>, %arg4: memref<1x1x32xf32, #tpu.memory_space<vmem>>, %arg5: memref<1x128x32xbf16, #tpu.memory_space<vmem>>, %arg6: memref<1x1x32xf32, #tpu.memory_space<vmem>>, %arg7: memref<1x128x32xbf16, #tpu.memory_space<vmem>>, %arg8: memref<1x1x32xf32, #tpu.memory_space<vmem>>, %arg9: memref<1x32x128xbf16, #tpu.memory_space<vmem>>, %arg10: memref<1x128xf32, #tpu.memory_space<vmem>>, %arg11: memref<1x128xf32, #tpu.memory_space<vmem>>, %arg12: memref<1x128xf32, #tpu.memory_space<vmem>>, %arg13: memref<1x32x128xbf16, #tpu.memory_space<vmem>>, %arg14: memref<32x128xf32, #tpu.memory_space<vmem>>) attributes {dimension_semantics = [#tpu.dimension_semantics<parallel>, #tpu.dimension_semantics<arbitrary>], iteration_bounds = array<i64: 2, 4>, scalar_prefetch = 0 : i64, scratch_operands = 1 : i64, tpu.core_type = #tpu.core_type<tc>, window_params = [{transform_indices = @transform_0, window_bounds = array<i64: 1, 32, 128>}, {transform_indices = @transform_1, window_bounds = array<i64: 1, 128, 32>}, {transform_indices = @transform_2, window_bounds = array<i64: 1, 1, 32>}, {transform_indices = @transform_3, window_bounds = array<i64: 1, 128, 32>}, {transform_indices = @transform_4, window_bounds = array<i64: 1, 1, 32>}, {transform_indices = @transform_5, window_bounds = array<i64: 1, 128, 32>}, {transform_indices = @transform_6, window_bounds = array<i64: 1, 1, 32>}, {transform_indices = @transform_7, window_bounds = array<i64: 1, 32, 128>}, {pipeline_mode = #tpu.pipeline_mode<synchronous>, transform_indices = @transform_8, window_bounds = array<i64: 1, 128>}, {pipeline_mode = #tpu.pipeline_mode<synchronous>, transform_indices = @transform_9, window_bounds = array<i64: 1, 128>}, {pipeline_mode = #tpu.pipeline_mode<synchronous>, transform_indices = @transform_10, window_bounds = array<i64: 1, 128>}, {transform_indices = @transform_11, window_bounds = array<i64: 1, 32, 128>}]} {
    %c0_i32 = arith.constant 0 : i32
    %0 = arith.cmpi eq, %arg1, %c0_i32 : i32
    %1 = arith.extui %0 : i1 to i32
    %c0_i32_0 = arith.constant 0 : i32
    %2 = arith.cmpi ne, %1, %c0_i32_0 : i32
    scf.if %2 {
      %cst_37 = arith.constant 0.000000e+00 : f32
      %54 = vector.broadcast %cst_37 : f32 to vector<32x128xf32>
      %c0_38 = arith.constant 0 : index
      %c0_39 = arith.constant 0 : index
      %55 = vector.load %arg14[%c0_38, %c0_39] : memref<32x128xf32, #tpu.memory_space<vmem>>, vector<32x128xf32>
      tpu.vector_store %arg14[%c0_38, %c0_39], %54 {strides = array<i32>} : memref<32x128xf32, #tpu.memory_space<vmem>>, vector<32x128xf32>,
    } else {
    }
    %c0 = arith.constant 0 : index
    %c0_1 = arith.constant 0 : index
    %c0_2 = arith.constant 0 : index
    %3 = vector.load %arg2[%c0, %c0_1, %c0_2] : memref<1x32x128xbf16, #tpu.memory_space<vmem>>, vector<1x32x128xbf16>
    %4 = vector.shape_cast %3 : vector<1x32x128xbf16> to vector<32x128xbf16>
    %c0_3 = arith.constant 0 : index
    %c0_4 = arith.constant 0 : index
    %c0_5 = arith.constant 0 : index
    %5 = vector.load %arg3[%c0_3, %c0_4, %c0_5] : memref<1x128x32xbf16, #tpu.memory_space<vmem>>, vector<1x128x32xbf16>
    %6 = vector.shape_cast %5 : vector<1x128x32xbf16> to vector<128x32xbf16>
    %c0_6 = arith.constant 0 : index
    %c0_7 = arith.constant 0 : index
    %c0_8 = arith.constant 0 : index
    %7 = vector.load %arg4[%c0_6, %c0_7, %c0_8] : memref<1x1x32xf32, #tpu.memory_space<vmem>>, vector<1x1x32xf32>
    %8 = vector.shape_cast %7 : vector<1x1x32xf32> to vector<1x32xf32>
    %c0_9 = arith.constant 0 : index
    %c0_10 = arith.constant 0 : index
    %c0_11 = arith.constant 0 : index
    %9 = vector.load %arg5[%c0_9, %c0_10, %c0_11] : memref<1x128x32xbf16, #tpu.memory_space<vmem>>, vector<1x128x32xbf16>
    %10 = vector.shape_cast %9 : vector<1x128x32xbf16> to vector<128x32xbf16>
    %c0_12 = arith.constant 0 : index
    %c0_13 = arith.constant 0 : index
    %c0_14 = arith.constant 0 : index
    %11 = vector.load %arg6[%c0_12, %c0_13, %c0_14] : memref<1x1x32xf32, #tpu.memory_space<vmem>>, vector<1x1x32xf32>
    %12 = vector.shape_cast %11 : vector<1x1x32xf32> to vector<1x32xf32>
    %c0_15 = arith.constant 0 : index
    %c0_16 = arith.constant 0 : index
    %c0_17 = arith.constant 0 : index
    %13 = vector.load %arg7[%c0_15, %c0_16, %c0_17] : memref<1x128x32xbf16, #tpu.memory_space<vmem>>, vector<1x128x32xbf16>
    %14 = vector.shape_cast %13 : vector<1x128x32xbf16> to vector<128x32xbf16>
    %c0_18 = arith.constant 0 : index
    %c0_19 = arith.constant 0 : index
    %c0_20 = arith.constant 0 : index
    %15 = vector.load %arg8[%c0_18, %c0_19, %c0_20] : memref<1x1x32xf32, #tpu.memory_space<vmem>>, vector<1x1x32xf32>
    %16 = vector.shape_cast %15 : vector<1x1x32xf32> to vector<1x32xf32>
    %cst = arith.constant dense<0.000000e+00> : vector<32x32xf32>
    %17 = tpu.matmul %4, %6, %cst {dimension_numbers = #tpu.dot_dimension_numbers<[1], [0], [0], [1], [0, 0, 1, 1], [], []>} : vector<32x128xbf16>, vector<128x32xbf16>, vector<32x32xf32> -> vector<32x32xf32>
    %18 = vector.broadcast %8 : vector<1x32xf32> to vector<32x32xf32>
    %19 = arith.addf %17, %18 : vector<32x32xf32>
    %20 = arith.truncf %19 : vector<32x32xf32> to vector<32x32xbf16>
    %cst_21 = arith.constant dense<0.000000e+00> : vector<32x32xf32>
    %21 = tpu.matmul %4, %10, %cst_21 {dimension_numbers = #tpu.dot_dimension_numbers<[1], [0], [0], [1], [0, 0, 1, 1], [], []>} : vector<32x128xbf16>, vector<128x32xbf16>, vector<32x32xf32> -> vector<32x32xf32>
    %22 = vector.broadcast %12 : vector<1x32xf32> to vector<32x32xf32>
    %23 = arith.addf %21, %22 : vector<32x32xf32>
    %24 = arith.truncf %23 : vector<32x32xf32> to vector<32x32xbf16>
    %cst_22 = arith.constant dense<0.000000e+00> : vector<32x32xf32>
    %25 = tpu.matmul %4, %14, %cst_22 {dimension_numbers = #tpu.dot_dimension_numbers<[1], [0], [0], [1], [0, 0, 1, 1], [], []>} : vector<32x128xbf16>, vector<128x32xbf16>, vector<32x32xf32> -> vector<32x32xf32>
    %26 = vector.broadcast %16 : vector<1x32xf32> to vector<32x32xf32>
    %27 = arith.addf %25, %26 : vector<32x32xf32>
    %28 = arith.truncf %27 : vector<32x32xf32> to vector<32x32xbf16>
    %cst_23 = arith.constant dense<0.000000e+00> : vector<32x32xf32>
    %29 = tpu.matmul %20, %24, %cst_23 {dimension_numbers = #tpu.dot_dimension_numbers<[1], [1], [0], [0], [0, 0, 1, 0], [], []>} : vector<32x32xbf16>, vector<32x32xbf16>, vector<32x32xf32> -> vector<32x32xf32>
    %cst_24 = arith.constant 0.176776692 : f32
    %30 = vector.broadcast %cst_24 : f32 to vector<32x32xf32>
    %31 = arith.mulf %29, %30 : vector<32x32xf32>
    %cst_25 = arith.constant dense<0xFF800000> : vector<32xf32>
    %32 = vector.multi_reduction <maximumf>, %31, %cst_25 [1] : vector<32x32xf32> to vector<32xf32>
    %33 = vector.shape_cast %32 : vector<32xf32> to vector<32x1xf32>
    %34 = vector.broadcast %33 : vector<32x1xf32> to vector<32x32xf32>
    %35 = arith.subf %31, %34 : vector<32x32xf32>
    %36 = math.exp %35 : vector<32x32xf32>
    %cst_26 = arith.constant dense<0.000000e+00> : vector<32xf32>
    %37 = vector.multi_reduction <add>, %36, %cst_26 [1] : vector<32x32xf32> to vector<32xf32>
    %38 = vector.shape_cast %37 : vector<32xf32> to vector<32x1xf32>
    %39 = tpu.reciprocal %38 {approx = true} : vector<32x1xf32> -> vector<32x1xf32>
    %40 = vector.broadcast %39 : vector<32x1xf32> to vector<32x32xf32>
    %41 = arith.mulf %36, %40 : vector<32x32xf32>
    %42 = arith.truncf %41 : vector<32x32xf32> to vector<32x32xbf16>
    %cst_27 = arith.constant dense<0.000000e+00> : vector<32x32xf32>
    %43 = tpu.matmul %42, %28, %cst_27 {dimension_numbers = #tpu.dot_dimension_numbers<[1], [0], [0], [1], [0, 0, 1, 1], [], []>} : vector<32x32xbf16>, vector<32x32xbf16>, vector<32x32xf32> -> vector<32x32xf32>
    %c0_28 = arith.constant 0 : index
    %c0_29 = arith.constant 0 : index
    %44 = vector.load %arg14[%c0_28, %c0_29] : memref<32x128xf32, #tpu.memory_space<vmem>>, vector<32x128xf32>
    %45 = arith.truncf %43 : vector<32x32xf32> to vector<32x32xbf16>
    %c0_30 = arith.constant 0 : index
    %c0_31 = arith.constant 0 : index
    %c0_32 = arith.constant 0 : index
    %46 = vector.load %arg9[%c0_30, %c0_31, %c0_32] : memref<1x32x128xbf16, #tpu.memory_space<vmem>>, vector<1x32x128xbf16>
    %47 = vector.shape_cast %46 : vector<1x32x128xbf16> to vector<32x128xbf16>
    %cst_33 = arith.constant dense<0.000000e+00> : vector<32x128xf32>
    %48 = tpu.matmul %45, %47, %cst_33 {dimension_numbers = #tpu.dot_dimension_numbers<[1], [0], [0], [1], [0, 0, 1, 1], [], []>} : vector<32x32xbf16>, vector<32x128xbf16>, vector<32x128xf32> -> vector<32x128xf32>
    %49 = arith.addf %44, %48 : vector<32x128xf32>
    %c0_34 = arith.constant 0 : index
    %c0_35 = arith.constant 0 : index
    %50 = vector.load %arg14[%c0_34, %c0_35] : memref<32x128xf32, #tpu.memory_space<vmem>>, vector<32x128xf32>
    tpu.vector_store %arg14[%c0_34, %c0_35], %49 {strides = array<i32>} : memref<32x128xf32, #tpu.memory_space<vmem>>, vector<32x128xf32>,
    %c3_i32 = arith.constant 3 : i32
    %51 = arith.cmpi eq, %arg1, %c3_i32 : i32
    %52 = arith.extui %51 : i1 to i32
    %c0_i32_36 = arith.constant 0 : i32
    %53 = arith.cmpi ne, %52, %c0_i32_36 : i32
    scf.if %53 {
      %c0_37 = arith.constant 0 : index
      %c0_38 = arith.constant 0 : index
      %54 = vector.load %arg14[%c0_37, %c0_38] : memref<32x128xf32, #tpu.memory_space<vmem>>, vector<32x128xf32>
      %c0_39 = arith.constant 0 : index
      %c0_40 = arith.constant 0 : index
      %55 = vector.load %arg10[%c0_39, %c0_40] : memref<1x128xf32, #tpu.memory_space<vmem>>, vector<1x128xf32>
      %56 = vector.broadcast %55 : vector<1x128xf32> to vector<32x128xf32>
      %57 = arith.addf %54, %56 : vector<32x128xf32>
      %58 = arith.extf %4 : vector<32x128xbf16> to vector<32x128xf32>
      %59 = arith.addf %57, %58 : vector<32x128xf32>
      %c0_41 = arith.constant 0 : index
      %c0_42 = arith.constant 0 : index
      %60 = vector.load %arg11[%c0_41, %c0_42] : memref<1x128xf32, #tpu.memory_space<vmem>>, vector<1x128xf32>
      %c0_43 = arith.constant 0 : index
      %c0_44 = arith.constant 0 : index
      %61 = vector.load %arg12[%c0_43, %c0_44] : memref<1x128xf32, #tpu.memory_space<vmem>>, vector<1x128xf32>
      %cst_45 = arith.constant dense<0.000000e+00> : vector<32xf32>
      %62 = vector.multi_reduction <add>, %59, %cst_45 [1] : vector<32x128xf32> to vector<32xf32>
      %63 = vector.shape_cast %62 : vector<32xf32> to vector<32x1xf32>
      %cst_46 = arith.constant 1.280000e+02 : f32
      %64 = vector.broadcast %cst_46 : f32 to vector<32x1xf32>
      %65 = arith.divf %63, %64 : vector<32x1xf32>
      %66 = vector.broadcast %65 : vector<32x1xf32> to vector<32x128xf32>
      %67 = arith.subf %59, %66 : vector<32x128xf32>
      %68 = arith.mulf %67, %67 : vector<32x128xf32>
      %cst_47 = arith.constant dense<0.000000e+00> : vector<32xf32>
      %69 = vector.multi_reduction <add>, %68, %cst_47 [1] : vector<32x128xf32> to vector<32xf32>
      %70 = vector.shape_cast %69 : vector<32xf32> to vector<32x1xf32>
      %cst_48 = arith.constant 1.280000e+02 : f32
      %71 = vector.broadcast %cst_48 : f32 to vector<32x1xf32>
      %72 = arith.divf %70, %71 : vector<32x1xf32>
      %73 = vector.broadcast %65 : vector<32x1xf32> to vector<32x128xf32>
      %74 = arith.subf %59, %73 : vector<32x128xf32>
      %cst_49 = arith.constant 9.99999974E-6 : f32
      %75 = vector.broadcast %cst_49 : f32 to vector<32x1xf32>
      %76 = arith.addf %72, %75 : vector<32x1xf32>
      %77 = math.rsqrt %76 : vector<32x1xf32>
      %78 = vector.broadcast %77 : vector<32x1xf32> to vector<32x128xf32>
      %79 = arith.mulf %74, %78 : vector<32x128xf32>
      %80 = vector.broadcast %60 : vector<1x128xf32> to vector<32x128xf32>
      %81 = arith.mulf %79, %80 : vector<32x128xf32>
      %82 = vector.broadcast %61 : vector<1x128xf32> to vector<32x128xf32>
      %83 = arith.addf %81, %82 : vector<32x128xf32>
      %84 = arith.truncf %83 : vector<32x128xf32> to vector<32x128xbf16>
      %c0_50 = arith.constant 0 : index
      %c0_51 = arith.constant 0 : index
      %c0_52 = arith.constant 0 : index
      %85 = vector.load %arg13[%c0_50, %c0_51, %c0_52] : memref<1x32x128xbf16, #tpu.memory_space<vmem>>, vector<1x32x128xbf16>
      %86 = vector.shape_cast %85 : vector<1x32x128xbf16> to vector<32x128xbf16>
      %87 = vector.shape_cast %84 : vector<32x128xbf16> to vector<1x32x128xbf16>
      tpu.vector_store %arg13[%c0_50, %c0_51, %c0_52], %87 {strides = array<i32>} : memref<1x32x128xbf16, #tpu.memory_space<vmem>>, vector<1x32x128xbf16>,
    } else {
    }
    return
  }
  func.func @transform_0(%arg0: i32, %arg1: i32) -> (i32, i32, i32) {
    %c0_i32 = arith.constant 0 : i32
    %c0_i32_0 = arith.constant 0 : i32
    %c0_i32_1 = arith.constant 0 : i32
    return %arg0, %c0_i32, %c0_i32_0 : i32, i32, i32
  }
  func.func @transform_1(%arg0: i32, %arg1: i32) -> (i32, i32, i32) {
    %c0_i32 = arith.constant 0 : i32
    %c0_i32_0 = arith.constant 0 : i32
    %c0_i32_1 = arith.constant 0 : i32
    return %arg1, %c0_i32, %c0_i32_0 : i32, i32, i32
  }
  func.func @transform_2(%arg0: i32, %arg1: i32) -> (i32, i32, i32) {
    %c0_i32 = arith.constant 0 : i32
    %c0_i32_0 = arith.constant 0 : i32
    %c0_i32_1 = arith.constant 0 : i32
    return %arg1, %c0_i32, %c0_i32_0 : i32, i32, i32
  }
  func.func @transform_3(%arg0: i32, %arg1: i32) -> (i32, i32, i32) {
    %c0_i32 = arith.constant 0 : i32
    %c0_i32_0 = arith.constant 0 : i32
    %c0_i32_1 = arith.constant 0 : i32
    return %arg1, %c0_i32, %c0_i32_0 : i32, i32, i32
  }
  func.func @transform_4(%arg0: i32, %arg1: i32) -> (i32, i32, i32) {
    %c0_i32 = arith.constant 0 : i32
    %c0_i32_0 = arith.constant 0 : i32
    %c0_i32_1 = arith.constant 0 : i32
    return %arg1, %c0_i32, %c0_i32_0 : i32, i32, i32
  }
  func.func @transform_5(%arg0: i32, %arg1: i32) -> (i32, i32, i32) {
    %c0_i32 = arith.constant 0 : i32
    %c0_i32_0 = arith.constant 0 : i32
    %c0_i32_1 = arith.constant 0 : i32
    return %arg1, %c0_i32, %c0_i32_0 : i32, i32, i32
  }
  func.func @transform_6(%arg0: i32, %arg1: i32) -> (i32, i32, i32) {
    %c0_i32 = arith.constant 0 : i32
    %c0_i32_0 = arith.constant 0 : i32
    %c0_i32_1 = arith.constant 0 : i32
    return %arg1, %c0_i32, %c0_i32_0 : i32, i32, i32
  }
  func.func @transform_7(%arg0: i32, %arg1: i32) -> (i32, i32, i32) {
    %c0_i32 = arith.constant 0 : i32
    %c0_i32_0 = arith.constant 0 : i32
    %c0_i32_1 = arith.constant 0 : i32
    return %arg1, %c0_i32, %c0_i32_0 : i32, i32, i32
  }
  func.func @transform_8(%arg0: i32, %arg1: i32) -> (i32, i32) {
    %c0_i32 = arith.constant 0 : i32
    %c0_i32_0 = arith.constant 0 : i32
    %c0_i32_1 = arith.constant 0 : i32
    return %c0_i32, %c0_i32_0 : i32, i32
  }
  func.func @transform_9(%arg0: i32, %arg1: i32) -> (i32, i32) {
    %c0_i32 = arith.constant 0 : i32
    %c0_i32_0 = arith.constant 0 : i32
    %c0_i32_1 = arith.constant 0 : i32
    return %c0_i32, %c0_i32_0 : i32, i32
  }
  func.func @transform_10(%arg0: i32, %arg1: i32) -> (i32, i32) {
    %c0_i32 = arith.constant 0 : i32
    %c0_i32_0 = arith.constant 0 : i32
    %c0_i32_1 = arith.constant 0 : i32
    return %c0_i32, %c0_i32_0 : i32, i32
  }
  func.func @transform_11(%arg0: i32, %arg1: i32) -> (i32, i32, i32) {
    %c0_i32 = arith.constant 0 : i32
    %c0_i32_0 = arith.constant 0 : i32
    %c0_i32_1 = arith.constant 0 : i32
    return %arg0, %c0_i32, %c0_i32_0 : i32, i32, i32
  }
}

module attributes {stable_mosaic.version = 11 : i64} {
  func.func @_ffn_ln_kernel(%arg0: i32, %arg1: i32, %arg2: memref<32x128xbf16, #tpu.memory_space<vmem>>, %arg3: memref<128x256xbf16, #tpu.memory_space<vmem>>, %arg4: memref<1x256xf32, #tpu.memory_space<vmem>>, %arg5: memref<256x128xbf16, #tpu.memory_space<vmem>>, %arg6: memref<1x128xf32, #tpu.memory_space<vmem>>, %arg7: memref<1x128xf32, #tpu.memory_space<vmem>>, %arg8: memref<1x128xf32, #tpu.memory_space<vmem>>, %arg9: memref<32x128xbf16, #tpu.memory_space<vmem>>, %arg10: memref<32x128xf32, #tpu.memory_space<vmem>>) attributes {dimension_semantics = [#tpu.dimension_semantics<parallel>, #tpu.dimension_semantics<arbitrary>], iteration_bounds = array<i64: 2, 1>, scalar_prefetch = 0 : i64, scratch_operands = 1 : i64, tpu.core_type = #tpu.core_type<tc>, window_params = [{transform_indices = @transform_0, window_bounds = array<i64: 32, 128>}, {transform_indices = @transform_1, window_bounds = array<i64: 128, 256>}, {transform_indices = @transform_2, window_bounds = array<i64: 1, 256>}, {transform_indices = @transform_3, window_bounds = array<i64: 256, 128>}, {pipeline_mode = #tpu.pipeline_mode<synchronous>, transform_indices = @transform_4, window_bounds = array<i64: 1, 128>}, {pipeline_mode = #tpu.pipeline_mode<synchronous>, transform_indices = @transform_5, window_bounds = array<i64: 1, 128>}, {pipeline_mode = #tpu.pipeline_mode<synchronous>, transform_indices = @transform_6, window_bounds = array<i64: 1, 128>}, {transform_indices = @transform_7, window_bounds = array<i64: 32, 128>}]} {
    %c0_i32 = arith.constant 0 : i32
    %0 = arith.cmpi eq, %arg1, %c0_i32 : i32
    %1 = arith.extui %0 : i1 to i32
    %c0_i32_0 = arith.constant 0 : i32
    %2 = arith.cmpi ne, %1, %c0_i32_0 : i32
    scf.if %2 {
      %cst_16 = arith.constant 0.000000e+00 : f32
      %20 = vector.broadcast %cst_16 : f32 to vector<32x128xf32>
      %c0_17 = arith.constant 0 : index
      %c0_18 = arith.constant 0 : index
      %21 = vector.load %arg10[%c0_17, %c0_18] : memref<32x128xf32, #tpu.memory_space<vmem>>, vector<32x128xf32>
      tpu.vector_store %arg10[%c0_17, %c0_18], %20 {strides = array<i32>} : memref<32x128xf32, #tpu.memory_space<vmem>>, vector<32x128xf32>,
    } else {
    }
    %c0 = arith.constant 0 : index
    %c0_1 = arith.constant 0 : index
    %3 = vector.load %arg2[%c0, %c0_1] : memref<32x128xbf16, #tpu.memory_space<vmem>>, vector<32x128xbf16>
    %c0_2 = arith.constant 0 : index
    %c0_3 = arith.constant 0 : index
    %4 = vector.load %arg3[%c0_2, %c0_3] : memref<128x256xbf16, #tpu.memory_space<vmem>>, vector<128x256xbf16>
    %cst = arith.constant dense<0.000000e+00> : vector<32x256xf32>
    %5 = tpu.matmul %3, %4, %cst {dimension_numbers = #tpu.dot_dimension_numbers<[1], [0], [0], [1], [0, 0, 1, 1], [], []>} : vector<32x128xbf16>, vector<128x256xbf16>, vector<32x256xf32> -> vector<32x256xf32>
    %c0_4 = arith.constant 0 : index
    %c0_5 = arith.constant 0 : index
    %6 = vector.load %arg4[%c0_4, %c0_5] : memref<1x256xf32, #tpu.memory_space<vmem>>, vector<1x256xf32>
    %7 = vector.broadcast %6 : vector<1x256xf32> to vector<32x256xf32>
    %8 = arith.addf %5, %7 : vector<32x256xf32>
    %cst_6 = arith.constant 0.000000e+00 : f32
    %9 = vector.broadcast %cst_6 : f32 to vector<32x256xf32>
    %10 = arith.maximumf %8, %9 : vector<32x256xf32>
    %c0_7 = arith.constant 0 : index
    %c0_8 = arith.constant 0 : index
    %11 = vector.load %arg10[%c0_7, %c0_8] : memref<32x128xf32, #tpu.memory_space<vmem>>, vector<32x128xf32>
    %12 = arith.truncf %10 : vector<32x256xf32> to vector<32x256xbf16>
    %c0_9 = arith.constant 0 : index
    %c0_10 = arith.constant 0 : index
    %13 = vector.load %arg5[%c0_9, %c0_10] : memref<256x128xbf16, #tpu.memory_space<vmem>>, vector<256x128xbf16>
    %cst_11 = arith.constant dense<0.000000e+00> : vector<32x128xf32>
    %14 = tpu.matmul %12, %13, %cst_11 {dimension_numbers = #tpu.dot_dimension_numbers<[1], [0], [0], [1], [0, 0, 1, 1], [], []>} : vector<32x256xbf16>, vector<256x128xbf16>, vector<32x128xf32> -> vector<32x128xf32>
    %15 = arith.addf %11, %14 : vector<32x128xf32>
    %c0_12 = arith.constant 0 : index
    %c0_13 = arith.constant 0 : index
    %16 = vector.load %arg10[%c0_12, %c0_13] : memref<32x128xf32, #tpu.memory_space<vmem>>, vector<32x128xf32>
    tpu.vector_store %arg10[%c0_12, %c0_13], %15 {strides = array<i32>} : memref<32x128xf32, #tpu.memory_space<vmem>>, vector<32x128xf32>,
    %c0_i32_14 = arith.constant 0 : i32
    %17 = arith.cmpi eq, %arg1, %c0_i32_14 : i32
    %18 = arith.extui %17 : i1 to i32
    %c0_i32_15 = arith.constant 0 : i32
    %19 = arith.cmpi ne, %18, %c0_i32_15 : i32
    scf.if %19 {
      %c0_16 = arith.constant 0 : index
      %c0_17 = arith.constant 0 : index
      %20 = vector.load %arg10[%c0_16, %c0_17] : memref<32x128xf32, #tpu.memory_space<vmem>>, vector<32x128xf32>
      %c0_18 = arith.constant 0 : index
      %c0_19 = arith.constant 0 : index
      %21 = vector.load %arg6[%c0_18, %c0_19] : memref<1x128xf32, #tpu.memory_space<vmem>>, vector<1x128xf32>
      %22 = vector.broadcast %21 : vector<1x128xf32> to vector<32x128xf32>
      %23 = arith.addf %20, %22 : vector<32x128xf32>
      %c0_20 = arith.constant 0 : index
      %c0_21 = arith.constant 0 : index
      %24 = vector.load %arg2[%c0_20, %c0_21] : memref<32x128xbf16, #tpu.memory_space<vmem>>, vector<32x128xbf16>
      %25 = arith.extf %24 : vector<32x128xbf16> to vector<32x128xf32>
      %26 = arith.addf %23, %25 : vector<32x128xf32>
      %c0_22 = arith.constant 0 : index
      %c0_23 = arith.constant 0 : index
      %27 = vector.load %arg7[%c0_22, %c0_23] : memref<1x128xf32, #tpu.memory_space<vmem>>, vector<1x128xf32>
      %c0_24 = arith.constant 0 : index
      %c0_25 = arith.constant 0 : index
      %28 = vector.load %arg8[%c0_24, %c0_25] : memref<1x128xf32, #tpu.memory_space<vmem>>, vector<1x128xf32>
      %cst_26 = arith.constant dense<0.000000e+00> : vector<32xf32>
      %29 = vector.multi_reduction <add>, %26, %cst_26 [1] : vector<32x128xf32> to vector<32xf32>
      %30 = vector.shape_cast %29 : vector<32xf32> to vector<32x1xf32>
      %cst_27 = arith.constant 1.280000e+02 : f32
      %31 = vector.broadcast %cst_27 : f32 to vector<32x1xf32>
      %32 = arith.divf %30, %31 : vector<32x1xf32>
      %33 = vector.broadcast %32 : vector<32x1xf32> to vector<32x128xf32>
      %34 = arith.subf %26, %33 : vector<32x128xf32>
      %35 = arith.mulf %34, %34 : vector<32x128xf32>
      %cst_28 = arith.constant dense<0.000000e+00> : vector<32xf32>
      %36 = vector.multi_reduction <add>, %35, %cst_28 [1] : vector<32x128xf32> to vector<32xf32>
      %37 = vector.shape_cast %36 : vector<32xf32> to vector<32x1xf32>
      %cst_29 = arith.constant 1.280000e+02 : f32
      %38 = vector.broadcast %cst_29 : f32 to vector<32x1xf32>
      %39 = arith.divf %37, %38 : vector<32x1xf32>
      %40 = vector.broadcast %32 : vector<32x1xf32> to vector<32x128xf32>
      %41 = arith.subf %26, %40 : vector<32x128xf32>
      %cst_30 = arith.constant 9.99999974E-6 : f32
      %42 = vector.broadcast %cst_30 : f32 to vector<32x1xf32>
      %43 = arith.addf %39, %42 : vector<32x1xf32>
      %44 = math.rsqrt %43 : vector<32x1xf32>
      %45 = vector.broadcast %44 : vector<32x1xf32> to vector<32x128xf32>
      %46 = arith.mulf %41, %45 : vector<32x128xf32>
      %47 = vector.broadcast %27 : vector<1x128xf32> to vector<32x128xf32>
      %48 = arith.mulf %46, %47 : vector<32x128xf32>
      %49 = vector.broadcast %28 : vector<1x128xf32> to vector<32x128xf32>
      %50 = arith.addf %48, %49 : vector<32x128xf32>
      %51 = arith.truncf %50 : vector<32x128xf32> to vector<32x128xbf16>
      %c0_31 = arith.constant 0 : index
      %c0_32 = arith.constant 0 : index
      %52 = vector.load %arg9[%c0_31, %c0_32] : memref<32x128xbf16, #tpu.memory_space<vmem>>, vector<32x128xbf16>
      tpu.vector_store %arg9[%c0_31, %c0_32], %51 {strides = array<i32>} : memref<32x128xbf16, #tpu.memory_space<vmem>>, vector<32x128xbf16>,
    } else {
    }
    return
  }
  func.func @transform_0(%arg0: i32, %arg1: i32) -> (i32, i32) {
    %c0_i32 = arith.constant 0 : i32
    %c0_i32_0 = arith.constant 0 : i32
    return %arg0, %c0_i32 : i32, i32
  }
  func.func @transform_1(%arg0: i32, %arg1: i32) -> (i32, i32) {
    %c0_i32 = arith.constant 0 : i32
    %c0_i32_0 = arith.constant 0 : i32
    return %c0_i32, %arg1 : i32, i32
  }
  func.func @transform_2(%arg0: i32, %arg1: i32) -> (i32, i32) {
    %c0_i32 = arith.constant 0 : i32
    %c0_i32_0 = arith.constant 0 : i32
    return %c0_i32, %arg1 : i32, i32
  }
  func.func @transform_3(%arg0: i32, %arg1: i32) -> (i32, i32) {
    %c0_i32 = arith.constant 0 : i32
    %c0_i32_0 = arith.constant 0 : i32
    return %arg1, %c0_i32 : i32, i32
  }
  func.func @transform_4(%arg0: i32, %arg1: i32) -> (i32, i32) {
    %c0_i32 = arith.constant 0 : i32
    %c0_i32_0 = arith.constant 0 : i32
    %c0_i32_1 = arith.constant 0 : i32
    return %c0_i32, %c0_i32_0 : i32, i32
  }
  func.func @transform_5(%arg0: i32, %arg1: i32) -> (i32, i32) {
    %c0_i32 = arith.constant 0 : i32
    %c0_i32_0 = arith.constant 0 : i32
    %c0_i32_1 = arith.constant 0 : i32
    return %c0_i32, %c0_i32_0 : i32, i32
  }
  func.func @transform_6(%arg0: i32, %arg1: i32) -> (i32, i32) {
    %c0_i32 = arith.constant 0 : i32
    %c0_i32_0 = arith.constant 0 : i32
    %c0_i32_1 = arith.constant 0 : i32
    return %c0_i32, %c0_i32_0 : i32, i32
  }
  func.func @transform_7(%arg0: i32, %arg1: i32) -> (i32, i32) {
    %c0_i32 = arith.constant 0 : i32
    %c0_i32_0 = arith.constant 0 : i32
    return %arg0, %c0_i32 : i32, i32
  }
}

module attributes {stable_mosaic.version = 11 : i64} {
  func.func @_ln_kernel(%arg0: i32, %arg1: memref<32x128xbf16, #tpu.memory_space<vmem>>, %arg2: memref<1x128xf32, #tpu.memory_space<vmem>>, %arg3: memref<1x128xf32, #tpu.memory_space<vmem>>, %arg4: memref<32x128xbf16, #tpu.memory_space<vmem>>) attributes {dimension_semantics = [#tpu.dimension_semantics<parallel>], iteration_bounds = array<i64: 2>, scalar_prefetch = 0 : i64, scratch_operands = 0 : i64, tpu.core_type = #tpu.core_type<tc>, window_params = [{transform_indices = @transform_0, window_bounds = array<i64: 32, 128>}, {pipeline_mode = #tpu.pipeline_mode<synchronous>, transform_indices = @transform_1, window_bounds = array<i64: 1, 128>}, {pipeline_mode = #tpu.pipeline_mode<synchronous>, transform_indices = @transform_2, window_bounds = array<i64: 1, 128>}, {transform_indices = @transform_3, window_bounds = array<i64: 32, 128>}]} {
    %c0 = arith.constant 0 : index
    %c0_0 = arith.constant 0 : index
    %0 = vector.load %arg1[%c0, %c0_0] : memref<32x128xbf16, #tpu.memory_space<vmem>>, vector<32x128xbf16>
    %1 = arith.extf %0 : vector<32x128xbf16> to vector<32x128xf32>
    %c0_1 = arith.constant 0 : index
    %c0_2 = arith.constant 0 : index
    %2 = vector.load %arg2[%c0_1, %c0_2] : memref<1x128xf32, #tpu.memory_space<vmem>>, vector<1x128xf32>
    %c0_3 = arith.constant 0 : index
    %c0_4 = arith.constant 0 : index
    %3 = vector.load %arg3[%c0_3, %c0_4] : memref<1x128xf32, #tpu.memory_space<vmem>>, vector<1x128xf32>
    %cst = arith.constant dense<0.000000e+00> : vector<32xf32>
    %4 = vector.multi_reduction <add>, %1, %cst [1] : vector<32x128xf32> to vector<32xf32>
    %5 = vector.shape_cast %4 : vector<32xf32> to vector<32x1xf32>
    %cst_5 = arith.constant 1.280000e+02 : f32
    %6 = vector.broadcast %cst_5 : f32 to vector<32x1xf32>
    %7 = arith.divf %5, %6 : vector<32x1xf32>
    %8 = vector.broadcast %7 : vector<32x1xf32> to vector<32x128xf32>
    %9 = arith.subf %1, %8 : vector<32x128xf32>
    %10 = arith.mulf %9, %9 : vector<32x128xf32>
    %cst_6 = arith.constant dense<0.000000e+00> : vector<32xf32>
    %11 = vector.multi_reduction <add>, %10, %cst_6 [1] : vector<32x128xf32> to vector<32xf32>
    %12 = vector.shape_cast %11 : vector<32xf32> to vector<32x1xf32>
    %cst_7 = arith.constant 1.280000e+02 : f32
    %13 = vector.broadcast %cst_7 : f32 to vector<32x1xf32>
    %14 = arith.divf %12, %13 : vector<32x1xf32>
    %15 = vector.broadcast %7 : vector<32x1xf32> to vector<32x128xf32>
    %16 = arith.subf %1, %15 : vector<32x128xf32>
    %cst_8 = arith.constant 9.99999974E-6 : f32
    %17 = vector.broadcast %cst_8 : f32 to vector<32x1xf32>
    %18 = arith.addf %14, %17 : vector<32x1xf32>
    %19 = math.rsqrt %18 : vector<32x1xf32>
    %20 = vector.broadcast %19 : vector<32x1xf32> to vector<32x128xf32>
    %21 = arith.mulf %16, %20 : vector<32x128xf32>
    %22 = vector.broadcast %2 : vector<1x128xf32> to vector<32x128xf32>
    %23 = arith.mulf %21, %22 : vector<32x128xf32>
    %24 = vector.broadcast %3 : vector<1x128xf32> to vector<32x128xf32>
    %25 = arith.addf %23, %24 : vector<32x128xf32>
    %26 = arith.truncf %25 : vector<32x128xf32> to vector<32x128xbf16>
    %c0_9 = arith.constant 0 : index
    %c0_10 = arith.constant 0 : index
    %27 = vector.load %arg4[%c0_9, %c0_10] : memref<32x128xbf16, #tpu.memory_space<vmem>>, vector<32x128xbf16>
    tpu.vector_store %arg4[%c0_9, %c0_10], %26 {strides = array<i32>} : memref<32x128xbf16, #tpu.memory_space<vmem>>, vector<32x128xbf16>,
    return
  }
  func.func @transform_0(%arg0: i32) -> (i32, i32) {
    %c0_i32 = arith.constant 0 : i32
    %c0_i32_0 = arith.constant 0 : i32
    return %arg0, %c0_i32 : i32, i32
  }
  func.func @transform_1(%arg0: i32) -> (i32, i32) {
    %c0_i32 = arith.constant 0 : i32
    %c0_i32_0 = arith.constant 0 : i32
    %c0_i32_1 = arith.constant 0 : i32
    return %c0_i32, %c0_i32_0 : i32, i32
  }
  func.func @transform_2(%arg0: i32) -> (i32, i32) {
    %c0_i32 = arith.constant 0 : i32
    %c0_i32_0 = arith.constant 0 : i32
    %c0_i32_1 = arith.constant 0 : i32
    return %c0_i32, %c0_i32_0 : i32, i32
  }
  func.func @transform_3(%arg0: i32) -> (i32, i32) {
    %c0_i32 = arith.constant 0 : i32
    %c0_i32_0 = arith.constant 0 : i32
    return %arg0, %c0_i32 : i32, i32
  }
}

module attributes {stable_mosaic.version = 11 : i64} {
  func.func @_self_attn_kernel(%arg0: i32, %arg1: i32, %arg2: memref<1x8x128xbf16, #tpu.memory_space<vmem>>, %arg3: memref<1x128x32xbf16, #tpu.memory_space<vmem>>, %arg4: memref<1x1x32xf32, #tpu.memory_space<vmem>>, %arg5: memref<1x128x32xbf16, #tpu.memory_space<vmem>>, %arg6: memref<1x1x32xf32, #tpu.memory_space<vmem>>, %arg7: memref<1x128x32xbf16, #tpu.memory_space<vmem>>, %arg8: memref<1x1x32xf32, #tpu.memory_space<vmem>>, %arg9: memref<1x32x128xbf16, #tpu.memory_space<vmem>>, %arg10: memref<1x128xf32, #tpu.memory_space<vmem>>, %arg11: memref<1x128xf32, #tpu.memory_space<vmem>>, %arg12: memref<1x128xf32, #tpu.memory_space<vmem>>, %arg13: memref<1x1x8xf32, #tpu.memory_space<vmem>>, %arg14: memref<1x8x128xbf16, #tpu.memory_space<vmem>>, %arg15: memref<8x128xf32, #tpu.memory_space<vmem>>) attributes {dimension_semantics = [#tpu.dimension_semantics<parallel>, #tpu.dimension_semantics<arbitrary>], iteration_bounds = array<i64: 2, 4>, scalar_prefetch = 0 : i64, scratch_operands = 1 : i64, tpu.core_type = #tpu.core_type<tc>, window_params = [{transform_indices = @transform_0, window_bounds = array<i64: 1, 8, 128>}, {transform_indices = @transform_1, window_bounds = array<i64: 1, 128, 32>}, {transform_indices = @transform_2, window_bounds = array<i64: 1, 1, 32>}, {transform_indices = @transform_3, window_bounds = array<i64: 1, 128, 32>}, {transform_indices = @transform_4, window_bounds = array<i64: 1, 1, 32>}, {transform_indices = @transform_5, window_bounds = array<i64: 1, 128, 32>}, {transform_indices = @transform_6, window_bounds = array<i64: 1, 1, 32>}, {transform_indices = @transform_7, window_bounds = array<i64: 1, 32, 128>}, {pipeline_mode = #tpu.pipeline_mode<synchronous>, transform_indices = @transform_8, window_bounds = array<i64: 1, 128>}, {pipeline_mode = #tpu.pipeline_mode<synchronous>, transform_indices = @transform_9, window_bounds = array<i64: 1, 128>}, {pipeline_mode = #tpu.pipeline_mode<synchronous>, transform_indices = @transform_10, window_bounds = array<i64: 1, 128>}, {transform_indices = @transform_11, window_bounds = array<i64: 1, 1, 8>}, {transform_indices = @transform_12, window_bounds = array<i64: 1, 8, 128>}]} {
    %c0 = arith.constant 0 : index
    %c0_0 = arith.constant 0 : index
    %c0_1 = arith.constant 0 : index
    %0 = vector.load %arg13[%c0, %c0_0, %c0_1] : memref<1x1x8xf32, #tpu.memory_space<vmem>>, vector<1x1x8xf32>
    %1 = vector.shape_cast %0 : vector<1x1x8xf32> to vector<1x8xf32>
    %c0_i32 = arith.constant 0 : i32
    %2 = arith.cmpi eq, %arg1, %c0_i32 : i32
    %3 = arith.extui %2 : i1 to i32
    %c0_i32_2 = arith.constant 0 : i32
    %4 = arith.cmpi ne, %3, %c0_i32_2 : i32
    scf.if %4 {
      %cst_42 = arith.constant 0.000000e+00 : f32
      %65 = vector.broadcast %cst_42 : f32 to vector<8x128xf32>
      %c0_43 = arith.constant 0 : index
      %c0_44 = arith.constant 0 : index
      %66 = vector.load %arg15[%c0_43, %c0_44] : memref<8x128xf32, #tpu.memory_space<vmem>>, vector<8x128xf32>
      tpu.vector_store %arg15[%c0_43, %c0_44], %65 {strides = array<i32>} : memref<8x128xf32, #tpu.memory_space<vmem>>, vector<8x128xf32>,
    } else {
    }
    %c0_3 = arith.constant 0 : index
    %c0_4 = arith.constant 0 : index
    %c0_5 = arith.constant 0 : index
    %5 = vector.load %arg2[%c0_3, %c0_4, %c0_5] : memref<1x8x128xbf16, #tpu.memory_space<vmem>>, vector<1x8x128xbf16>
    %6 = vector.shape_cast %5 : vector<1x8x128xbf16> to vector<8x128xbf16>
    %c0_6 = arith.constant 0 : index
    %c0_7 = arith.constant 0 : index
    %c0_8 = arith.constant 0 : index
    %7 = vector.load %arg3[%c0_6, %c0_7, %c0_8] : memref<1x128x32xbf16, #tpu.memory_space<vmem>>, vector<1x128x32xbf16>
    %8 = vector.shape_cast %7 : vector<1x128x32xbf16> to vector<128x32xbf16>
    %c0_9 = arith.constant 0 : index
    %c0_10 = arith.constant 0 : index
    %c0_11 = arith.constant 0 : index
    %9 = vector.load %arg4[%c0_9, %c0_10, %c0_11] : memref<1x1x32xf32, #tpu.memory_space<vmem>>, vector<1x1x32xf32>
    %10 = vector.shape_cast %9 : vector<1x1x32xf32> to vector<1x32xf32>
    %c0_12 = arith.constant 0 : index
    %c0_13 = arith.constant 0 : index
    %c0_14 = arith.constant 0 : index
    %11 = vector.load %arg5[%c0_12, %c0_13, %c0_14] : memref<1x128x32xbf16, #tpu.memory_space<vmem>>, vector<1x128x32xbf16>
    %12 = vector.shape_cast %11 : vector<1x128x32xbf16> to vector<128x32xbf16>
    %c0_15 = arith.constant 0 : index
    %c0_16 = arith.constant 0 : index
    %c0_17 = arith.constant 0 : index
    %13 = vector.load %arg6[%c0_15, %c0_16, %c0_17] : memref<1x1x32xf32, #tpu.memory_space<vmem>>, vector<1x1x32xf32>
    %14 = vector.shape_cast %13 : vector<1x1x32xf32> to vector<1x32xf32>
    %c0_18 = arith.constant 0 : index
    %c0_19 = arith.constant 0 : index
    %c0_20 = arith.constant 0 : index
    %15 = vector.load %arg7[%c0_18, %c0_19, %c0_20] : memref<1x128x32xbf16, #tpu.memory_space<vmem>>, vector<1x128x32xbf16>
    %16 = vector.shape_cast %15 : vector<1x128x32xbf16> to vector<128x32xbf16>
    %c0_21 = arith.constant 0 : index
    %c0_22 = arith.constant 0 : index
    %c0_23 = arith.constant 0 : index
    %17 = vector.load %arg8[%c0_21, %c0_22, %c0_23] : memref<1x1x32xf32, #tpu.memory_space<vmem>>, vector<1x1x32xf32>
    %18 = vector.shape_cast %17 : vector<1x1x32xf32> to vector<1x32xf32>
    %cst = arith.constant dense<0.000000e+00> : vector<8x32xf32>
    %19 = tpu.matmul %6, %8, %cst {dimension_numbers = #tpu.dot_dimension_numbers<[1], [0], [0], [1], [0, 0, 1, 1], [], []>} : vector<8x128xbf16>, vector<128x32xbf16>, vector<8x32xf32> -> vector<8x32xf32>
    %20 = vector.broadcast %10 : vector<1x32xf32> to vector<8x32xf32>
    %21 = arith.addf %19, %20 : vector<8x32xf32>
    %22 = arith.truncf %21 : vector<8x32xf32> to vector<8x32xbf16>
    %cst_24 = arith.constant dense<0.000000e+00> : vector<8x32xf32>
    %23 = tpu.matmul %6, %12, %cst_24 {dimension_numbers = #tpu.dot_dimension_numbers<[1], [0], [0], [1], [0, 0, 1, 1], [], []>} : vector<8x128xbf16>, vector<128x32xbf16>, vector<8x32xf32> -> vector<8x32xf32>
    %24 = vector.broadcast %14 : vector<1x32xf32> to vector<8x32xf32>
    %25 = arith.addf %23, %24 : vector<8x32xf32>
    %26 = arith.truncf %25 : vector<8x32xf32> to vector<8x32xbf16>
    %cst_25 = arith.constant dense<0.000000e+00> : vector<8x32xf32>
    %27 = tpu.matmul %6, %16, %cst_25 {dimension_numbers = #tpu.dot_dimension_numbers<[1], [0], [0], [1], [0, 0, 1, 1], [], []>} : vector<8x128xbf16>, vector<128x32xbf16>, vector<8x32xf32> -> vector<8x32xf32>
    %28 = vector.broadcast %18 : vector<1x32xf32> to vector<8x32xf32>
    %29 = arith.addf %27, %28 : vector<8x32xf32>
    %30 = arith.truncf %29 : vector<8x32xf32> to vector<8x32xbf16>
    %cst_26 = arith.constant dense<0.000000e+00> : vector<8x8xf32>
    %31 = tpu.matmul %22, %26, %cst_26 {dimension_numbers = #tpu.dot_dimension_numbers<[1], [1], [0], [0], [0, 0, 1, 0], [], []>} : vector<8x32xbf16>, vector<8x32xbf16>, vector<8x8xf32> -> vector<8x8xf32>
    %cst_27 = arith.constant 0.176776692 : f32
    %32 = vector.broadcast %cst_27 : f32 to vector<8x8xf32>
    %33 = arith.mulf %31, %32 : vector<8x8xf32>
    %34 = vector.broadcast %1 : vector<1x8xf32> to vector<8x8xf32>
    %35 = arith.addf %33, %34 : vector<8x8xf32>
    %36 = tpu.iota {dimensions = array<i32: 0>} : vector<8x8xi32>
    %37 = tpu.iota {dimensions = array<i32: 1>} : vector<8x8xi32>
    %38 = arith.cmpi sgt, %37, %36 : vector<8x8xi32>
    %cst_28 = arith.constant -1.000000e+09 : f32
    %cst_29 = arith.constant 0.000000e+00 : f32
    %39 = vector.broadcast %cst_28 : f32 to vector<8x8xf32>
    %40 = vector.broadcast %cst_29 : f32 to vector<8x8xf32>
    %41 = arith.select %38, %39, %40 : vector<8x8xi1>, vector<8x8xf32>
    %42 = arith.addf %35, %41 : vector<8x8xf32>
    %cst_30 = arith.constant dense<0xFF800000> : vector<8xf32>
    %43 = vector.multi_reduction <maximumf>, %42, %cst_30 [1] : vector<8x8xf32> to vector<8xf32>
    %44 = vector.shape_cast %43 : vector<8xf32> to vector<8x1xf32>
    %45 = vector.broadcast %44 : vector<8x1xf32> to vector<8x8xf32>
    %46 = arith.subf %42, %45 : vector<8x8xf32>
    %47 = math.exp %46 : vector<8x8xf32>
    %cst_31 = arith.constant dense<0.000000e+00> : vector<8xf32>
    %48 = vector.multi_reduction <add>, %47, %cst_31 [1] : vector<8x8xf32> to vector<8xf32>
    %49 = vector.shape_cast %48 : vector<8xf32> to vector<8x1xf32>
    %50 = tpu.reciprocal %49 {approx = true} : vector<8x1xf32> -> vector<8x1xf32>
    %51 = vector.broadcast %50 : vector<8x1xf32> to vector<8x8xf32>
    %52 = arith.mulf %47, %51 : vector<8x8xf32>
    %53 = arith.truncf %52 : vector<8x8xf32> to vector<8x8xbf16>
    %cst_32 = arith.constant dense<0.000000e+00> : vector<8x32xf32>
    %54 = tpu.matmul %53, %30, %cst_32 {dimension_numbers = #tpu.dot_dimension_numbers<[1], [0], [0], [1], [0, 0, 1, 1], [], []>} : vector<8x8xbf16>, vector<8x32xbf16>, vector<8x32xf32> -> vector<8x32xf32>
    %c0_33 = arith.constant 0 : index
    %c0_34 = arith.constant 0 : index
    %55 = vector.load %arg15[%c0_33, %c0_34] : memref<8x128xf32, #tpu.memory_space<vmem>>, vector<8x128xf32>
    %56 = arith.truncf %54 : vector<8x32xf32> to vector<8x32xbf16>
    %c0_35 = arith.constant 0 : index
    %c0_36 = arith.constant 0 : index
    %c0_37 = arith.constant 0 : index
    %57 = vector.load %arg9[%c0_35, %c0_36, %c0_37] : memref<1x32x128xbf16, #tpu.memory_space<vmem>>, vector<1x32x128xbf16>
    %58 = vector.shape_cast %57 : vector<1x32x128xbf16> to vector<32x128xbf16>
    %cst_38 = arith.constant dense<0.000000e+00> : vector<8x128xf32>
    %59 = tpu.matmul %56, %58, %cst_38 {dimension_numbers = #tpu.dot_dimension_numbers<[1], [0], [0], [1], [0, 0, 1, 1], [], []>} : vector<8x32xbf16>, vector<32x128xbf16>, vector<8x128xf32> -> vector<8x128xf32>
    %60 = arith.addf %55, %59 : vector<8x128xf32>
    %c0_39 = arith.constant 0 : index
    %c0_40 = arith.constant 0 : index
    %61 = vector.load %arg15[%c0_39, %c0_40] : memref<8x128xf32, #tpu.memory_space<vmem>>, vector<8x128xf32>
    tpu.vector_store %arg15[%c0_39, %c0_40], %60 {strides = array<i32>} : memref<8x128xf32, #tpu.memory_space<vmem>>, vector<8x128xf32>,
    %c3_i32 = arith.constant 3 : i32
    %62 = arith.cmpi eq, %arg1, %c3_i32 : i32
    %63 = arith.extui %62 : i1 to i32
    %c0_i32_41 = arith.constant 0 : i32
    %64 = arith.cmpi ne, %63, %c0_i32_41 : i32
    scf.if %64 {
      %c0_42 = arith.constant 0 : index
      %c0_43 = arith.constant 0 : index
      %65 = vector.load %arg15[%c0_42, %c0_43] : memref<8x128xf32, #tpu.memory_space<vmem>>, vector<8x128xf32>
      %c0_44 = arith.constant 0 : index
      %c0_45 = arith.constant 0 : index
      %66 = vector.load %arg10[%c0_44, %c0_45] : memref<1x128xf32, #tpu.memory_space<vmem>>, vector<1x128xf32>
      %67 = vector.broadcast %66 : vector<1x128xf32> to vector<8x128xf32>
      %68 = arith.addf %65, %67 : vector<8x128xf32>
      %69 = arith.extf %6 : vector<8x128xbf16> to vector<8x128xf32>
      %70 = arith.addf %68, %69 : vector<8x128xf32>
      %c0_46 = arith.constant 0 : index
      %c0_47 = arith.constant 0 : index
      %71 = vector.load %arg11[%c0_46, %c0_47] : memref<1x128xf32, #tpu.memory_space<vmem>>, vector<1x128xf32>
      %c0_48 = arith.constant 0 : index
      %c0_49 = arith.constant 0 : index
      %72 = vector.load %arg12[%c0_48, %c0_49] : memref<1x128xf32, #tpu.memory_space<vmem>>, vector<1x128xf32>
      %cst_50 = arith.constant dense<0.000000e+00> : vector<8xf32>
      %73 = vector.multi_reduction <add>, %70, %cst_50 [1] : vector<8x128xf32> to vector<8xf32>
      %74 = vector.shape_cast %73 : vector<8xf32> to vector<8x1xf32>
      %cst_51 = arith.constant 1.280000e+02 : f32
      %75 = vector.broadcast %cst_51 : f32 to vector<8x1xf32>
      %76 = arith.divf %74, %75 : vector<8x1xf32>
      %77 = vector.broadcast %76 : vector<8x1xf32> to vector<8x128xf32>
      %78 = arith.subf %70, %77 : vector<8x128xf32>
      %79 = arith.mulf %78, %78 : vector<8x128xf32>
      %cst_52 = arith.constant dense<0.000000e+00> : vector<8xf32>
      %80 = vector.multi_reduction <add>, %79, %cst_52 [1] : vector<8x128xf32> to vector<8xf32>
      %81 = vector.shape_cast %80 : vector<8xf32> to vector<8x1xf32>
      %cst_53 = arith.constant 1.280000e+02 : f32
      %82 = vector.broadcast %cst_53 : f32 to vector<8x1xf32>
      %83 = arith.divf %81, %82 : vector<8x1xf32>
      %84 = vector.broadcast %76 : vector<8x1xf32> to vector<8x128xf32>
      %85 = arith.subf %70, %84 : vector<8x128xf32>
      %cst_54 = arith.constant 9.99999974E-6 : f32
      %86 = vector.broadcast %cst_54 : f32 to vector<8x1xf32>
      %87 = arith.addf %83, %86 : vector<8x1xf32>
      %88 = math.rsqrt %87 : vector<8x1xf32>
      %89 = vector.broadcast %88 : vector<8x1xf32> to vector<8x128xf32>
      %90 = arith.mulf %85, %89 : vector<8x128xf32>
      %91 = vector.broadcast %71 : vector<1x128xf32> to vector<8x128xf32>
      %92 = arith.mulf %90, %91 : vector<8x128xf32>
      %93 = vector.broadcast %72 : vector<1x128xf32> to vector<8x128xf32>
      %94 = arith.addf %92, %93 : vector<8x128xf32>
      %95 = arith.truncf %94 : vector<8x128xf32> to vector<8x128xbf16>
      %c0_55 = arith.constant 0 : index
      %c0_56 = arith.constant 0 : index
      %c0_57 = arith.constant 0 : index
      %96 = vector.load %arg14[%c0_55, %c0_56, %c0_57] : memref<1x8x128xbf16, #tpu.memory_space<vmem>>, vector<1x8x128xbf16>
      %97 = vector.shape_cast %96 : vector<1x8x128xbf16> to vector<8x128xbf16>
      %98 = vector.shape_cast %95 : vector<8x128xbf16> to vector<1x8x128xbf16>
      tpu.vector_store %arg14[%c0_55, %c0_56, %c0_57], %98 {strides = array<i32>} : memref<1x8x128xbf16, #tpu.memory_space<vmem>>, vector<1x8x128xbf16>,
    } else {
    }
    return
  }
  func.func @transform_0(%arg0: i32, %arg1: i32) -> (i32, i32, i32) {
    %c0_i32 = arith.constant 0 : i32
    %c0_i32_0 = arith.constant 0 : i32
    %c0_i32_1 = arith.constant 0 : i32
    return %arg0, %c0_i32, %c0_i32_0 : i32, i32, i32
  }
  func.func @transform_1(%arg0: i32, %arg1: i32) -> (i32, i32, i32) {
    %c0_i32 = arith.constant 0 : i32
    %c0_i32_0 = arith.constant 0 : i32
    %c0_i32_1 = arith.constant 0 : i32
    return %arg1, %c0_i32, %c0_i32_0 : i32, i32, i32
  }
  func.func @transform_2(%arg0: i32, %arg1: i32) -> (i32, i32, i32) {
    %c0_i32 = arith.constant 0 : i32
    %c0_i32_0 = arith.constant 0 : i32
    %c0_i32_1 = arith.constant 0 : i32
    return %arg1, %c0_i32, %c0_i32_0 : i32, i32, i32
  }
  func.func @transform_3(%arg0: i32, %arg1: i32) -> (i32, i32, i32) {
    %c0_i32 = arith.constant 0 : i32
    %c0_i32_0 = arith.constant 0 : i32
    %c0_i32_1 = arith.constant 0 : i32
    return %arg1, %c0_i32, %c0_i32_0 : i32, i32, i32
  }
  func.func @transform_4(%arg0: i32, %arg1: i32) -> (i32, i32, i32) {
    %c0_i32 = arith.constant 0 : i32
    %c0_i32_0 = arith.constant 0 : i32
    %c0_i32_1 = arith.constant 0 : i32
    return %arg1, %c0_i32, %c0_i32_0 : i32, i32, i32
  }
  func.func @transform_5(%arg0: i32, %arg1: i32) -> (i32, i32, i32) {
    %c0_i32 = arith.constant 0 : i32
    %c0_i32_0 = arith.constant 0 : i32
    %c0_i32_1 = arith.constant 0 : i32
    return %arg1, %c0_i32, %c0_i32_0 : i32, i32, i32
  }
  func.func @transform_6(%arg0: i32, %arg1: i32) -> (i32, i32, i32) {
    %c0_i32 = arith.constant 0 : i32
    %c0_i32_0 = arith.constant 0 : i32
    %c0_i32_1 = arith.constant 0 : i32
    return %arg1, %c0_i32, %c0_i32_0 : i32, i32, i32
  }
  func.func @transform_7(%arg0: i32, %arg1: i32) -> (i32, i32, i32) {
    %c0_i32 = arith.constant 0 : i32
    %c0_i32_0 = arith.constant 0 : i32
    %c0_i32_1 = arith.constant 0 : i32
    return %arg1, %c0_i32, %c0_i32_0 : i32, i32, i32
  }
  func.func @transform_8(%arg0: i32, %arg1: i32) -> (i32, i32) {
    %c0_i32 = arith.constant 0 : i32
    %c0_i32_0 = arith.constant 0 : i32
    %c0_i32_1 = arith.constant 0 : i32
    return %c0_i32, %c0_i32_0 : i32, i32
  }
  func.func @transform_9(%arg0: i32, %arg1: i32) -> (i32, i32) {
    %c0_i32 = arith.constant 0 : i32
    %c0_i32_0 = arith.constant 0 : i32
    %c0_i32_1 = arith.constant 0 : i32
    return %c0_i32, %c0_i32_0 : i32, i32
  }
  func.func @transform_10(%arg0: i32, %arg1: i32) -> (i32, i32) {
    %c0_i32 = arith.constant 0 : i32
    %c0_i32_0 = arith.constant 0 : i32
    %c0_i32_1 = arith.constant 0 : i32
    return %c0_i32, %c0_i32_0 : i32, i32
  }
  func.func @transform_11(%arg0: i32, %arg1: i32) -> (i32, i32, i32) {
    %c0_i32 = arith.constant 0 : i32
    %c0_i32_0 = arith.constant 0 : i32
    %c0_i32_1 = arith.constant 0 : i32
    return %arg0, %c0_i32, %c0_i32_0 : i32, i32, i32
  }
  func.func @transform_12(%arg0: i32, %arg1: i32) -> (i32, i32, i32) {
    %c0_i32 = arith.constant 0 : i32
    %c0_i32_0 = arith.constant 0 : i32
    %c0_i32_1 = arith.constant 0 : i32
    return %arg0, %c0_i32, %c0_i32_0 : i32, i32, i32
  }
}

module attributes {stable_mosaic.version = 11 : i64} {
  func.func @_cross_attn_kernel(%arg0: i32, %arg1: i32, %arg2: memref<1x8x128xbf16, #tpu.memory_space<vmem>>, %arg3: memref<1x32x128xbf16, #tpu.memory_space<vmem>>, %arg4: memref<1x128x32xbf16, #tpu.memory_space<vmem>>, %arg5: memref<1x1x32xf32, #tpu.memory_space<vmem>>, %arg6: memref<1x128x32xbf16, #tpu.memory_space<vmem>>, %arg7: memref<1x1x32xf32, #tpu.memory_space<vmem>>, %arg8: memref<1x128x32xbf16, #tpu.memory_space<vmem>>, %arg9: memref<1x1x32xf32, #tpu.memory_space<vmem>>, %arg10: memref<1x32x128xbf16, #tpu.memory_space<vmem>>, %arg11: memref<1x128xf32, #tpu.memory_space<vmem>>, %arg12: memref<1x128xf32, #tpu.memory_space<vmem>>, %arg13: memref<1x128xf32, #tpu.memory_space<vmem>>, %arg14: memref<1x8x128xbf16, #tpu.memory_space<vmem>>, %arg15: memref<8x128xf32, #tpu.memory_space<vmem>>) attributes {dimension_semantics = [#tpu.dimension_semantics<parallel>, #tpu.dimension_semantics<arbitrary>], iteration_bounds = array<i64: 2, 4>, scalar_prefetch = 0 : i64, scratch_operands = 1 : i64, tpu.core_type = #tpu.core_type<tc>, window_params = [{transform_indices = @transform_0, window_bounds = array<i64: 1, 8, 128>}, {transform_indices = @transform_1, window_bounds = array<i64: 1, 32, 128>}, {transform_indices = @transform_2, window_bounds = array<i64: 1, 128, 32>}, {transform_indices = @transform_3, window_bounds = array<i64: 1, 1, 32>}, {transform_indices = @transform_4, window_bounds = array<i64: 1, 128, 32>}, {transform_indices = @transform_5, window_bounds = array<i64: 1, 1, 32>}, {transform_indices = @transform_6, window_bounds = array<i64: 1, 128, 32>}, {transform_indices = @transform_7, window_bounds = array<i64: 1, 1, 32>}, {transform_indices = @transform_8, window_bounds = array<i64: 1, 32, 128>}, {pipeline_mode = #tpu.pipeline_mode<synchronous>, transform_indices = @transform_9, window_bounds = array<i64: 1, 128>}, {pipeline_mode = #tpu.pipeline_mode<synchronous>, transform_indices = @transform_10, window_bounds = array<i64: 1, 128>}, {pipeline_mode = #tpu.pipeline_mode<synchronous>, transform_indices = @transform_11, window_bounds = array<i64: 1, 128>}, {transform_indices = @transform_12, window_bounds = array<i64: 1, 8, 128>}]} {
    %c0_i32 = arith.constant 0 : i32
    %0 = arith.cmpi eq, %arg1, %c0_i32 : i32
    %1 = arith.extui %0 : i1 to i32
    %c0_i32_0 = arith.constant 0 : i32
    %2 = arith.cmpi ne, %1, %c0_i32_0 : i32
    scf.if %2 {
      %cst_40 = arith.constant 0.000000e+00 : f32
      %56 = vector.broadcast %cst_40 : f32 to vector<8x128xf32>
      %c0_41 = arith.constant 0 : index
      %c0_42 = arith.constant 0 : index
      %57 = vector.load %arg15[%c0_41, %c0_42] : memref<8x128xf32, #tpu.memory_space<vmem>>, vector<8x128xf32>
      tpu.vector_store %arg15[%c0_41, %c0_42], %56 {strides = array<i32>} : memref<8x128xf32, #tpu.memory_space<vmem>>, vector<8x128xf32>,
    } else {
    }
    %c0 = arith.constant 0 : index
    %c0_1 = arith.constant 0 : index
    %c0_2 = arith.constant 0 : index
    %3 = vector.load %arg2[%c0, %c0_1, %c0_2] : memref<1x8x128xbf16, #tpu.memory_space<vmem>>, vector<1x8x128xbf16>
    %4 = vector.shape_cast %3 : vector<1x8x128xbf16> to vector<8x128xbf16>
    %c0_3 = arith.constant 0 : index
    %c0_4 = arith.constant 0 : index
    %c0_5 = arith.constant 0 : index
    %5 = vector.load %arg3[%c0_3, %c0_4, %c0_5] : memref<1x32x128xbf16, #tpu.memory_space<vmem>>, vector<1x32x128xbf16>
    %6 = vector.shape_cast %5 : vector<1x32x128xbf16> to vector<32x128xbf16>
    %c0_6 = arith.constant 0 : index
    %c0_7 = arith.constant 0 : index
    %c0_8 = arith.constant 0 : index
    %7 = vector.load %arg4[%c0_6, %c0_7, %c0_8] : memref<1x128x32xbf16, #tpu.memory_space<vmem>>, vector<1x128x32xbf16>
    %8 = vector.shape_cast %7 : vector<1x128x32xbf16> to vector<128x32xbf16>
    %c0_9 = arith.constant 0 : index
    %c0_10 = arith.constant 0 : index
    %c0_11 = arith.constant 0 : index
    %9 = vector.load %arg5[%c0_9, %c0_10, %c0_11] : memref<1x1x32xf32, #tpu.memory_space<vmem>>, vector<1x1x32xf32>
    %10 = vector.shape_cast %9 : vector<1x1x32xf32> to vector<1x32xf32>
    %c0_12 = arith.constant 0 : index
    %c0_13 = arith.constant 0 : index
    %c0_14 = arith.constant 0 : index
    %11 = vector.load %arg6[%c0_12, %c0_13, %c0_14] : memref<1x128x32xbf16, #tpu.memory_space<vmem>>, vector<1x128x32xbf16>
    %12 = vector.shape_cast %11 : vector<1x128x32xbf16> to vector<128x32xbf16>
    %c0_15 = arith.constant 0 : index
    %c0_16 = arith.constant 0 : index
    %c0_17 = arith.constant 0 : index
    %13 = vector.load %arg7[%c0_15, %c0_16, %c0_17] : memref<1x1x32xf32, #tpu.memory_space<vmem>>, vector<1x1x32xf32>
    %14 = vector.shape_cast %13 : vector<1x1x32xf32> to vector<1x32xf32>
    %c0_18 = arith.constant 0 : index
    %c0_19 = arith.constant 0 : index
    %c0_20 = arith.constant 0 : index
    %15 = vector.load %arg8[%c0_18, %c0_19, %c0_20] : memref<1x128x32xbf16, #tpu.memory_space<vmem>>, vector<1x128x32xbf16>
    %16 = vector.shape_cast %15 : vector<1x128x32xbf16> to vector<128x32xbf16>
    %c0_21 = arith.constant 0 : index
    %c0_22 = arith.constant 0 : index
    %c0_23 = arith.constant 0 : index
    %17 = vector.load %arg9[%c0_21, %c0_22, %c0_23] : memref<1x1x32xf32, #tpu.memory_space<vmem>>, vector<1x1x32xf32>
    %18 = vector.shape_cast %17 : vector<1x1x32xf32> to vector<1x32xf32>
    %cst = arith.constant dense<0.000000e+00> : vector<8x32xf32>
    %19 = tpu.matmul %4, %8, %cst {dimension_numbers = #tpu.dot_dimension_numbers<[1], [0], [0], [1], [0, 0, 1, 1], [], []>} : vector<8x128xbf16>, vector<128x32xbf16>, vector<8x32xf32> -> vector<8x32xf32>
    %20 = vector.broadcast %10 : vector<1x32xf32> to vector<8x32xf32>
    %21 = arith.addf %19, %20 : vector<8x32xf32>
    %22 = arith.truncf %21 : vector<8x32xf32> to vector<8x32xbf16>
    %cst_24 = arith.constant dense<0.000000e+00> : vector<32x32xf32>
    %23 = tpu.matmul %6, %12, %cst_24 {dimension_numbers = #tpu.dot_dimension_numbers<[1], [0], [0], [1], [0, 0, 1, 1], [], []>} : vector<32x128xbf16>, vector<128x32xbf16>, vector<32x32xf32> -> vector<32x32xf32>
    %24 = vector.broadcast %14 : vector<1x32xf32> to vector<32x32xf32>
    %25 = arith.addf %23, %24 : vector<32x32xf32>
    %26 = arith.truncf %25 : vector<32x32xf32> to vector<32x32xbf16>
    %cst_25 = arith.constant dense<0.000000e+00> : vector<32x32xf32>
    %27 = tpu.matmul %6, %16, %cst_25 {dimension_numbers = #tpu.dot_dimension_numbers<[1], [0], [0], [1], [0, 0, 1, 1], [], []>} : vector<32x128xbf16>, vector<128x32xbf16>, vector<32x32xf32> -> vector<32x32xf32>
    %28 = vector.broadcast %18 : vector<1x32xf32> to vector<32x32xf32>
    %29 = arith.addf %27, %28 : vector<32x32xf32>
    %30 = arith.truncf %29 : vector<32x32xf32> to vector<32x32xbf16>
    %cst_26 = arith.constant dense<0.000000e+00> : vector<8x32xf32>
    %31 = tpu.matmul %22, %26, %cst_26 {dimension_numbers = #tpu.dot_dimension_numbers<[1], [1], [0], [0], [0, 0, 1, 0], [], []>} : vector<8x32xbf16>, vector<32x32xbf16>, vector<8x32xf32> -> vector<8x32xf32>
    %cst_27 = arith.constant 0.176776692 : f32
    %32 = vector.broadcast %cst_27 : f32 to vector<8x32xf32>
    %33 = arith.mulf %31, %32 : vector<8x32xf32>
    %cst_28 = arith.constant dense<0xFF800000> : vector<8xf32>
    %34 = vector.multi_reduction <maximumf>, %33, %cst_28 [1] : vector<8x32xf32> to vector<8xf32>
    %35 = vector.shape_cast %34 : vector<8xf32> to vector<8x1xf32>
    %36 = vector.broadcast %35 : vector<8x1xf32> to vector<8x32xf32>
    %37 = arith.subf %33, %36 : vector<8x32xf32>
    %38 = math.exp %37 : vector<8x32xf32>
    %cst_29 = arith.constant dense<0.000000e+00> : vector<8xf32>
    %39 = vector.multi_reduction <add>, %38, %cst_29 [1] : vector<8x32xf32> to vector<8xf32>
    %40 = vector.shape_cast %39 : vector<8xf32> to vector<8x1xf32>
    %41 = tpu.reciprocal %40 {approx = true} : vector<8x1xf32> -> vector<8x1xf32>
    %42 = vector.broadcast %41 : vector<8x1xf32> to vector<8x32xf32>
    %43 = arith.mulf %38, %42 : vector<8x32xf32>
    %44 = arith.truncf %43 : vector<8x32xf32> to vector<8x32xbf16>
    %cst_30 = arith.constant dense<0.000000e+00> : vector<8x32xf32>
    %45 = tpu.matmul %44, %30, %cst_30 {dimension_numbers = #tpu.dot_dimension_numbers<[1], [0], [0], [1], [0, 0, 1, 1], [], []>} : vector<8x32xbf16>, vector<32x32xbf16>, vector<8x32xf32> -> vector<8x32xf32>
    %c0_31 = arith.constant 0 : index
    %c0_32 = arith.constant 0 : index
    %46 = vector.load %arg15[%c0_31, %c0_32] : memref<8x128xf32, #tpu.memory_space<vmem>>, vector<8x128xf32>
    %47 = arith.truncf %45 : vector<8x32xf32> to vector<8x32xbf16>
    %c0_33 = arith.constant 0 : index
    %c0_34 = arith.constant 0 : index
    %c0_35 = arith.constant 0 : index
    %48 = vector.load %arg10[%c0_33, %c0_34, %c0_35] : memref<1x32x128xbf16, #tpu.memory_space<vmem>>, vector<1x32x128xbf16>
    %49 = vector.shape_cast %48 : vector<1x32x128xbf16> to vector<32x128xbf16>
    %cst_36 = arith.constant dense<0.000000e+00> : vector<8x128xf32>
    %50 = tpu.matmul %47, %49, %cst_36 {dimension_numbers = #tpu.dot_dimension_numbers<[1], [0], [0], [1], [0, 0, 1, 1], [], []>} : vector<8x32xbf16>, vector<32x128xbf16>, vector<8x128xf32> -> vector<8x128xf32>
    %51 = arith.addf %46, %50 : vector<8x128xf32>
    %c0_37 = arith.constant 0 : index
    %c0_38 = arith.constant 0 : index
    %52 = vector.load %arg15[%c0_37, %c0_38] : memref<8x128xf32, #tpu.memory_space<vmem>>, vector<8x128xf32>
    tpu.vector_store %arg15[%c0_37, %c0_38], %51 {strides = array<i32>} : memref<8x128xf32, #tpu.memory_space<vmem>>, vector<8x128xf32>,
    %c3_i32 = arith.constant 3 : i32
    %53 = arith.cmpi eq, %arg1, %c3_i32 : i32
    %54 = arith.extui %53 : i1 to i32
    %c0_i32_39 = arith.constant 0 : i32
    %55 = arith.cmpi ne, %54, %c0_i32_39 : i32
    scf.if %55 {
      %c0_40 = arith.constant 0 : index
      %c0_41 = arith.constant 0 : index
      %56 = vector.load %arg15[%c0_40, %c0_41] : memref<8x128xf32, #tpu.memory_space<vmem>>, vector<8x128xf32>
      %c0_42 = arith.constant 0 : index
      %c0_43 = arith.constant 0 : index
      %57 = vector.load %arg11[%c0_42, %c0_43] : memref<1x128xf32, #tpu.memory_space<vmem>>, vector<1x128xf32>
      %58 = vector.broadcast %57 : vector<1x128xf32> to vector<8x128xf32>
      %59 = arith.addf %56, %58 : vector<8x128xf32>
      %60 = arith.extf %4 : vector<8x128xbf16> to vector<8x128xf32>
      %61 = arith.addf %59, %60 : vector<8x128xf32>
      %c0_44 = arith.constant 0 : index
      %c0_45 = arith.constant 0 : index
      %62 = vector.load %arg12[%c0_44, %c0_45] : memref<1x128xf32, #tpu.memory_space<vmem>>, vector<1x128xf32>
      %c0_46 = arith.constant 0 : index
      %c0_47 = arith.constant 0 : index
      %63 = vector.load %arg13[%c0_46, %c0_47] : memref<1x128xf32, #tpu.memory_space<vmem>>, vector<1x128xf32>
      %cst_48 = arith.constant dense<0.000000e+00> : vector<8xf32>
      %64 = vector.multi_reduction <add>, %61, %cst_48 [1] : vector<8x128xf32> to vector<8xf32>
      %65 = vector.shape_cast %64 : vector<8xf32> to vector<8x1xf32>
      %cst_49 = arith.constant 1.280000e+02 : f32
      %66 = vector.broadcast %cst_49 : f32 to vector<8x1xf32>
      %67 = arith.divf %65, %66 : vector<8x1xf32>
      %68 = vector.broadcast %67 : vector<8x1xf32> to vector<8x128xf32>
      %69 = arith.subf %61, %68 : vector<8x128xf32>
      %70 = arith.mulf %69, %69 : vector<8x128xf32>
      %cst_50 = arith.constant dense<0.000000e+00> : vector<8xf32>
      %71 = vector.multi_reduction <add>, %70, %cst_50 [1] : vector<8x128xf32> to vector<8xf32>
      %72 = vector.shape_cast %71 : vector<8xf32> to vector<8x1xf32>
      %cst_51 = arith.constant 1.280000e+02 : f32
      %73 = vector.broadcast %cst_51 : f32 to vector<8x1xf32>
      %74 = arith.divf %72, %73 : vector<8x1xf32>
      %75 = vector.broadcast %67 : vector<8x1xf32> to vector<8x128xf32>
      %76 = arith.subf %61, %75 : vector<8x128xf32>
      %cst_52 = arith.constant 9.99999974E-6 : f32
      %77 = vector.broadcast %cst_52 : f32 to vector<8x1xf32>
      %78 = arith.addf %74, %77 : vector<8x1xf32>
      %79 = math.rsqrt %78 : vector<8x1xf32>
      %80 = vector.broadcast %79 : vector<8x1xf32> to vector<8x128xf32>
      %81 = arith.mulf %76, %80 : vector<8x128xf32>
      %82 = vector.broadcast %62 : vector<1x128xf32> to vector<8x128xf32>
      %83 = arith.mulf %81, %82 : vector<8x128xf32>
      %84 = vector.broadcast %63 : vector<1x128xf32> to vector<8x128xf32>
      %85 = arith.addf %83, %84 : vector<8x128xf32>
      %86 = arith.truncf %85 : vector<8x128xf32> to vector<8x128xbf16>
      %c0_53 = arith.constant 0 : index
      %c0_54 = arith.constant 0 : index
      %c0_55 = arith.constant 0 : index
      %87 = vector.load %arg14[%c0_53, %c0_54, %c0_55] : memref<1x8x128xbf16, #tpu.memory_space<vmem>>, vector<1x8x128xbf16>
      %88 = vector.shape_cast %87 : vector<1x8x128xbf16> to vector<8x128xbf16>
      %89 = vector.shape_cast %86 : vector<8x128xbf16> to vector<1x8x128xbf16>
      tpu.vector_store %arg14[%c0_53, %c0_54, %c0_55], %89 {strides = array<i32>} : memref<1x8x128xbf16, #tpu.memory_space<vmem>>, vector<1x8x128xbf16>,
    } else {
    }
    return
  }
  func.func @transform_0(%arg0: i32, %arg1: i32) -> (i32, i32, i32) {
    %c0_i32 = arith.constant 0 : i32
    %c0_i32_0 = arith.constant 0 : i32
    %c0_i32_1 = arith.constant 0 : i32
    return %arg0, %c0_i32, %c0_i32_0 : i32, i32, i32
  }
  func.func @transform_1(%arg0: i32, %arg1: i32) -> (i32, i32, i32) {
    %c0_i32 = arith.constant 0 : i32
    %c0_i32_0 = arith.constant 0 : i32
    %c0_i32_1 = arith.constant 0 : i32
    return %arg0, %c0_i32, %c0_i32_0 : i32, i32, i32
  }
  func.func @transform_2(%arg0: i32, %arg1: i32) -> (i32, i32, i32) {
    %c0_i32 = arith.constant 0 : i32
    %c0_i32_0 = arith.constant 0 : i32
    %c0_i32_1 = arith.constant 0 : i32
    return %arg1, %c0_i32, %c0_i32_0 : i32, i32, i32
  }
  func.func @transform_3(%arg0: i32, %arg1: i32) -> (i32, i32, i32) {
    %c0_i32 = arith.constant 0 : i32
    %c0_i32_0 = arith.constant 0 : i32
    %c0_i32_1 = arith.constant 0 : i32
    return %arg1, %c0_i32, %c0_i32_0 : i32, i32, i32
  }
  func.func @transform_4(%arg0: i32, %arg1: i32) -> (i32, i32, i32) {
    %c0_i32 = arith.constant 0 : i32
    %c0_i32_0 = arith.constant 0 : i32
    %c0_i32_1 = arith.constant 0 : i32
    return %arg1, %c0_i32, %c0_i32_0 : i32, i32, i32
  }
  func.func @transform_5(%arg0: i32, %arg1: i32) -> (i32, i32, i32) {
    %c0_i32 = arith.constant 0 : i32
    %c0_i32_0 = arith.constant 0 : i32
    %c0_i32_1 = arith.constant 0 : i32
    return %arg1, %c0_i32, %c0_i32_0 : i32, i32, i32
  }
  func.func @transform_6(%arg0: i32, %arg1: i32) -> (i32, i32, i32) {
    %c0_i32 = arith.constant 0 : i32
    %c0_i32_0 = arith.constant 0 : i32
    %c0_i32_1 = arith.constant 0 : i32
    return %arg1, %c0_i32, %c0_i32_0 : i32, i32, i32
  }
  func.func @transform_7(%arg0: i32, %arg1: i32) -> (i32, i32, i32) {
    %c0_i32 = arith.constant 0 : i32
    %c0_i32_0 = arith.constant 0 : i32
    %c0_i32_1 = arith.constant 0 : i32
    return %arg1, %c0_i32, %c0_i32_0 : i32, i32, i32
  }
  func.func @transform_8(%arg0: i32, %arg1: i32) -> (i32, i32, i32) {
    %c0_i32 = arith.constant 0 : i32
    %c0_i32_0 = arith.constant 0 : i32
    %c0_i32_1 = arith.constant 0 : i32
    return %arg1, %c0_i32, %c0_i32_0 : i32, i32, i32
  }
  func.func @transform_9(%arg0: i32, %arg1: i32) -> (i32, i32) {
    %c0_i32 = arith.constant 0 : i32
    %c0_i32_0 = arith.constant 0 : i32
    %c0_i32_1 = arith.constant 0 : i32
    return %c0_i32, %c0_i32_0 : i32, i32
  }
  func.func @transform_10(%arg0: i32, %arg1: i32) -> (i32, i32) {
    %c0_i32 = arith.constant 0 : i32
    %c0_i32_0 = arith.constant 0 : i32
    %c0_i32_1 = arith.constant 0 : i32
    return %c0_i32, %c0_i32_0 : i32, i32
  }
  func.func @transform_11(%arg0: i32, %arg1: i32) -> (i32, i32) {
    %c0_i32 = arith.constant 0 : i32
    %c0_i32_0 = arith.constant 0 : i32
    %c0_i32_1 = arith.constant 0 : i32
    return %c0_i32, %c0_i32_0 : i32, i32
  }
  func.func @transform_12(%arg0: i32, %arg1: i32) -> (i32, i32, i32) {
    %c0_i32 = arith.constant 0 : i32
    %c0_i32_0 = arith.constant 0 : i32
    %c0_i32_1 = arith.constant 0 : i32
    return %arg0, %c0_i32, %c0_i32_0 : i32, i32, i32
  }
}

module attributes {stable_mosaic.version = 11 : i64} {
  func.func @_ffn_ln_kernel(%arg0: i32, %arg1: i32, %arg2: memref<16x128xbf16, #tpu.memory_space<vmem>>, %arg3: memref<128x256xbf16, #tpu.memory_space<vmem>>, %arg4: memref<1x256xf32, #tpu.memory_space<vmem>>, %arg5: memref<256x128xbf16, #tpu.memory_space<vmem>>, %arg6: memref<1x128xf32, #tpu.memory_space<vmem>>, %arg7: memref<1x128xf32, #tpu.memory_space<vmem>>, %arg8: memref<1x128xf32, #tpu.memory_space<vmem>>, %arg9: memref<16x128xbf16, #tpu.memory_space<vmem>>, %arg10: memref<16x128xf32, #tpu.memory_space<vmem>>) attributes {dimension_semantics = [#tpu.dimension_semantics<parallel>, #tpu.dimension_semantics<arbitrary>], iteration_bounds = array<i64: 1, 1>, scalar_prefetch = 0 : i64, scratch_operands = 1 : i64, tpu.core_type = #tpu.core_type<tc>, window_params = [{transform_indices = @transform_0, window_bounds = array<i64: 16, 128>}, {transform_indices = @transform_1, window_bounds = array<i64: 128, 256>}, {transform_indices = @transform_2, window_bounds = array<i64: 1, 256>}, {transform_indices = @transform_3, window_bounds = array<i64: 256, 128>}, {pipeline_mode = #tpu.pipeline_mode<synchronous>, transform_indices = @transform_4, window_bounds = array<i64: 1, 128>}, {pipeline_mode = #tpu.pipeline_mode<synchronous>, transform_indices = @transform_5, window_bounds = array<i64: 1, 128>}, {pipeline_mode = #tpu.pipeline_mode<synchronous>, transform_indices = @transform_6, window_bounds = array<i64: 1, 128>}, {transform_indices = @transform_7, window_bounds = array<i64: 16, 128>}]} {
    %c0_i32 = arith.constant 0 : i32
    %0 = arith.cmpi eq, %arg1, %c0_i32 : i32
    %1 = arith.extui %0 : i1 to i32
    %c0_i32_0 = arith.constant 0 : i32
    %2 = arith.cmpi ne, %1, %c0_i32_0 : i32
    scf.if %2 {
      %cst_16 = arith.constant 0.000000e+00 : f32
      %20 = vector.broadcast %cst_16 : f32 to vector<16x128xf32>
      %c0_17 = arith.constant 0 : index
      %c0_18 = arith.constant 0 : index
      %21 = vector.load %arg10[%c0_17, %c0_18] : memref<16x128xf32, #tpu.memory_space<vmem>>, vector<16x128xf32>
      tpu.vector_store %arg10[%c0_17, %c0_18], %20 {strides = array<i32>} : memref<16x128xf32, #tpu.memory_space<vmem>>, vector<16x128xf32>,
    } else {
    }
    %c0 = arith.constant 0 : index
    %c0_1 = arith.constant 0 : index
    %3 = vector.load %arg2[%c0, %c0_1] : memref<16x128xbf16, #tpu.memory_space<vmem>>, vector<16x128xbf16>
    %c0_2 = arith.constant 0 : index
    %c0_3 = arith.constant 0 : index
    %4 = vector.load %arg3[%c0_2, %c0_3] : memref<128x256xbf16, #tpu.memory_space<vmem>>, vector<128x256xbf16>
    %cst = arith.constant dense<0.000000e+00> : vector<16x256xf32>
    %5 = tpu.matmul %3, %4, %cst {dimension_numbers = #tpu.dot_dimension_numbers<[1], [0], [0], [1], [0, 0, 1, 1], [], []>} : vector<16x128xbf16>, vector<128x256xbf16>, vector<16x256xf32> -> vector<16x256xf32>
    %c0_4 = arith.constant 0 : index
    %c0_5 = arith.constant 0 : index
    %6 = vector.load %arg4[%c0_4, %c0_5] : memref<1x256xf32, #tpu.memory_space<vmem>>, vector<1x256xf32>
    %7 = vector.broadcast %6 : vector<1x256xf32> to vector<16x256xf32>
    %8 = arith.addf %5, %7 : vector<16x256xf32>
    %cst_6 = arith.constant 0.000000e+00 : f32
    %9 = vector.broadcast %cst_6 : f32 to vector<16x256xf32>
    %10 = arith.maximumf %8, %9 : vector<16x256xf32>
    %c0_7 = arith.constant 0 : index
    %c0_8 = arith.constant 0 : index
    %11 = vector.load %arg10[%c0_7, %c0_8] : memref<16x128xf32, #tpu.memory_space<vmem>>, vector<16x128xf32>
    %12 = arith.truncf %10 : vector<16x256xf32> to vector<16x256xbf16>
    %c0_9 = arith.constant 0 : index
    %c0_10 = arith.constant 0 : index
    %13 = vector.load %arg5[%c0_9, %c0_10] : memref<256x128xbf16, #tpu.memory_space<vmem>>, vector<256x128xbf16>
    %cst_11 = arith.constant dense<0.000000e+00> : vector<16x128xf32>
    %14 = tpu.matmul %12, %13, %cst_11 {dimension_numbers = #tpu.dot_dimension_numbers<[1], [0], [0], [1], [0, 0, 1, 1], [], []>} : vector<16x256xbf16>, vector<256x128xbf16>, vector<16x128xf32> -> vector<16x128xf32>
    %15 = arith.addf %11, %14 : vector<16x128xf32>
    %c0_12 = arith.constant 0 : index
    %c0_13 = arith.constant 0 : index
    %16 = vector.load %arg10[%c0_12, %c0_13] : memref<16x128xf32, #tpu.memory_space<vmem>>, vector<16x128xf32>
    tpu.vector_store %arg10[%c0_12, %c0_13], %15 {strides = array<i32>} : memref<16x128xf32, #tpu.memory_space<vmem>>, vector<16x128xf32>,
    %c0_i32_14 = arith.constant 0 : i32
    %17 = arith.cmpi eq, %arg1, %c0_i32_14 : i32
    %18 = arith.extui %17 : i1 to i32
    %c0_i32_15 = arith.constant 0 : i32
    %19 = arith.cmpi ne, %18, %c0_i32_15 : i32
    scf.if %19 {
      %c0_16 = arith.constant 0 : index
      %c0_17 = arith.constant 0 : index
      %20 = vector.load %arg10[%c0_16, %c0_17] : memref<16x128xf32, #tpu.memory_space<vmem>>, vector<16x128xf32>
      %c0_18 = arith.constant 0 : index
      %c0_19 = arith.constant 0 : index
      %21 = vector.load %arg6[%c0_18, %c0_19] : memref<1x128xf32, #tpu.memory_space<vmem>>, vector<1x128xf32>
      %22 = vector.broadcast %21 : vector<1x128xf32> to vector<16x128xf32>
      %23 = arith.addf %20, %22 : vector<16x128xf32>
      %c0_20 = arith.constant 0 : index
      %c0_21 = arith.constant 0 : index
      %24 = vector.load %arg2[%c0_20, %c0_21] : memref<16x128xbf16, #tpu.memory_space<vmem>>, vector<16x128xbf16>
      %25 = arith.extf %24 : vector<16x128xbf16> to vector<16x128xf32>
      %26 = arith.addf %23, %25 : vector<16x128xf32>
      %c0_22 = arith.constant 0 : index
      %c0_23 = arith.constant 0 : index
      %27 = vector.load %arg7[%c0_22, %c0_23] : memref<1x128xf32, #tpu.memory_space<vmem>>, vector<1x128xf32>
      %c0_24 = arith.constant 0 : index
      %c0_25 = arith.constant 0 : index
      %28 = vector.load %arg8[%c0_24, %c0_25] : memref<1x128xf32, #tpu.memory_space<vmem>>, vector<1x128xf32>
      %cst_26 = arith.constant dense<0.000000e+00> : vector<16xf32>
      %29 = vector.multi_reduction <add>, %26, %cst_26 [1] : vector<16x128xf32> to vector<16xf32>
      %30 = vector.shape_cast %29 : vector<16xf32> to vector<16x1xf32>
      %cst_27 = arith.constant 1.280000e+02 : f32
      %31 = vector.broadcast %cst_27 : f32 to vector<16x1xf32>
      %32 = arith.divf %30, %31 : vector<16x1xf32>
      %33 = vector.broadcast %32 : vector<16x1xf32> to vector<16x128xf32>
      %34 = arith.subf %26, %33 : vector<16x128xf32>
      %35 = arith.mulf %34, %34 : vector<16x128xf32>
      %cst_28 = arith.constant dense<0.000000e+00> : vector<16xf32>
      %36 = vector.multi_reduction <add>, %35, %cst_28 [1] : vector<16x128xf32> to vector<16xf32>
      %37 = vector.shape_cast %36 : vector<16xf32> to vector<16x1xf32>
      %cst_29 = arith.constant 1.280000e+02 : f32
      %38 = vector.broadcast %cst_29 : f32 to vector<16x1xf32>
      %39 = arith.divf %37, %38 : vector<16x1xf32>
      %40 = vector.broadcast %32 : vector<16x1xf32> to vector<16x128xf32>
      %41 = arith.subf %26, %40 : vector<16x128xf32>
      %cst_30 = arith.constant 9.99999974E-6 : f32
      %42 = vector.broadcast %cst_30 : f32 to vector<16x1xf32>
      %43 = arith.addf %39, %42 : vector<16x1xf32>
      %44 = math.rsqrt %43 : vector<16x1xf32>
      %45 = vector.broadcast %44 : vector<16x1xf32> to vector<16x128xf32>
      %46 = arith.mulf %41, %45 : vector<16x128xf32>
      %47 = vector.broadcast %27 : vector<1x128xf32> to vector<16x128xf32>
      %48 = arith.mulf %46, %47 : vector<16x128xf32>
      %49 = vector.broadcast %28 : vector<1x128xf32> to vector<16x128xf32>
      %50 = arith.addf %48, %49 : vector<16x128xf32>
      %51 = arith.truncf %50 : vector<16x128xf32> to vector<16x128xbf16>
      %c0_31 = arith.constant 0 : index
      %c0_32 = arith.constant 0 : index
      %52 = vector.load %arg9[%c0_31, %c0_32] : memref<16x128xbf16, #tpu.memory_space<vmem>>, vector<16x128xbf16>
      tpu.vector_store %arg9[%c0_31, %c0_32], %51 {strides = array<i32>} : memref<16x128xbf16, #tpu.memory_space<vmem>>, vector<16x128xbf16>,
    } else {
    }
    return
  }
  func.func @transform_0(%arg0: i32, %arg1: i32) -> (i32, i32) {
    %c0_i32 = arith.constant 0 : i32
    %c0_i32_0 = arith.constant 0 : i32
    return %arg0, %c0_i32 : i32, i32
  }
  func.func @transform_1(%arg0: i32, %arg1: i32) -> (i32, i32) {
    %c0_i32 = arith.constant 0 : i32
    %c0_i32_0 = arith.constant 0 : i32
    return %c0_i32, %arg1 : i32, i32
  }
  func.func @transform_2(%arg0: i32, %arg1: i32) -> (i32, i32) {
    %c0_i32 = arith.constant 0 : i32
    %c0_i32_0 = arith.constant 0 : i32
    return %c0_i32, %arg1 : i32, i32
  }
  func.func @transform_3(%arg0: i32, %arg1: i32) -> (i32, i32) {
    %c0_i32 = arith.constant 0 : i32
    %c0_i32_0 = arith.constant 0 : i32
    return %arg1, %c0_i32 : i32, i32
  }
  func.func @transform_4(%arg0: i32, %arg1: i32) -> (i32, i32) {
    %c0_i32 = arith.constant 0 : i32
    %c0_i32_0 = arith.constant 0 : i32
    %c0_i32_1 = arith.constant 0 : i32
    return %c0_i32, %c0_i32_0 : i32, i32
  }
  func.func @transform_5(%arg0: i32, %arg1: i32) -> (i32, i32) {
    %c0_i32 = arith.constant 0 : i32
    %c0_i32_0 = arith.constant 0 : i32
    %c0_i32_1 = arith.constant 0 : i32
    return %c0_i32, %c0_i32_0 : i32, i32
  }
  func.func @transform_6(%arg0: i32, %arg1: i32) -> (i32, i32) {
    %c0_i32 = arith.constant 0 : i32
    %c0_i32_0 = arith.constant 0 : i32
    %c0_i32_1 = arith.constant 0 : i32
    return %c0_i32, %c0_i32_0 : i32, i32
  }
  func.func @transform_7(%arg0: i32, %arg1: i32) -> (i32, i32) {
    %c0_i32 = arith.constant 0 : i32
    %c0_i32_0 = arith.constant 0 : i32
    return %arg0, %c0_i32 : i32, i32
  }
}

module attributes {stable_mosaic.version = 11 : i64} {
  func.func @_ln_kernel(%arg0: i32, %arg1: memref<16x128xbf16, #tpu.memory_space<vmem>>, %arg2: memref<1x128xf32, #tpu.memory_space<vmem>>, %arg3: memref<1x128xf32, #tpu.memory_space<vmem>>, %arg4: memref<16x128xbf16, #tpu.memory_space<vmem>>) attributes {dimension_semantics = [#tpu.dimension_semantics<parallel>], iteration_bounds = array<i64: 1>, scalar_prefetch = 0 : i64, scratch_operands = 0 : i64, tpu.core_type = #tpu.core_type<tc>, window_params = [{transform_indices = @transform_0, window_bounds = array<i64: 16, 128>}, {pipeline_mode = #tpu.pipeline_mode<synchronous>, transform_indices = @transform_1, window_bounds = array<i64: 1, 128>}, {pipeline_mode = #tpu.pipeline_mode<synchronous>, transform_indices = @transform_2, window_bounds = array<i64: 1, 128>}, {transform_indices = @transform_3, window_bounds = array<i64: 16, 128>}]} {
    %c0 = arith.constant 0 : index
    %c0_0 = arith.constant 0 : index
    %0 = vector.load %arg1[%c0, %c0_0] : memref<16x128xbf16, #tpu.memory_space<vmem>>, vector<16x128xbf16>
    %1 = arith.extf %0 : vector<16x128xbf16> to vector<16x128xf32>
    %c0_1 = arith.constant 0 : index
    %c0_2 = arith.constant 0 : index
    %2 = vector.load %arg2[%c0_1, %c0_2] : memref<1x128xf32, #tpu.memory_space<vmem>>, vector<1x128xf32>
    %c0_3 = arith.constant 0 : index
    %c0_4 = arith.constant 0 : index
    %3 = vector.load %arg3[%c0_3, %c0_4] : memref<1x128xf32, #tpu.memory_space<vmem>>, vector<1x128xf32>
    %cst = arith.constant dense<0.000000e+00> : vector<16xf32>
    %4 = vector.multi_reduction <add>, %1, %cst [1] : vector<16x128xf32> to vector<16xf32>
    %5 = vector.shape_cast %4 : vector<16xf32> to vector<16x1xf32>
    %cst_5 = arith.constant 1.280000e+02 : f32
    %6 = vector.broadcast %cst_5 : f32 to vector<16x1xf32>
    %7 = arith.divf %5, %6 : vector<16x1xf32>
    %8 = vector.broadcast %7 : vector<16x1xf32> to vector<16x128xf32>
    %9 = arith.subf %1, %8 : vector<16x128xf32>
    %10 = arith.mulf %9, %9 : vector<16x128xf32>
    %cst_6 = arith.constant dense<0.000000e+00> : vector<16xf32>
    %11 = vector.multi_reduction <add>, %10, %cst_6 [1] : vector<16x128xf32> to vector<16xf32>
    %12 = vector.shape_cast %11 : vector<16xf32> to vector<16x1xf32>
    %cst_7 = arith.constant 1.280000e+02 : f32
    %13 = vector.broadcast %cst_7 : f32 to vector<16x1xf32>
    %14 = arith.divf %12, %13 : vector<16x1xf32>
    %15 = vector.broadcast %7 : vector<16x1xf32> to vector<16x128xf32>
    %16 = arith.subf %1, %15 : vector<16x128xf32>
    %cst_8 = arith.constant 9.99999974E-6 : f32
    %17 = vector.broadcast %cst_8 : f32 to vector<16x1xf32>
    %18 = arith.addf %14, %17 : vector<16x1xf32>
    %19 = math.rsqrt %18 : vector<16x1xf32>
    %20 = vector.broadcast %19 : vector<16x1xf32> to vector<16x128xf32>
    %21 = arith.mulf %16, %20 : vector<16x128xf32>
    %22 = vector.broadcast %2 : vector<1x128xf32> to vector<16x128xf32>
    %23 = arith.mulf %21, %22 : vector<16x128xf32>
    %24 = vector.broadcast %3 : vector<1x128xf32> to vector<16x128xf32>
    %25 = arith.addf %23, %24 : vector<16x128xf32>
    %26 = arith.truncf %25 : vector<16x128xf32> to vector<16x128xbf16>
    %c0_9 = arith.constant 0 : index
    %c0_10 = arith.constant 0 : index
    %27 = vector.load %arg4[%c0_9, %c0_10] : memref<16x128xbf16, #tpu.memory_space<vmem>>, vector<16x128xbf16>
    tpu.vector_store %arg4[%c0_9, %c0_10], %26 {strides = array<i32>} : memref<16x128xbf16, #tpu.memory_space<vmem>>, vector<16x128xbf16>,
    return
  }
  func.func @transform_0(%arg0: i32) -> (i32, i32) {
    %c0_i32 = arith.constant 0 : i32
    %c0_i32_0 = arith.constant 0 : i32
    return %arg0, %c0_i32 : i32, i32
  }
  func.func @transform_1(%arg0: i32) -> (i32, i32) {
    %c0_i32 = arith.constant 0 : i32
    %c0_i32_0 = arith.constant 0 : i32
    %c0_i32_1 = arith.constant 0 : i32
    return %c0_i32, %c0_i32_0 : i32, i32
  }
  func.func @transform_2(%arg0: i32) -> (i32, i32) {
    %c0_i32 = arith.constant 0 : i32
    %c0_i32_0 = arith.constant 0 : i32
    %c0_i32_1 = arith.constant 0 : i32
    return %c0_i32, %c0_i32_0 : i32, i32
  }
  func.func @transform_3(%arg0: i32) -> (i32, i32) {
    %c0_i32 = arith.constant 0 : i32
    %c0_i32_0 = arith.constant 0 : i32
    return %arg0, %c0_i32 : i32, i32
  }
}

module attributes {stable_mosaic.version = 11 : i64} {
  func.func @_matmul_kernel(%arg0: i32, %arg1: i32, %arg2: i32, %arg3: memref<16x128xbf16, #tpu.memory_space<vmem>>, %arg4: memref<128x128xbf16, #tpu.memory_space<vmem>>, %arg5: memref<1x128xf32, #tpu.memory_space<vmem>>, %arg6: memref<16x128xf32, #tpu.memory_space<vmem>>, %arg7: memref<16x128xf32, #tpu.memory_space<vmem>>) attributes {dimension_semantics = [#tpu.dimension_semantics<parallel>, #tpu.dimension_semantics<parallel>, #tpu.dimension_semantics<arbitrary>], iteration_bounds = array<i64: 1, 1, 1>, scalar_prefetch = 0 : i64, scratch_operands = 1 : i64, tpu.core_type = #tpu.core_type<tc>, window_params = [{transform_indices = @transform_0, window_bounds = array<i64: 16, 128>}, {transform_indices = @transform_1, window_bounds = array<i64: 128, 128>}, {transform_indices = @transform_2, window_bounds = array<i64: 1, 128>}, {transform_indices = @transform_3, window_bounds = array<i64: 16, 128>}]} {
    %c0_i32 = arith.constant 0 : i32
    %0 = arith.cmpi eq, %arg2, %c0_i32 : i32
    %1 = arith.extui %0 : i1 to i32
    %c0_i32_0 = arith.constant 0 : i32
    %2 = arith.cmpi ne, %1, %c0_i32_0 : i32
    scf.if %2 {
      %cst_10 = arith.constant 0.000000e+00 : f32
      %12 = vector.broadcast %cst_10 : f32 to vector<16x128xf32>
      %c0_11 = arith.constant 0 : index
      %c0_12 = arith.constant 0 : index
      %13 = vector.load %arg7[%c0_11, %c0_12] : memref<16x128xf32, #tpu.memory_space<vmem>>, vector<16x128xf32>
      tpu.vector_store %arg7[%c0_11, %c0_12], %12 {strides = array<i32>} : memref<16x128xf32, #tpu.memory_space<vmem>>, vector<16x128xf32>,
    } else {
    }
    %c0 = arith.constant 0 : index
    %c0_1 = arith.constant 0 : index
    %3 = vector.load %arg7[%c0, %c0_1] : memref<16x128xf32, #tpu.memory_space<vmem>>, vector<16x128xf32>
    %c0_2 = arith.constant 0 : index
    %c0_3 = arith.constant 0 : index
    %4 = vector.load %arg3[%c0_2, %c0_3] : memref<16x128xbf16, #tpu.memory_space<vmem>>, vector<16x128xbf16>
    %c0_4 = arith.constant 0 : index
    %c0_5 = arith.constant 0 : index
    %5 = vector.load %arg4[%c0_4, %c0_5] : memref<128x128xbf16, #tpu.memory_space<vmem>>, vector<128x128xbf16>
    %cst = arith.constant dense<0.000000e+00> : vector<16x128xf32>
    %6 = tpu.matmul %4, %5, %cst {dimension_numbers = #tpu.dot_dimension_numbers<[1], [0], [0], [1], [0, 0, 1, 1], [], []>} : vector<16x128xbf16>, vector<128x128xbf16>, vector<16x128xf32> -> vector<16x128xf32>
    %7 = arith.addf %3, %6 : vector<16x128xf32>
    %c0_6 = arith.constant 0 : index
    %c0_7 = arith.constant 0 : index
    %8 = vector.load %arg7[%c0_6, %c0_7] : memref<16x128xf32, #tpu.memory_space<vmem>>, vector<16x128xf32>
    tpu.vector_store %arg7[%c0_6, %c0_7], %7 {strides = array<i32>} : memref<16x128xf32, #tpu.memory_space<vmem>>, vector<16x128xf32>,
    %c0_i32_8 = arith.constant 0 : i32
    %9 = arith.cmpi eq, %arg2, %c0_i32_8 : i32
    %10 = arith.extui %9 : i1 to i32
    %c0_i32_9 = arith.constant 0 : i32
    %11 = arith.cmpi ne, %10, %c0_i32_9 : i32
    scf.if %11 {
      %c0_10 = arith.constant 0 : index
      %c0_11 = arith.constant 0 : index
      %12 = vector.load %arg7[%c0_10, %c0_11] : memref<16x128xf32, #tpu.memory_space<vmem>>, vector<16x128xf32>
      %c0_12 = arith.constant 0 : index
      %c0_13 = arith.constant 0 : index
      %13 = vector.load %arg5[%c0_12, %c0_13] : memref<1x128xf32, #tpu.memory_space<vmem>>, vector<1x128xf32>
      %14 = vector.broadcast %13 : vector<1x128xf32> to vector<16x128xf32>
      %15 = arith.addf %12, %14 : vector<16x128xf32>
      %c0_14 = arith.constant 0 : index
      %c0_15 = arith.constant 0 : index
      %16 = vector.load %arg6[%c0_14, %c0_15] : memref<16x128xf32, #tpu.memory_space<vmem>>, vector<16x128xf32>
      tpu.vector_store %arg6[%c0_14, %c0_15], %15 {strides = array<i32>} : memref<16x128xf32, #tpu.memory_space<vmem>>, vector<16x128xf32>,
    } else {
    }
    return
  }
  func.func @transform_0(%arg0: i32, %arg1: i32, %arg2: i32) -> (i32, i32) {
    %c0_i32 = arith.constant 0 : i32
    return %arg0, %arg2 : i32, i32
  }
  func.func @transform_1(%arg0: i32, %arg1: i32, %arg2: i32) -> (i32, i32) {
    %c0_i32 = arith.constant 0 : i32
    return %arg2, %arg1 : i32, i32
  }
  func.func @transform_2(%arg0: i32, %arg1: i32, %arg2: i32) -> (i32, i32) {
    %c0_i32 = arith.constant 0 : i32
    %c0_i32_0 = arith.constant 0 : i32
    return %c0_i32, %arg1 : i32, i32
  }
  func.func @transform_3(%arg0: i32, %arg1: i32, %arg2: i32) -> (i32, i32) {
    %c0_i32 = arith.constant 0 : i32
    return %arg0, %arg1 : i32, i32
  }
}

</mosaic_0001>

<bundles_post_ra>
// kernel: vietocr_forward.9
= control target key start
LH: loop header
LB: loop body
LE: loop exit
PB: predicated region body
PF: predicated region fallthrough
CT: control target
= control target key end

     0   :  { %s573_s12 = smov 0   ;;  %s575_s13 = smov 0   ;;  %s612_s0 = inlined_call_operand.vmem [shape: bf16[64,16], index: 0, kind: input, shape index: {}]   ;;  %s613_s1 = inlined_call_operand.vmem [shape: bf16[16,128], index: 1, kind: input, shape index: {}]   ;;  %s614_s2 = inlined_call_operand.vmem [shape: f32[1,128], index: 2, kind: input, shape index: {}]   ;;  %s615_s3 = inlined_call_operand.vmem [shape: bf16[64,128], index: 3, kind: output, shape index: {}]  }
   0x1   :  { %s577_s14 = smov 0  }
   0x2 LB: > { %s32_s15 = sadd.s32 1, %s547_s13  ;;  %p468_p0 = scmp.ge.s32.totalorder %s551_s14, 1  ;;  %s551_s14 = sphi %s577_s14, %s13_s14   ;;  %s547_s13 = sphi %s575_s13, %s617_s13   ;;  %s543_s12 = sphi %s573_s12, %s616_s12  }
   0x3   : > { %p34_p1 = scmp.ge.s32.totalorder %s32_s15, 2  ;;  %p188_p2 = scmp.lt.s32.totalorder %s551_s14, 3 }
   0x5   : > { %s619_s15 = smov (%p34_p1, %s32_s15), 0  ;;  %p189_p3 = pnand %p468_p0, %p188_p2 }
   0x6   : > { %s469_s18 = sshll.u32 (!%p189_p3), %s543_s12, 2 }
   0x7   : > { %192 = sbr.rel (%p189_p3) target bundleno = 156 (0x9c), region = 32  ;;  %p230_p4 = scmp.lt.s32.totalorder (!%p189_p3), %s469_s18, 7 }
   0xc   : > { %v491_v0 = vld [vmem:[%s613_s1] sm:$0xff]  ;;  %s621_s18 = smov (!%p230_p4, %s469_s18), 7  ;;  %vm294_vm0 = vcmask 130048  }
   0xd   : > { %308 = vmatpush.bf16.msra.mxu0 %v491_v0  ;;  %503 = vmatpush.bf16.msra.mxu1 %v491_v0  ;;  %s470_s19 = sshll.u32 %s621_s18, 2  ;;  %v528_v5 = vld [vmem:[%s614_s2] ss:$0 sm:$0xff] }
   0xe   : > { %s236_s22 = scalar_lea.vmem %s612_s0, %s470_s19  ;;  %s257_s27 = scalar_lea.vmem %s615_s3, %s470_s19 }
   0xf   : > { %v489_v1 = vld [vmem:[%s236_s22] sm:$0xff]  ;;  %v490_v2 = vld [vmem:[%s236_s22 + $0x8] sm:$0xff] }
  0x10   : > { %485 = vmatmul.msk.bf16.vlgmr.msra.gmra.mxu0 %vm294_vm0, %v489_v1  ;;  %486 = vmatmul.msk.bf16.vlgmr.msra.gmra.mxu1 %vm294_vm0, %v490_v2 }
  0x8d   : > { %v310_v3 = vpop.f32.mrf.mxu0  ;;  %v315_v4 = vpop.f32.mrf.mxu1 }
  0x8e   : > { %v339_v8 = vadd.f32 %v528_v5, %v310_v3  ;;  %v341_v9 = vadd.f32 %v528_v5, %v315_v4 }
  0x95   : > { %v312_v6 = vpop.f32.mrf.mxu0  ;;  %v317_v7 = vpop.f32.mrf.mxu1 }
  0x96   : > { %v340_v10 = vadd.f32 %v528_v5, %v312_v6  ;;  %v342_v11 = vadd.f32 %v528_v5, %v317_v7 }
  0x98   : > { %v495_v12 = vpack.c.bf16 %v340_v10, %v339_v8  ;;  %v500_v13 = vpack.c.bf16 %v342_v11, %v341_v9 }
  0x9a   : > { %496 = vst [vmem:[%s257_s27] sm:$0xff] %v495_v12  }
  0x9b   : > { %502 = vst [vmem:[%s257_s27 + $0x8] sm:$0xff] %v500_v13  }
  0x9c PF: > { %s13_s14 = sadd.s32 1, %s551_s14   ;;  %s616_s12 = smov %s547_s13 }
  0x9d   : > { %p10_p5 = scmp.ge.s32.totalorder %s13_s14, 4   ;;  %s617_s13 = smov %s619_s15 }
  0x9f   :  { %12 = sbr.rel (!%p10_p5) target bundleno = 2 (0x2), region = 76 }

// kernel: vietocr_forward.10
= control target key start
LH: loop header
LB: loop body
LE: loop exit
PB: predicated region body
PF: predicated region fallthrough
CT: control target
= control target key end

     0   :  { %s1613_s17 = smov 0   ;;  %s1615_s18 = smov 0   ;;  %s1815_s0 = inlined_call_operand.vmem [shape: bf16[2,32,128], index: 0, kind: input, shape index: {}]   ;;  %s1816_s1 = inlined_call_operand.vmem [shape: bf16[4,128,32], index: 1, kind: input, shape index: {}]   ;;  %s1817_s2 = inlined_call_operand.vmem [shape: f32[4,1,32], index: 2, kind: input, shape index: {}]   ;;  %s1818_s3 = inlined_call_operand.vmem [shape: bf16[4,128,32], index: 3, kind: input, shape index: {}]   ;;  %s1819_s4 = inlined_call_operand.vmem [shape: f32[4,1,32], index: 4, kind: input, shape index: {}]   ;;  %s1820_s5 = inlined_call_operand.vmem [shape: bf16[4,128,32], index: 5, kind: input, shape index: {}]   ;;  %s1821_s6 = inlined_call_operand.vmem [shape: f32[4,1,32], index: 6, kind: input, shape index: {}]   ;;  %s1822_s7 = inlined_call_operand.vmem [shape: bf16[4,32,128], index: 7, kind: input, shape index: {}]   ;;  %s1823_s8 = inlined_call_operand.vmem [shape: f32[1,128], index: 8, kind: input, shape index: {}]   ;;  %s1824_s9 = inlined_call_operand.vmem [shape: f32[1,128], index: 9, kind: input, shape index: {}]   ;;  %s1825_s10 = inlined_call_operand.vmem [shape: f32[1,128], index: 10, kind: input, shape index: {}]   ;;  %s1826_s11 = inlined_call_operand.vmem [shape: bf16[2,32,128], index: 11, kind: output, shape index: {}]  }
   0x1   :  { %1830 = sst [smem:[#allocation8_spill]] %s1815_s0  ;;  %s1617_s19 = smov 0  }
   0x2   :  { %1831 = sst [smem:[#allocation9_spill]] %s1816_s1  ;;  %s1619_s20 = smov 0  }
   0x3   :  { %1832 = sst [smem:[#allocation10_spill]] %s1818_s3  ;;  %s1621_s21 = smov 0  }
   0x4 LB: > { %1833 = sst [smem:[#allocation3_spill]] %s1541_s19  ;;  %s30_s22 = sadd.s32 1, %s1541_s19  ;;  %s1549_s21 = sphi %s1621_s21, %s21_s21   ;;  %s1545_s20 = sphi %s1619_s20, %s1846_s20   ;;  %s1541_s19 = sphi %s1617_s19, %s1845_s19   ;;  %s1537_s18 = sphi %s1615_s18, %s1844_s18   ;;  %s1533_s17 = sphi %s1613_s17, %s1843_s17  }
   0x5   : > { %1834 = sst [smem:[#allocation4_spill]] %s1545_s20  ;;  %s33_s23 = sadd.s32 1, %s1545_s20 }
   0x6   : > { %1835 = sst [smem:[#allocation5_spill]] %s1549_s21  ;;  %p31_p0 = scmp.ge.s32.totalorder %s30_s22, 4 }
   0x7   : > { %p1255_p1 = scmp.ge.s32.totalorder %s1549_s21, 1  ;;  %p413_p2 = scmp.lt.s32.totalorder %s1549_s21, 9 }
   0x8   : > { %s1848_s22 = smov (%p31_p0, %s30_s22), 0  ;;  %s1850_s23 = smov (!%p31_p0, %s33_s23), %s1545_s20 }
   0x9   : > { %1836 = sst [smem:[#allocation6_spill]] %s1848_s22  ;;  %p414_p3 = pnand %p1255_p1, %p413_p2 }
   0xa   : > { %p35_p4 = scmp.ge.s32.totalorder %s1850_s23, 2  ;;  %p482_p5 = scmp.lt.s32.totalorder (!%p414_p3), %s1537_s18, 1 }
   0xb   : > { %417 = sbr.rel (%p414_p3) target bundleno = 1212 (0x4bc), region = 64  ;;  %p487_p6 = scmp.lt.s32.totalorder (!%p414_p3), %s1533_s17, 3 }
   0xc   : > { %s1852_s23 = smov (%p35_p4, %s1850_s23), 0  ;;  %s1838_s0 = sld [smem:[#allocation8_spill]] (!%p414_p3) }
   0xd   : > { %1837 = sst [smem:[#allocation7_spill]] %s1852_s23  ;;  %p1268_p7 = scmp.ne.s32.totalorder (!%p414_p3), %s1533_s17, 0 }
   0xe   : > { %s1839_s1 = sld [smem:[#allocation9_spill]] (!%p414_p3) }
   0xf   : > { %s1840_s3 = sld [smem:[#allocation10_spill]] (!%p414_p3) }
  0x10   : > { %s1854_s18 = smov (!%p482_p5, %s1537_s18), 1 }
  0x11   : > { %s1647_s24 = scalar_select %p487_p6, %s1533_s17, 3 }
  0x12   : > { %s1390_s25 = sshll.u32 %s1854_s18, 4 }
  0x13   : > { %s1652_s28 = scalar_lea.vmem %s1838_s0, %s1390_s25  ;;  %s1391_s29 = sshll.u32 %s1647_s24, 6 }
  0x14   : > { %s1658_s13 = scalar_lea.vmem %s1839_s1, %s1391_s29  ;;  %s502_s26 = scalar_lea.vmem %s1819_s4, %s1647_s24 }
  0x15   : > { %s1667_s20 = scalar_lea.vmem %s1840_s3, %s1391_s29  ;;  %s1676_s21 = scalar_lea.vmem %s1820_s5, %s1391_s29 }
  0x16   : > { %s510_s1 = scalar_lea.vmem %s1821_s6, %s1647_s24  ;;  %s1394_s14 = sshll.u32 %s1647_s24, 4 }
  0x17   : > { %s1686_s22 = scalar_lea.vmem %s1826_s11, %s1390_s25  ;;  %s1691_s19 = scalar_lea.vmem %s1822_s7, %s1394_s14 }
  0x18   : > { %525 = sbr.rel (%p1268_p7) target bundleno = 34 (0x22), region = 68 }
  0x1d   : > { %v1551_v0 = vmov 0.0  }
  0x1e   : > { %526 = vst [vmem:[#allocation2 + $0x10] sm:$0xff] %v1551_v0 }
  0x1f   : > { %527 = vst [vmem:[#allocation2] sm:$0xff] %v1551_v0 }
  0x20   : > { %528 = vst [vmem:[#allocation2 + $0x18] sm:$0xff] %v1551_v0 }
  0x21   : > { %529 = vst [vmem:[#allocation2 + $0x8] sm:$0xff] %v1551_v0 }
  0x22 PF: > { %v1413_v1 = vld [vmem:[%s1667_s20 + $0x38] sm:$0xff]  ;;  %v1412_v2 = vld [vmem:[%s1667_s20 + $0x30] sm:$0xff]  ;;  %v1697_v3 = vld [vmem:[%s1652_s28] sm:$0xff]   ;;  %vm813_vm0 = vcmask 261120   ;;  %p1387_p8 = scmp.ne.s32.totalorder %s1533_s17, 3 }
  0x23   : > { %720 = vmatpush.bf16.msra.mxu1 %v1413_v1  ;;  %v1700_v4 = vld [vmem:[%s1652_s28 + $0x8] sm:$0xff]   ;;  %v1405_v5 = vld [vmem:[%s1658_s13 + $0x38] sm:$0xff]  ;;  %v1404_v6 = vld [vmem:[%s1658_s13 + $0x30] sm:$0xff] }
  0x24   : > { %648 = vmatpush.bf16.msra.mxu0 %v1405_v5  ;;  %v1411_v7 = vld [vmem:[%s1667_s20 + $0x28] sm:$0xff]  ;;  %v1410_v9 = vld [vmem:[%s1667_s20 + $0x20] sm:$0xff]  ;;  %v1409_v11 = vld [vmem:[%s1667_s20 + $0x18] sm:$0xff] }
  0x25   : > { %v1403_v8 = vld [vmem:[%s1658_s13 + $0x28] sm:$0xff]  ;;  %v1402_v10 = vld [vmem:[%s1658_s13 + $0x20] sm:$0xff]  ;;  %v1401_v12 = vld [vmem:[%s1658_s13 + $0x18] sm:$0xff] }
  0x26   : > { %v1408_v13 = vld [vmem:[%s1667_s20 + $0x10] sm:$0xff]  ;;  %v1407_v15 = vld [vmem:[%s1667_s20 + $0x8] sm:$0xff]  ;;  %v1406_v17 = vld [vmem:[%s1667_s20] sm:$0xff] }
  0x27   : > { %721 = vmatpush.bf16.msra.mxu1 %v1412_v2  ;;  %v1400_v14 = vld [vmem:[%s1658_s13 + $0x10] sm:$0xff]  ;;  %v1399_v16 = vld [vmem:[%s1658_s13 + $0x8] sm:$0xff]  ;;  %v1398_v18 = vld [vmem:[%s1658_s13] sm:$0xff] }
  0x28   : > { %649 = vmatpush.bf16.msra.mxu0 %v1404_v6  ;;  %v1396_v19 = vld [vmem:[%s1652_s28] sm:$0xff]  ;;  %v1718_v20 = vld [vmem:[%s1652_s28 + $0x8] sm:$0xff]  ;;  %s1841_s28 = scalar_lea.vmem %s1817_s2, %s1647_s24  ;;  %v1421_v45 = vld [vmem:[%s1676_s21 + $0x38] sm:$0xff] }
  0x29   : > { %v1479_v25 = vld [vmem:[%s502_s26] ss:$0 sm:$0xff]  ;;  %792 = vmatpush.bf16.msra.mxu2 %v1421_v45  ;;  %v1420_v46 = vld [vmem:[%s1676_s21 + $0x30] sm:$0xff]  ;;  %v1419_v47 = vld [vmem:[%s1676_s21 + $0x28] sm:$0xff] }
  0x2a   : > { %v1480_v35 = vld [vmem:[%s1841_s28] ss:$0 sm:$0xff]  ;;  %v1417_v49 = vld [vmem:[%s1676_s21 + $0x18] sm:$0xff]  ;;  %v1416_v50 = vld [vmem:[%s1676_s21 + $0x10] sm:$0xff] }
  0x2b   : > { %722 = vmatpush.bf16.msra.mxu1 %v1411_v7  ;;  %v1418_v48 = vld [vmem:[%s1676_s21 + $0x20] sm:$0xff]  ;;  %v1415_v54 = vld [vmem:[%s1676_s21 + $0x8] sm:$0xff] }
  0x2c   : > { %650 = vmatpush.bf16.msra.mxu0 %v1403_v8  ;;  %v1414_v55 = vld [vmem:[%s1676_s21] sm:$0xff] }
  0x2d   : > { %793 = vmatpush.bf16.msra.mxu2 %v1420_v46 }
  0x2f   : > { %723 = vmatpush.bf16.msra.mxu1 %v1410_v9 }
  0x30   : > { %651 = vmatpush.bf16.msra.mxu0 %v1402_v10 }
  0x31   : > { %794 = vmatpush.bf16.msra.mxu2 %v1419_v47 }
  0x33   : > { %724 = vmatpush.bf16.msra.mxu1 %v1409_v11 }
  0x34   : > { %652 = vmatpush.bf16.msra.mxu0 %v1401_v12 }
  0x35   : > { %795 = vmatpush.bf16.msra.mxu2 %v1418_v48 }
  0x37   : > { %725 = vmatpush.bf16.msra.mxu1 %v1408_v13 }
  0x38   : > { %653 = vmatpush.bf16.msra.mxu0 %v1400_v14 }
  0x39   : > { %796 = vmatpush.bf16.msra.mxu2 %v1417_v49  ;;  %v1422_v49 = vld [vmem:[%s1691_s19] sm:$0xff] }
  0x3b   : > { %726 = vmatpush.bf16.msra.mxu1 %v1407_v15 }
  0x3c   : > { %654 = vmatpush.bf16.msra.mxu0 %v1399_v16 }
  0x3d   : > { %797 = vmatpush.bf16.msra.mxu2 %v1416_v50 }
  0x3f   : > { %727 = vmatpush.bf16.msra.mxu1 %v1406_v17 }
  0x40   : > { %655 = vmatpush.bf16.msra.mxu0 %v1398_v18 }
  0x41   : > { %798 = vmatpush.bf16.msra.mxu2 %v1415_v54 }
  0x42   : > { %728 = vmatmul.bf16.vlgmr.msra.gmra.mxu1 %v1396_v19 }
  0x43   : > { %656 = vmatmul.bf16.vlgmr.msra.gmra.mxu0 %v1396_v19 }
  0x45   : > { %799 = vmatpush.bf16.msra.mxu2 %v1414_v55 }
  0x48   : > { %800 = vmatmul.bf16.vlgmr.msra.gmra.mxu2 %v1396_v19 }
  0x52   : > { %733 = vmatmul.bf16.gmra.mxu1 %v1718_v20 }
  0x53   : > { %661 = vmatmul.bf16.gmra.mxu0 %v1718_v20 }
  0x58   : > { %805 = vmatmul.bf16.gmra.mxu2 %v1718_v20 }
  0xbf   : > { %v729_v21 = vpop.f32.mrf.mxu1 }
  0xc0   : > { %v657_v24 = vpop.f32.mrf.mxu0  ;;  %v730_v32 = vadd.f32 %v1479_v25, %v729_v21 }
  0xc1   : > { %v658_v37 = vadd.f32 %v1480_v35, %v657_v24 }
  0xc7   : > { %v731_v22 = vpop.f32.mrf.mxu1 }
  0xc8   : > { %v732_v30 = vadd.f32 %v1479_v25, %v731_v22  ;;  %v659_v33 = vpop.f32.mrf.mxu0 }
  0xc9   : > { %v660_v38 = vadd.f32 %v1480_v35, %v659_v33 }
  0xca   : > { %v739_v34 = vpack.c.bf16 %v732_v30, %v730_v32 }
  0xcb   : > { %v667_v40 = vpack.c.bf16 %v660_v38, %v658_v37  ;;  %v801_v18 = vpop.f32.mrf.mxu2 }
  0xcc   : > { %v821_v36 = vsel %vm813_vm0, %v739_v34, 0 }
  0xcf   : > { %v734_v23 = vpop.f32.mrf.mxu1 }
  0xd0   : > { %v735_v27 = vadd.f32 %v1479_v25, %v734_v23  ;;  %v662_v39 = vpop.f32.mrf.mxu0 }
  0xd1   : > { %v663_v42 = vadd.f32 %v1480_v35, %v662_v39 }
  0xd3   : > { %v803_v22 = vpop.f32.mrf.mxu2 }
  0xd7   : > { %v736_v26 = vpop.f32.mrf.mxu1 }
  0xd8   : > { %v737_v28 = vadd.f32 %v1479_v25, %v736_v26  ;;  %v664_v41 = vpop.f32.mrf.mxu0  ;;  %v1481_v26 = vld [vmem:[%s510_s1] ss:$0 sm:$0xff] }
  0xd9   : > { %v665_v43 = vadd.f32 %v1480_v35, %v664_v41  ;;  %v804_v30 = vadd.f32 %v1481_v26, %v803_v22  ;;  %v1423_v35 = vld [vmem:[%s1691_s19 + $0x8] sm:$0xff] }
  0xda   : > { %v740_v29 = vpack.c.bf16 %v737_v28, %v735_v27  ;;  %954 = vmatpush.bf16.msrb.mxu0 %v1423_v35  ;;  %1435 = vmatpush.bf16.msrb.mxu1 %v1423_v35 }
  0xdb   : > { %v668_v44 = vpack.c.bf16 %v665_v43, %v663_v42  ;;  %v806_v25 = vpop.f32.mrf.mxu2 }
  0xdc   : > { %v824_v31 = vsel %vm813_vm0, %v740_v29, 0  ;;  %v807_v27 = vadd.f32 %v1481_v26, %v806_v25  ;;  %v802_v29 = vadd.f32 %v1481_v26, %v801_v18 }
  0xdd   : > { %832 = vmatpush.bf16.xpose.msra.mxu3 %v824_v31 }
  0xde   : > { %v811_v33 = vpack.c.bf16 %v804_v30, %v802_v29  ;;  %955 = vmatpush.bf16.msrb.mxu0 %v1422_v49  ;;  %1436 = vmatpush.bf16.msrb.mxu1 %v1422_v49 }
  0xe3   : > { %v808_v28 = vpop.f32.mrf.mxu2 }
  0xe4   : > { %v809_v31 = vadd.f32 %v1481_v26, %v808_v28 }
  0xe5   : > { %833 = vmatpush.bf16.xpose.msra.mxu3 %v821_v36 }
  0xe6   : > { %v812_v32 = vpack.c.bf16 %v809_v31, %v807_v27 }
  0xec   : > { %1373 = vmatmul.msk.bf16.vlgmr.msra.gmra.mxu3 %vm813_vm0, %v667_v40 }
  0xed   : > { %907 = vmatpush.bf16.msrb.mxu3 %v812_v32 }
  0xf1   : > { %908 = vmatpush.bf16.msrb.mxu3 %v811_v33 }
  0xfc   : > { %1374 = vmatmul.msk.bf16.gmra.mxu3 %vm813_vm0, %v668_v44 }
 0x16f   : > { %v835_v51 = vpop.f32.mrf.mxu3 }
 0x170   : > { %v845_v52 = vmul.f32 0.17677669, %v835_v51 }
 0x172   : > { %v849_v53 = vsel %vm813_vm0, %v845_v52, -inf }
 0x173   : > { %850 = vmax.xlane.f32.xlu0 %v849_v53 }
 0x177   : > { %v837_v56 = vpop.f32.mrf.mxu3 }
 0x178   : > { %v846_v57 = vmul.f32 0.17677669, %v837_v56  ;;  %v920_v56 = vld [vmem:[#allocation2 + $0x10] sm:$0xff] }
 0x17a   : > { %v852_v58 = vsel %vm813_vm0, %v846_v57, -inf }
 0x17b   : > { %853 = vmax.xlane.f32.xlu0 %v852_v58 }
 0x17f   : > { %v840_v59 = vpop.f32.mrf.mxu3 }
 0x180   : > { %v847_v60 = vmul.f32 0.17677669, %v840_v59  ;;  %v921_v59 = vld [vmem:[#allocation2] sm:$0xff] }
 0x182   : > { %v855_v61 = vsel %vm813_vm0, %v847_v60, -inf }
 0x183   : > { %856 = vmax.xlane.f32.xlu1 %v855_v61 }
 0x187   : > { %v842_v62 = vpop.f32.mrf.mxu3 }
 0x188   : > { %v848_v63 = vmul.f32 0.17677669, %v842_v62  ;;  %v922_v62 = vld [vmem:[#allocation2 + $0x18] sm:$0xff] }
 0x18a   : > { %v858_v0 = vsel %vm813_vm0, %v848_v63, -inf }
 0x18b   : > { %859 = vmax.xlane.f32.xlu1 %v858_v0 }
 0x1e6   : > { %v851_v1 = vpop.xlane.xlu0 %850 }
 0x1e7   : > { %v861_v2 = vsub.f32 %v845_v52, %v851_v1  ;;  %v923_v1 = vld [vmem:[#allocation2 + $0x8] sm:$0xff] }
 0x1e9   : > { %v865_v5 = vmul.f32 1.442695, %v861_v2 }
 0x1eb   : > { %1482 = vpow2.f32 %v865_v5 }
 0x1ee   : > { %v854_v6 = vpop.xlane.xlu0 %853 }
 0x1ef   : > { %v862_v7 = vsub.f32 %v846_v57, %v854_v6 }
 0x1f1   : > { %v1483_v8 = vpop.eup %1482  ;;  %v867_v9 = vmul.f32 1.442695, %v862_v7 }
 0x1f2   : > { %v873_v10 = vsel %vm813_vm0, %v1483_v8, 0.0 }
 0x1f3   : > { %1484 = vpow2.f32 %v867_v9  ;;  %874 = vadd.xlane.f32.xlu2 %v873_v10 }
 0x1f6   : > { %v857_v11 = vpop.xlane.xlu1 %856 }
 0x1f7   : > { %v863_v12 = vsub.f32 %v847_v60, %v857_v11 }
 0x1f9   : > { %v1485_v13 = vpop.eup %1484  ;;  %v869_v14 = vmul.f32 1.442695, %v863_v12 }
 0x1fa   : > { %v876_v15 = vsel %vm813_vm0, %v1485_v13, 0.0 }
 0x1fb   : > { %1486 = vpow2.f32 %v869_v14  ;;  %877 = vadd.xlane.f32.xlu2 %v876_v15 }
 0x1fe   : > { %v860_v16 = vpop.xlane.xlu1 %859 }
 0x1ff   : > { %v864_v17 = vsub.f32 %v848_v63, %v860_v16 }
 0x201   : > { %v1487_v19 = vpop.eup %1486  ;;  %v871_v20 = vmul.f32 1.442695, %v864_v17 }
 0x202   : > { %v879_v21 = vsel %vm813_vm0, %v1487_v19, 0.0 }
 0x203   : > { %1488 = vpow2.f32 %v871_v20  ;;  %880 = vadd.xlane.f32.xlu0 %v879_v21 }
 0x209   : > { %v1489_v23 = vpop.eup %1488 }
 0x20a   : > { %v882_v24 = vsel %vm813_vm0, %v1489_v23, 0.0 }
 0x20b   : > { %883 = vadd.xlane.f32.xlu1 %v882_v24 }
 0x266   : > { %v875_v34 = vpop.xlane.xlu2 %874 }
 0x267   : > { %1490 = vrcp.f32 %v875_v34 }
 0x26d   : > { %v1491_v37 = vpop.eup %1490 }
 0x26e   : > { %v878_v36 = vpop.xlane.xlu2 %877  ;;  %v889_v39 = vmul.f32 %v1491_v37, %v1483_v8 }
 0x26f   : > { %1492 = vrcp.f32 %v878_v36 }
 0x275   : > { %v1493_v38 = vpop.eup %1492 }
 0x276   : > { %v890_v40 = vmul.f32 %v1493_v38, %v1485_v13  ;;  %v881_v42 = vpop.xlane.xlu0 %880 }
 0x277   : > { %1494 = vrcp.f32 %v881_v42 }
 0x278   : > { %v893_v41 = vpack.c.bf16 %v890_v40, %v889_v39 }
 0x27a   : > { %1375 = vmatmul.msk.bf16.vlgmr.msrb.gmra.mxu3 %vm813_vm0, %v893_v41 }
 0x27d   : > { %v1495_v44 = vpop.eup %1494 }
 0x27e   : > { %v884_v43 = vpop.xlane.xlu1 %883  ;;  %v891_v46 = vmul.f32 %v1495_v44, %v1487_v19 }
 0x27f   : > { %1496 = vrcp.f32 %v884_v43 }
 0x285   : > { %v1497_v45 = vpop.eup %1496 }
 0x286   : > { %v892_v47 = vmul.f32 %v1497_v45, %v1489_v23 }
 0x288   : > { %v894_v48 = vpack.c.bf16 %v892_v47, %v891_v46 }
 0x28a   : > { %1376 = vmatmul.msk.bf16.gmra.mxu3 %vm813_vm0, %v894_v48 }
 0x2fd   : > { %v910_v50 = vpop.f32.mrf.mxu3 }
 0x305   : > { %v912_v51 = vpop.f32.mrf.mxu3 }
 0x306   : > { %v924_v52 = vpack.c.bf16 %v912_v51, %v910_v50 }
 0x308   : > { %1385 = vmatmul.msk.bf16.vlgmr.msrb.gmra.mxu0 %vm813_vm0, %v924_v52 }
 0x30d   : > { %v915_v53 = vpop.f32.mrf.mxu3 }
 0x315   : > { %v917_v54 = vpop.f32.mrf.mxu3 }
 0x316   : > { %v925_v55 = vpack.c.bf16 %v917_v54, %v915_v53 }
 0x318   : > { %1386 = vmatmul.msk.bf16.vlgmr.msrb.gmra.mxu1 %vm813_vm0, %v925_v55 }
 0x385   : > { %v957_v57 = vpop.f32.mrf.mxu0 }
 0x386   : > { %v967_v58 = vadd.f32 %v957_v57, %v920_v56 }
 0x388   : > { %971 = vst [vmem:[#allocation2 + $0x10] sm:$0xff] %v967_v58 }
 0x38d   : > { %v959_v60 = vpop.f32.mrf.mxu0 }
 0x38e   : > { %v968_v61 = vadd.f32 %v959_v60, %v921_v59 }
 0x390   : > { %972 = vst [vmem:[#allocation2] sm:$0xff] %v968_v61 }
 0x395   : > { %v962_v63 = vpop.f32.mrf.mxu1 }
 0x396   : > { %v969_v0 = vadd.f32 %v962_v63, %v922_v62 }
 0x398   : > { %973 = vst [vmem:[#allocation2 + $0x18] sm:$0xff] %v969_v0 }
 0x39c   : > { %978 = sbr.rel (%p1387_p8) target bundleno = 1212 (0x4bc), region = 72 }
 0x39d   : > { %v964_v2 = vpop.f32.mrf.mxu1 }
 0x39e   : > { %v970_v5 = vadd.f32 %v964_v2, %v923_v1 }
 0x3a0   : > { %974 = vst [vmem:[#allocation2 + $0x8] sm:$0xff] %v970_v5 }
 0x3a1   : > { %v981_v6 = vld [vmem:[#allocation2 + $0x18] sm:$0xff]  ;;  %v1498_v7 = vld [vmem:[%s1823_s8] ss:$0 sm:$0xff]  ;;  %v993_v8 = vunpack.c.l.bf16 %v1700_v4  ;;  %v991_v9 = vunpack.c.l.bf16 %v1697_v3  ;;  %v979_v10 = vld [vmem:[#allocation2 + $0x10] sm:$0xff]  ;;  %v994_v18 = vunpack.c.h.bf16 %v1700_v4  ;;  %v992_v20 = vunpack.c.h.bf16 %v1697_v3 }
 0x3a2   : > { %v989_v11 = vadd.f32 %v1498_v7, %v981_v6  ;;  %v987_v12 = vadd.f32 %v1498_v7, %v979_v10  ;;  %v980_v14 = vld [vmem:[#allocation2] sm:$0xff]  ;;  %v1552_v23 = vmov 128.0  }
 0x3a3   : > { %v988_v19 = vadd.f32 %v1498_v7, %v980_v14  ;;  %1501 = vrcp.f32 %v1552_v23 }
 0x3a4   : > { %v997_v15 = vadd.f32 %v993_v8, %v989_v11  ;;  %v995_v16 = vadd.f32 %v991_v9, %v987_v12 }
 0x3a5   : > { %v996_v22 = vadd.f32 %v992_v20, %v988_v19 }
 0x3a6   : > { %1005 = vadd.xlane.f32.xlu1 %v997_v15  ;;  %1001 = vadd.xlane.f32.xlu0 %v995_v16 }
 0x3a7   : > { %v982_v13 = vld [vmem:[#allocation2 + $0x8] sm:$0xff] }
 0x3a8   : > { %v990_v17 = vadd.f32 %v1498_v7, %v982_v13 }
 0x3a9   : > { %v1502_v24 = vpop.eup %1501 }
 0x3aa   : > { %v998_v21 = vadd.f32 %v994_v18, %v990_v17  ;;  %v1010_v25 = vmul.f32 128.0, %v1502_v24  ;;  %vm1014_vm1 = vweird.f32 %v1502_v24  ;;  %v1499_v17 = vld [vmem:[%s1824_s9] ss:$0 sm:$0xff] }
 0x3ac   : > { %v1011_v26 = vsub.f32 1.0, %v1010_v25 }
 0x3ae   : > { %1007 = vadd.xlane.f32.xlu1 %v998_v21  ;;  %1003 = vadd.xlane.f32.xlu0 %v996_v22  ;;  %v1012_v27 = vmul.f32 %v1502_v24, %v1011_v26 }
 0x3b0   : > { %v1013_v28 = vadd.f32 %v1502_v24, %v1012_v27 }
 0x3b2   : > { %v1015_v29 = vsel %vm1014_vm1, %v1502_v24, %v1013_v28  ;;  %v1500_v24 = vld [vmem:[%s1825_s10] ss:$0 sm:$0xff] }
 0x419   : > { %v1006_v30 = vpop.xlane.xlu1 %1005  ;;  %v1002_v31 = vpop.xlane.xlu0 %1001 }
 0x41a   : > { %v1018_v32 = vmul.f32 %v1015_v29, %v1006_v30  ;;  %v1016_v4 = vmul.f32 %v1015_v29, %v1002_v31 }
 0x41c   : > { %v1772_v33 = vsub.f32 %v997_v15, %v1018_v32  ;;  %v1774_v3 = vsub.f32 %v995_v16, %v1016_v4 }
 0x41e   : > { %v1026_v34 = vmul.f32 %v1772_v33, %v1772_v33  ;;  %v1024_v35 = vmul.f32 %v1774_v3, %v1774_v3 }
 0x420   : > { %1032 = vadd.xlane.f32.xlu0 %v1026_v34  ;;  %1028 = vadd.xlane.f32.xlu2 %v1024_v35 }
 0x421   : > { %v1008_v36 = vpop.xlane.xlu1 %1007  ;;  %v1004_v37 = vpop.xlane.xlu0 %1003 }
 0x422   : > { %v1019_v38 = vmul.f32 %v1015_v29, %v1008_v36  ;;  %v1017_v39 = vmul.f32 %v1015_v29, %v1004_v37 }
 0x424   : > { %v1780_v40 = vsub.f32 %v998_v21, %v1019_v38  ;;  %v1782_v41 = vsub.f32 %v996_v22, %v1017_v39 }
 0x426   : > { %v1027_v42 = vmul.f32 %v1780_v40, %v1780_v40  ;;  %v1025_v43 = vmul.f32 %v1782_v41, %v1782_v41 }
 0x428   : > { %1034 = vadd.xlane.f32.xlu1 %v1027_v42  ;;  %1030 = vadd.xlane.f32.xlu2 %v1025_v43 }
 0x493   : > { %v1029_v44 = vpop.xlane.xlu2 %1028  ;;  %v1033_v45 = vpop.xlane.xlu0 %1032 }
 0x494   : > { %v1036_v46 = vmul.f32 %v1029_v44, %v1015_v29  ;;  %v1038_v47 = vmul.f32 %v1033_v45, %v1015_v29 }
 0x496   : > { %v1040_v48 = vadd.f32 1e-05, %v1036_v46  ;;  %v1042_v49 = vadd.f32 1e-05, %v1038_v47 }
 0x498   : > { %1503 = vrsqrt.f32 %v1040_v48  ;;  %vm1070_vm4 = vweird.f32 %v1042_v49  ;;  %vm1050_vm5 = vweird.f32 %v1040_v48 }
 0x499   : > { %1505 = vrsqrt.f32 %v1042_v49 }
 0x49b   : > { %v1035_v50 = vpop.xlane.xlu1 %1034  ;;  %v1031_v51 = vpop.xlane.xlu2 %1030 }
 0x49c   : > { %v1039_v52 = vmul.f32 %v1035_v50, %v1015_v29  ;;  %v1037_v53 = vmul.f32 %v1031_v51, %v1015_v29 }
 0x49e   : > { %v1504_v54 = vpop.eup %1503  ;;  %v1043_v55 = vadd.f32 1e-05, %v1039_v52  ;;  %v1041_v56 = vadd.f32 1e-05, %v1037_v53 }
 0x49f   : > { %v1506_v57 = vpop.eup %1505  ;;  %v1045_v58 = vmul.f32 %v1504_v54, %v1040_v48  ;;  %vm1051_vm3 = vweird.f32 %v1504_v54 }
 0x4a0   : > { %v1065_v59 = vmul.f32 %v1506_v57, %v1042_v49  ;;  %1507 = vrsqrt.f32 %v1043_v55  ;;  %vm1071_vm2 = vweird.f32 %v1506_v57  ;;  %vm1052_vm7 = vmor %vm1050_vm5, %vm1051_vm3  ;;  %vm1080_vm10 = vweird.f32 %v1043_v55 }
 0x4a1   : > { %v1046_v60 = vmul.f32 %v1504_v54, %v1045_v58  ;;  %1509 = vrsqrt.f32 %v1041_v56  ;;  %vm1072_vm6 = vmor %vm1070_vm4, %vm1071_vm2  ;;  %vm1060_vm12 = vweird.f32 %v1041_v56 }
 0x4a2   : > { %v1066_v61 = vmul.f32 %v1506_v57, %v1065_v59 }
 0x4a3   : > { %v1047_v62 = vmul.f32 0.5, %v1046_v60 }
 0x4a4   : > { %v1067_v63 = vmul.f32 0.5, %v1066_v61 }
 0x4a5   : > { %v1048_v0 = vsub.f32 1.5, %v1047_v62 }
 0x4a6   : > { %v1508_v1 = vpop.eup %1507  ;;  %v1068_v2 = vsub.f32 1.5, %v1067_v63 }
 0x4a7   : > { %v1510_v5 = vpop.eup %1509  ;;  %v1075_v6 = vmul.f32 %v1508_v1, %v1043_v55  ;;  %v1049_v7 = vmul.f32 %v1504_v54, %v1048_v0  ;;  %vm1081_vm8 = vweird.f32 %v1508_v1 }
 0x4a8   : > { %v1069_v8 = vmul.f32 %v1506_v57, %v1068_v2  ;;  %v1055_v9 = vmul.f32 %v1510_v5, %v1041_v56  ;;  %vm1061_vm9 = vweird.f32 %v1510_v5  ;;  %vm1082_vm11 = vmor %vm1080_vm10, %vm1081_vm8 }
 0x4a9   : > { %v1076_v10 = vmul.f32 %v1508_v1, %v1075_v6  ;;  %v1053_v14 = vsel %vm1052_vm7, %v1504_v54, %v1049_v7  ;;  %vm1062_vm13 = vmor %vm1060_vm12, %vm1061_vm9 }
 0x4aa   : > { %v1056_v11 = vmul.f32 %v1510_v5, %v1055_v9  ;;  %v1073_v12 = vsel %vm1072_vm6, %v1506_v57, %v1069_v8  ;;  %v1084_v20 = vmul.f32 %v1053_v14, %v1774_v3 }
 0x4ab   : > { %v1077_v13 = vmul.f32 0.5, %v1076_v10  ;;  %v1086_v18 = vmul.f32 %v1073_v12, %v1772_v33 }
 0x4ac   : > { %v1057_v15 = vmul.f32 0.5, %v1056_v11  ;;  %v1091_v28 = vmul.f32 %v1499_v17, %v1084_v20 }
 0x4ad   : > { %v1078_v16 = vsub.f32 1.5, %v1077_v13  ;;  %v1093_v25 = vmul.f32 %v1499_v17, %v1086_v18 }
 0x4ae   : > { %v1058_v19 = vsub.f32 1.5, %v1057_v15  ;;  %v1098_v33 = vadd.f32 %v1500_v24, %v1091_v28 }
 0x4af   : > { %v1079_v21 = vmul.f32 %v1508_v1, %v1078_v16  ;;  %v1100_v32 = vadd.f32 %v1500_v24, %v1093_v25 }
 0x4b0   : > { %v1059_v22 = vmul.f32 %v1510_v5, %v1058_v19 }
 0x4b1   : > { %v1083_v23 = vsel %vm1082_vm11, %v1508_v1, %v1079_v21 }
 0x4b2   : > { %v1087_v26 = vmul.f32 %v1083_v23, %v1780_v40  ;;  %v1063_v27 = vsel %vm1062_vm13, %v1510_v5, %v1059_v22 }
 0x4b3   : > { %v1085_v29 = vmul.f32 %v1063_v27, %v1782_v41 }
 0x4b4   : > { %v1094_v30 = vmul.f32 %v1499_v17, %v1087_v26 }
 0x4b5   : > { %v1092_v31 = vmul.f32 %v1499_v17, %v1085_v29 }
 0x4b6   : > { %v1101_v4 = vadd.f32 %v1500_v24, %v1094_v30 }
 0x4b7   : > { %v1099_v3 = vadd.f32 %v1500_v24, %v1092_v31 }
 0x4b8   : > { %v1432_v34 = vpack.c.bf16 %v1101_v4, %v1100_v32 }
 0x4b9   : > { %v1427_v35 = vpack.c.bf16 %v1099_v3, %v1098_v33 }
 0x4ba   : > { %1434 = vst [vmem:[%s1686_s22 + $0x8] sm:$0xff] %v1432_v34  }
 0x4bb   : > { %1428 = vst [vmem:[%s1686_s22] sm:$0xff] %v1427_v35  }
 0x4bc PF: > { %s1842_s26 = sld [smem:[#allocation5_spill]] }
 0x4bd   : > { %s1843_s17 = sld [smem:[#allocation3_spill]] }
 0x4be   : > { %s1844_s18 = sld [smem:[#allocation4_spill]] }
 0x4bf   : > { %s1845_s19 = sld [smem:[#allocation6_spill]] }
 0x4c0   : > { %s1846_s20 = sld [smem:[#allocation7_spill]] }
 0x4c2   : > { %s21_s21 = sadd.s32 1, %s1842_s26  }
 0x4c3   : > { %p18_p9 = scmp.ge.s32.totalorder %s21_s21, 10  }
 0x4c5   :  { %20 = sbr.rel (!%p18_p9) target bundleno = 4 (0x4), region = 123 }

// kernel: vietocr_forward.11
= control target key start
LH: loop header
LB: loop body
LE: loop exit
PB: predicated region body
PF: predicated region fallthrough
CT: control target
= control target key end

     0   :  { %s1263_s24 = smov 0   ;;  %s1265_s25 = smov 0   ;;  %s1478_s0 = inlined_call_operand.vmem [shape: bf16[64,128], index: 0, kind: input, shape index: {}]   ;;  %s1479_s1 = inlined_call_operand.vmem [shape: bf16[128,256], index: 1, kind: input, shape index: {}]   ;;  %s1480_s2 = inlined_call_operand.vmem [shape: f32[1,256], index: 2, kind: input, shape index: {}]   ;;  %s1481_s3 = inlined_call_operand.vmem [shape: bf16[256,128], index: 3, kind: input, shape index: {}]   ;;  %s1482_s4 = inlined_call_operand.vmem [shape: f32[1,128], index: 4, kind: input, shape index: {}]   ;;  %s1483_s5 = inlined_call_operand.vmem [shape: f32[1,128], index: 5, kind: input, shape index: {}]   ;;  %s1484_s6 = inlined_call_operand.vmem [shape: f32[1,128], index: 6, kind: input, shape index: {}]   ;;  %s1485_s7 = inlined_call_operand.vmem [shape: bf16[64,128], index: 7, kind: output, shape index: {}]  }
   0x1   :  { %s1267_s26 = smov 0  }
   0x2 LB: > { %s29_s27 = sadd.s32 1, %s1216_s25  ;;  %p963_p0 = scmp.ge.s32.totalorder %s1220_s26, 1  ;;  %s1220_s26 = sphi %s1267_s26, %s17_s26   ;;  %s1216_s25 = sphi %s1265_s25, %s1487_s25   ;;  %s1212_s24 = sphi %s1263_s24, %s1486_s24  }
   0x3   : > { %p31_p1 = scmp.ge.s32.totalorder %s29_s27, 2  ;;  %p282_p2 = scmp.lt.s32.totalorder %s1220_s26, 3 }
   0x5   : > { %s1489_s27 = smov (%p31_p1, %s29_s27), 0  ;;  %p283_p3 = pnand %p963_p0, %p282_p2 }
   0x6   : > { %s964_s30 = sshll.u32 (!%p283_p3), %s1212_s24, 2 }
   0x7   : > { %286 = sbr.rel (%p283_p3) target bundleno = 618 (0x26a), region = 48  ;;  %p329_p4 = scmp.lt.s32.totalorder (!%p283_p3), %s964_s30, 7 }
   0xc   : > { %v1034_v0 = vld [vmem:[%s1479_s1 + $0x70] sm:$0xf]  ;;  %v1123_v1 = vld [vmem:[%s1479_s1 + $0x74] sm:$0xf0]  ;;  %v1122_v2 = vld [vmem:[%s1479_s1 + $0x74] sm:$0xf] }
   0xd   : > { %v1035_v3 = vor.u32 %v1123_v1, %v1034_v0  ;;  %v1036_v4 = vld [vmem:[%s1479_s1 + $0x78] sm:$0xf0]  ;;  %v1026_v5 = vld [vmem:[%s1479_s1 + $0x60] sm:$0xf]  ;;  %v1121_v6 = vld [vmem:[%s1479_s1 + $0x64] sm:$0xf0] }
   0xe   : > { %v1039_v7 = vor.u32 %v1122_v2, %v1036_v4  ;;  %v1120_v8 = vld [vmem:[%s1479_s1 + $0x64] sm:$0xf]  ;;  %v1028_v9 = vld [vmem:[%s1479_s1 + $0x68] sm:$0xf0]  ;;  %v1027_v10 = vor.u32 %v1121_v6, %v1026_v5  ;;  %v1018_v12 = vld [vmem:[%s1479_s1 + $0x50] sm:$0xf] }
   0xf   : > { %483 = vmatpush.bf16.msra.mxu0 %v1035_v3  ;;  %v1031_v11 = vor.u32 %v1120_v8, %v1028_v9  ;;  %v1119_v13 = vld [vmem:[%s1479_s1 + $0x54] sm:$0xf0]  ;;  %v1118_v14 = vld [vmem:[%s1479_s1 + $0x54] sm:$0xf]  ;;  %v1020_v15 = vld [vmem:[%s1479_s1 + $0x58] sm:$0xf0] }
  0x10   : > { %502 = vmatpush.bf16.msra.mxu1 %v1039_v7  ;;  %v1019_v16 = vor.u32 %v1119_v13, %v1018_v12  ;;  %v1023_v17 = vor.u32 %v1118_v14, %v1020_v15  ;;  %v1010_v18 = vld [vmem:[%s1479_s1 + $0x40] sm:$0xf]  ;;  %v1117_v19 = vld [vmem:[%s1479_s1 + $0x44] sm:$0xf0]  ;;  %v1116_v20 = vld [vmem:[%s1479_s1 + $0x44] sm:$0xf] }
  0x11   : > { %v1012_v21 = vld [vmem:[%s1479_s1 + $0x48] sm:$0xf0]  ;;  %v1011_v22 = vor.u32 %v1117_v19, %v1010_v18  ;;  %v1002_v24 = vld [vmem:[%s1479_s1 + $0x30] sm:$0xf]  ;;  %v1115_v25 = vld [vmem:[%s1479_s1 + $0x34] sm:$0xf0] }
  0x12   : > { %v1015_v23 = vor.u32 %v1116_v20, %v1012_v21  ;;  %v1114_v26 = vld [vmem:[%s1479_s1 + $0x34] sm:$0xf]  ;;  %v1004_v27 = vld [vmem:[%s1479_s1 + $0x38] sm:$0xf0]  ;;  %v1003_v28 = vor.u32 %v1115_v25, %v1002_v24  ;;  %v994_v30 = vld [vmem:[%s1479_s1 + $0x20] sm:$0xf] }
  0x13   : > { %484 = vmatpush.bf16.msra.mxu0 %v1027_v10  ;;  %v1007_v29 = vor.u32 %v1114_v26, %v1004_v27  ;;  %v1113_v31 = vld [vmem:[%s1479_s1 + $0x24] sm:$0xf0]  ;;  %v1112_v32 = vld [vmem:[%s1479_s1 + $0x24] sm:$0xf]  ;;  %v996_v33 = vld [vmem:[%s1479_s1 + $0x28] sm:$0xf0] }
  0x14   : > { %503 = vmatpush.bf16.msra.mxu1 %v1031_v11  ;;  %v995_v34 = vor.u32 %v1113_v31, %v994_v30  ;;  %v986_v35 = vld [vmem:[%s1479_s1 + $0x10] sm:$0xf]  ;;  %v1131_v36 = vld [vmem:[%s1481_s3 + $0x38] sm:$0xff]  ;;  %v999_v38 = vor.u32 %v1112_v32, %v996_v33  ;;  %v1110_v40 = vld [vmem:[%s1479_s1 + $0x14] sm:$0xf]  ;;  %s1491_s30 = smov (!%p329_p4, %s964_s30), 7 }
  0x15   : > { %v1139_v37 = vld [vmem:[%s1481_s3 + $0x78] sm:$0xff]  ;;  %665 = vmatpush.bf16.msra.mxu2 %v1131_v36  ;;  %v1130_v42 = vld [vmem:[%s1481_s3 + $0x30] sm:$0xff]  ;;  %v978_v45 = vld [vmem:[%s1479_s1] sm:$0xf]  ;;  %s965_s18 = sshll.u32 %s1491_s30, 2 }
  0x16   : > { %v1111_v39 = vld [vmem:[%s1479_s1 + $0x14] sm:$0xf0]  ;;  %v988_v41 = vld [vmem:[%s1479_s1 + $0x18] sm:$0xf0]  ;;  %684 = vmatpush.bf16.msra.mxu3 %v1139_v37  ;;  %v1138_v43 = vld [vmem:[%s1481_s3 + $0x70] sm:$0xff]  ;;  %s1406_s9 = scalar_lea.vmem %s1478_s0, %s965_s18  ;;  %s355_s22 = scalar_lea.vmem %s1485_s7, %s965_s18 }
  0x17   : > { %485 = vmatpush.bf16.msra.mxu0 %v1019_v16  ;;  %v987_v44 = vor.u32 %v1111_v39, %v986_v35  ;;  %v991_v46 = vor.u32 %v1110_v40, %v988_v41  ;;  %v1109_v47 = vld [vmem:[%s1479_s1 + $0x4] sm:$0xf0]  ;;  %v1108_v48 = vld [vmem:[%s1479_s1 + $0x4] sm:$0xf]  ;;  %v980_v49 = vld [vmem:[%s1479_s1 + $0x8] sm:$0xf0] }
  0x18   : > { %504 = vmatpush.bf16.msra.mxu1 %v1023_v17  ;;  %v1129_v50 = vld [vmem:[%s1481_s3 + $0x28] sm:$0xff]  ;;  %v979_v52 = vor.u32 %v1109_v47, %v978_v45  ;;  %v983_v53 = vor.u32 %v1108_v48, %v980_v49  ;;  %v1128_v54 = vld [vmem:[%s1481_s3 + $0x20] sm:$0xff]  ;;  %v1127_v58 = vld [vmem:[%s1481_s3 + $0x18] sm:$0xff] }
  0x19   : > { %666 = vmatpush.bf16.msra.mxu2 %v1130_v42  ;;  %v1137_v51 = vld [vmem:[%s1481_s3 + $0x68] sm:$0xff]  ;;  %v1136_v55 = vld [vmem:[%s1481_s3 + $0x60] sm:$0xff]  ;;  %v1135_v59 = vld [vmem:[%s1481_s3 + $0x58] sm:$0xff] }
  0x1a   : > { %685 = vmatpush.bf16.msra.mxu3 %v1138_v43  ;;  %v1106_v56 = vld [vmem:[%s1406_s9] sm:$0xff]  ;;  %v1107_v57 = vld [vmem:[%s1406_s9 + $0x8] sm:$0xff]  ;;  %v1126_v60 = vld [vmem:[%s1481_s3 + $0x10] sm:$0xff] }
  0x1b   : > { %486 = vmatpush.bf16.msra.mxu0 %v1011_v22  ;;  %v1134_v61 = vld [vmem:[%s1481_s3 + $0x50] sm:$0xff]  ;;  %v1125_v62 = vld [vmem:[%s1481_s3 + $0x8] sm:$0xff]  ;;  %v1124_v0 = vld [vmem:[%s1481_s3] sm:$0xff] }
  0x1c   : > { %505 = vmatpush.bf16.msra.mxu1 %v1015_v23  ;;  %v1133_v63 = vld [vmem:[%s1481_s3 + $0x48] sm:$0xff]  ;;  %v1132_v1 = vld [vmem:[%s1481_s3 + $0x40] sm:$0xff] }
  0x1d   : > { %667 = vmatpush.bf16.msra.mxu2 %v1129_v50  ;;  %v385_v2 = vld [vmem:[%s1480_s2] sm:$0x3]  ;;  %v1158_v47 = vld [vmem:[%s1406_s9 + $0x8] sm:$0xff]  }
  0x1e   : > { %686 = vmatpush.bf16.msra.mxu3 %v1137_v51  ;;  %v387_v5 = vperm.slane %v385_v2, 0  ;;  %v388_v6 = vperm.slane %v385_v2, 1  ;;  %v1141_v33 = vld [vmem:[%s1406_s9] sm:$0xff]   ;;  %v1146_v51 = vunpack.c.l.bf16 %v1158_v47 }
  0x1f   : > { %487 = vmatpush.bf16.msra.mxu0 %v1003_v28  ;;  %v1185_v35 = vld [vmem:[%s1482_s4] ss:$0 sm:$0xff] }
  0x20   : > { %506 = vmatpush.bf16.msra.mxu1 %v1007_v29 }
  0x21   : > { %668 = vmatpush.bf16.msra.mxu2 %v1128_v54 }
  0x22   : > { %687 = vmatpush.bf16.msra.mxu3 %v1136_v55 }
  0x23   : > { %488 = vmatpush.bf16.msra.mxu0 %v995_v34 }
  0x24   : > { %507 = vmatpush.bf16.msra.mxu1 %v999_v38  ;;  %v1142_v38 = vunpack.c.l.bf16 %v1141_v33 }
  0x25   : > { %669 = vmatpush.bf16.msra.mxu2 %v1127_v58 }
  0x26   : > { %688 = vmatpush.bf16.msra.mxu3 %v1135_v59 }
  0x27   : > { %489 = vmatpush.bf16.msra.mxu0 %v987_v44  ;;  %v1143_v44 = vunpack.c.h.bf16 %v1141_v33 }
  0x28   : > { %508 = vmatpush.bf16.msra.mxu1 %v991_v46 }
  0x29   : > { %670 = vmatpush.bf16.msra.mxu2 %v1126_v60  ;;  %v1222_v60 = vmov 128.0  }
  0x2a   : > { %689 = vmatpush.bf16.msra.mxu3 %v1134_v61  ;;  %1188 = vrcp.f32 %v1222_v60 }
  0x2b   : > { %490 = vmatpush.bf16.msra.mxu0 %v979_v52 }
  0x2c   : > { %509 = vmatpush.bf16.msra.mxu1 %v983_v53 }
  0x2d   : > { %671 = vmatpush.bf16.msra.mxu2 %v1125_v62 }
  0x2e   : > { %491 = vmatmul.bf16.vlgmr.msra.gmra.mxu0 %v1106_v56  ;;  %690 = vmatpush.bf16.msra.mxu3 %v1133_v63 }
  0x2f   : > { %510 = vmatmul.bf16.vlgmr.msra.gmra.mxu1 %v1106_v56 }
  0x30   : > { %v1189_v61 = vpop.eup %1188 }
  0x31   : > { %672 = vmatpush.bf16.msra.mxu2 %v1124_v0  ;;  %v749_v62 = vmul.f32 128.0, %v1189_v61  ;;  %vm753_vm0 = vweird.f32 %v1189_v61 }
  0x32   : > { %691 = vmatpush.bf16.msra.mxu3 %v1132_v1 }
  0x33   : > { %v750_v63 = vsub.f32 1.0, %v749_v62 }
  0x35   : > { %v751_v0 = vmul.f32 %v1189_v61, %v750_v63 }
  0x37   : > { %v752_v1 = vadd.f32 %v1189_v61, %v751_v0 }
  0x39   : > { %v754_v2 = vsel %vm753_vm0, %v1189_v61, %v752_v1 }
  0x3e   : > { %496 = vmatmul.bf16.gmra.mxu0 %v1107_v57 }
  0x3f   : > { %515 = vmatmul.bf16.gmra.mxu1 %v1107_v57  ;;  %v1147_v57 = vunpack.c.h.bf16 %v1158_v47 }
  0xab   : > { %v492_v3 = vpop.f32.mrf.mxu0 }
  0xac   : > { %v511_v4 = vpop.f32.mrf.mxu1  ;;  %v493_v7 = vadd.f32 %v492_v3, %v387_v5 }
  0xad   : > { %v512_v8 = vadd.f32 %v511_v4, %v388_v6 }
  0xae   : > { %v521_v13 = vmax.f32 %v493_v7, 0.0 }
  0xaf   : > { %v522_v15 = vmax.f32 %v512_v8, 0.0 }
  0xb3   : > { %v494_v9 = vpop.f32.mrf.mxu0 }
  0xb4   : > { %v495_v10 = vadd.f32 %v494_v9, %v387_v5  ;;  %v513_v11 = vpop.f32.mrf.mxu1 }
  0xb5   : > { %v514_v12 = vadd.f32 %v513_v11, %v388_v6 }
  0xb6   : > { %v523_v14 = vmax.f32 %v495_v10, 0.0 }
  0xb7   : > { %v524_v16 = vmax.f32 %v514_v12, 0.0 }
  0xb8   : > { %v533_v17 = vpack.c.bf16 %v523_v14, %v521_v13 }
  0xb9   : > { %v534_v18 = vpack.c.bf16 %v524_v16, %v522_v15 }
  0xba   : > { %673 = vmatmul.bf16.vlgmr.msra.gmra.mxu2 %v533_v17 }
  0xbb   : > { %692 = vmatmul.bf16.vlgmr.msra.gmra.mxu3 %v534_v18  ;;  %v497_v19 = vpop.f32.mrf.mxu0 }
  0xbc   : > { %v516_v20 = vpop.f32.mrf.mxu1  ;;  %v498_v21 = vadd.f32 %v497_v19, %v387_v5 }
  0xbd   : > { %v517_v22 = vadd.f32 %v516_v20, %v388_v6 }
  0xbe   : > { %v525_v27 = vmax.f32 %v498_v21, 0.0 }
  0xbf   : > { %v526_v29 = vmax.f32 %v517_v22, 0.0 }
  0xc3   : > { %v499_v23 = vpop.f32.mrf.mxu0 }
  0xc4   : > { %v500_v24 = vadd.f32 %v499_v23, %v387_v5  ;;  %v518_v25 = vpop.f32.mrf.mxu1 }
  0xc5   : > { %v519_v26 = vadd.f32 %v518_v25, %v388_v6 }
  0xc6   : > { %v527_v28 = vmax.f32 %v500_v24, 0.0 }
  0xc7   : > { %v528_v30 = vmax.f32 %v519_v26, 0.0 }
  0xc8   : > { %v535_v31 = vpack.c.bf16 %v527_v28, %v525_v27 }
  0xc9   : > { %v536_v32 = vpack.c.bf16 %v528_v30, %v526_v29 }
  0xca   : > { %678 = vmatmul.bf16.gmra.mxu2 %v535_v31 }
  0xcb   : > { %697 = vmatmul.bf16.gmra.mxu3 %v536_v32 }
 0x13d   : > { %v674_v34 = vpop.f32.mrf.mxu2 }
 0x13e   : > { %v693_v36 = vpop.f32.mrf.mxu3 }
 0x13f   : > { %v694_v37 = vadd.f32 %v693_v36, %v674_v34 }
 0x141   : > { %v722_v39 = vadd.f32 %v1185_v35, %v694_v37 }
 0x143   : > { %v734_v40 = vadd.f32 %v1142_v38, %v722_v39 }
 0x145   : > { %740 = vadd.xlane.f32.xlu0 %v734_v40  ;;  %v676_v41 = vpop.f32.mrf.mxu2 }
 0x146   : > { %v695_v42 = vpop.f32.mrf.mxu3 }
 0x147   : > { %v696_v43 = vadd.f32 %v695_v42, %v676_v41 }
 0x149   : > { %v723_v45 = vadd.f32 %v1185_v35, %v696_v43  ;;  %v1186_v43 = vld [vmem:[%s1483_s5] ss:$0 sm:$0xff] }
 0x14b   : > { %v735_v46 = vadd.f32 %v1143_v44, %v723_v45 }
 0x14d   : > { %742 = vadd.xlane.f32.xlu0 %v735_v46  ;;  %v679_v48 = vpop.f32.mrf.mxu2 }
 0x14e   : > { %v698_v49 = vpop.f32.mrf.mxu3 }
 0x14f   : > { %v699_v50 = vadd.f32 %v698_v49, %v679_v48 }
 0x151   : > { %v724_v52 = vadd.f32 %v1185_v35, %v699_v50  ;;  %v1187_v50 = vld [vmem:[%s1484_s6] ss:$0 sm:$0xff] }
 0x153   : > { %v736_v53 = vadd.f32 %v1146_v51, %v724_v52 }
 0x155   : > { %744 = vadd.xlane.f32.xlu1 %v736_v53  ;;  %v681_v54 = vpop.f32.mrf.mxu2 }
 0x156   : > { %v700_v55 = vpop.f32.mrf.mxu3 }
 0x157   : > { %v701_v56 = vadd.f32 %v700_v55, %v681_v54 }
 0x159   : > { %v725_v58 = vadd.f32 %v1185_v35, %v701_v56 }
 0x15b   : > { %v737_v59 = vadd.f32 %v1147_v57, %v725_v58 }
 0x15d   : > { %746 = vadd.xlane.f32.xlu1 %v737_v59 }
 0x1b8   : > { %v741_v3 = vpop.xlane.xlu0 %740 }
 0x1b9   : > { %v755_v4 = vmul.f32 %v754_v2, %v741_v3 }
 0x1bb   : > { %v759_v5 = vsub.f32 %v734_v40, %v755_v4 }
 0x1bd   : > { %v763_v6 = vmul.f32 %v759_v5, %v759_v5 }
 0x1bf   : > { %767 = vadd.xlane.f32.xlu2 %v763_v6 }
 0x1c0   : > { %v743_v7 = vpop.xlane.xlu0 %742 }
 0x1c1   : > { %v756_v8 = vmul.f32 %v754_v2, %v743_v7 }
 0x1c3   : > { %v760_v9 = vsub.f32 %v735_v46, %v756_v8 }
 0x1c5   : > { %v764_v10 = vmul.f32 %v760_v9, %v760_v9 }
 0x1c7   : > { %769 = vadd.xlane.f32.xlu2 %v764_v10 }
 0x1c8   : > { %v745_v11 = vpop.xlane.xlu1 %744 }
 0x1c9   : > { %v757_v12 = vmul.f32 %v754_v2, %v745_v11 }
 0x1cb   : > { %v1448_v13 = vsub.f32 %v736_v53, %v757_v12 }
 0x1cd   : > { %v765_v14 = vmul.f32 %v1448_v13, %v1448_v13 }
 0x1cf   : > { %771 = vadd.xlane.f32.xlu0 %v765_v14 }
 0x1d0   : > { %v747_v15 = vpop.xlane.xlu1 %746 }
 0x1d1   : > { %v758_v16 = vmul.f32 %v754_v2, %v747_v15 }
 0x1d3   : > { %v1452_v17 = vsub.f32 %v737_v59, %v758_v16 }
 0x1d5   : > { %v766_v18 = vmul.f32 %v1452_v17, %v1452_v17 }
 0x1d7   : > { %773 = vadd.xlane.f32.xlu1 %v766_v18 }
 0x232   : > { %v768_v19 = vpop.xlane.xlu2 %767 }
 0x233   : > { %v775_v20 = vmul.f32 %v768_v19, %v754_v2 }
 0x235   : > { %v779_v21 = vadd.f32 1e-05, %v775_v20 }
 0x237   : > { %1190 = vrsqrt.f32 %v779_v21  ;;  %vm789_vm2 = vweird.f32 %v779_v21 }
 0x23a   : > { %v770_v22 = vpop.xlane.xlu2 %769 }
 0x23b   : > { %v776_v23 = vmul.f32 %v770_v22, %v754_v2 }
 0x23d   : > { %v1191_v24 = vpop.eup %1190  ;;  %v780_v25 = vadd.f32 1e-05, %v776_v23 }
 0x23e   : > { %v784_v26 = vmul.f32 %v1191_v24, %v779_v21  ;;  %vm790_vm1 = vweird.f32 %v1191_v24 }
 0x23f   : > { %1192 = vrsqrt.f32 %v780_v25  ;;  %vm791_vm3 = vmor %vm789_vm2, %vm790_vm1  ;;  %vm799_vm5 = vweird.f32 %v780_v25 }
 0x240   : > { %v785_v27 = vmul.f32 %v1191_v24, %v784_v26 }
 0x242   : > { %v786_v28 = vmul.f32 0.5, %v785_v27  ;;  %v772_v29 = vpop.xlane.xlu0 %771 }
 0x243   : > { %v777_v30 = vmul.f32 %v772_v29, %v754_v2 }
 0x244   : > { %v787_v31 = vsub.f32 1.5, %v786_v28 }
 0x245   : > { %v1193_v32 = vpop.eup %1192  ;;  %v781_v33 = vadd.f32 1e-05, %v777_v30 }
 0x246   : > { %v788_v34 = vmul.f32 %v1191_v24, %v787_v31  ;;  %v794_v35 = vmul.f32 %v1193_v32, %v780_v25  ;;  %vm800_vm4 = vweird.f32 %v1193_v32 }
 0x247   : > { %1194 = vrsqrt.f32 %v781_v33  ;;  %vm801_vm6 = vmor %vm799_vm5, %vm800_vm4  ;;  %vm809_vm8 = vweird.f32 %v781_v33 }
 0x248   : > { %v795_v36 = vmul.f32 %v1193_v32, %v794_v35  ;;  %v792_v37 = vsel %vm791_vm3, %v1191_v24, %v788_v34 }
 0x249   : > { %v823_v44 = vmul.f32 %v792_v37, %v759_v5 }
 0x24a   : > { %v796_v38 = vmul.f32 0.5, %v795_v36  ;;  %v774_v39 = vpop.xlane.xlu1 %773 }
 0x24b   : > { %v778_v40 = vmul.f32 %v774_v39, %v754_v2  ;;  %v830_v51 = vmul.f32 %v1186_v43, %v823_v44 }
 0x24c   : > { %v797_v41 = vsub.f32 1.5, %v796_v38 }
 0x24d   : > { %v1195_v42 = vpop.eup %1194  ;;  %v782_v45 = vadd.f32 1e-05, %v778_v40  ;;  %v837_v57 = vadd.f32 %v1187_v50, %v830_v51 }
 0x24e   : > { %v798_v46 = vmul.f32 %v1193_v32, %v797_v41  ;;  %v804_v47 = vmul.f32 %v1195_v42, %v781_v33  ;;  %vm810_vm7 = vweird.f32 %v1195_v42 }
 0x24f   : > { %1196 = vrsqrt.f32 %v782_v45  ;;  %vm811_vm9 = vmor %vm809_vm8, %vm810_vm7  ;;  %vm819_vm11 = vweird.f32 %v782_v45 }
 0x250   : > { %v802_v48 = vsel %vm801_vm6, %v1193_v32, %v798_v46  ;;  %v805_v49 = vmul.f32 %v1195_v42, %v804_v47 }
 0x251   : > { %v824_v52 = vmul.f32 %v802_v48, %v760_v9 }
 0x252   : > { %v806_v53 = vmul.f32 0.5, %v805_v49 }
 0x253   : > { %v831_v54 = vmul.f32 %v1186_v43, %v824_v52 }
 0x254   : > { %v807_v55 = vsub.f32 1.5, %v806_v53 }
 0x255   : > { %v1197_v56 = vpop.eup %1196  ;;  %v838_v58 = vadd.f32 %v1187_v50, %v831_v54 }
 0x256   : > { %v808_v59 = vmul.f32 %v1195_v42, %v807_v55  ;;  %v814_v60 = vmul.f32 %v1197_v56, %v782_v45  ;;  %vm820_vm10 = vweird.f32 %v1197_v56 }
 0x257   : > { %v1151_v61 = vpack.c.bf16 %v838_v58, %v837_v57  ;;  %vm821_vm12 = vmor %vm819_vm11, %vm820_vm10 }
 0x258   : > { %v815_v62 = vmul.f32 %v1197_v56, %v814_v60  ;;  %v812_v63 = vsel %vm811_vm9, %v1195_v42, %v808_v59 }
 0x259   : > { %1152 = vst [vmem:[%s355_s22] sm:$0xff] %v1151_v61   ;;  %v825_v2 = vmul.f32 %v812_v63, %v1448_v13 }
 0x25a   : > { %v816_v0 = vmul.f32 0.5, %v815_v62 }
 0x25b   : > { %v832_v5 = vmul.f32 %v1186_v43, %v825_v2 }
 0x25c   : > { %v817_v1 = vsub.f32 1.5, %v816_v0 }
 0x25d   : > { %v839_v8 = vadd.f32 %v1187_v50, %v832_v5 }
 0x25e   : > { %v818_v3 = vmul.f32 %v1197_v56, %v817_v1 }
 0x260   : > { %v822_v4 = vsel %vm821_vm12, %v1197_v56, %v818_v3 }
 0x261   : > { %v826_v6 = vmul.f32 %v822_v4, %v1452_v17 }
 0x263   : > { %v833_v7 = vmul.f32 %v1186_v43, %v826_v6 }
 0x265   : > { %v840_v9 = vadd.f32 %v1187_v50, %v833_v7 }
 0x267   : > { %v1156_v10 = vpack.c.bf16 %v840_v9, %v839_v8 }
 0x269   : > { %1159 = vst [vmem:[%s355_s22 + $0x8] sm:$0xff] %v1156_v10  }
 0x26a PF: > { %s17_s26 = sadd.s32 1, %s1220_s26   ;;  %s1486_s24 = smov %s1216_s25 }
 0x26b   : > { %p14_p5 = scmp.ge.s32.totalorder %s17_s26, 4   ;;  %s1487_s25 = smov %s1489_s27 }
 0x26d   :  { %16 = sbr.rel (!%p14_p5) target bundleno = 2 (0x2), region = 95 }

// kernel: vietocr_forward.12
= control target key start
LH: loop header
LB: loop body
LE: loop exit
PB: predicated region body
PF: predicated region fallthrough
CT: control target
= control target key end

     0   :  { %s430_s12 = smov 0   ;;  %s480_s0 = inlined_call_operand.vmem [shape: bf16[64,128], index: 0, kind: input, shape index: {}]   ;;  %s481_s1 = inlined_call_operand.vmem [shape: f32[1,128], index: 1, kind: input, shape index: {}]   ;;  %s482_s2 = inlined_call_operand.vmem [shape: f32[1,128], index: 2, kind: input, shape index: {}]   ;;  %s483_s3 = inlined_call_operand.vmem [shape: bf16[64,128], index: 3, kind: output, shape index: {}]  }
   0x1 LB: > { %s349_s13 = sadd.s32 4294967295, %s407_s12   ;;  %p353_p0 = scmp.ge.s32.totalorder %s407_s12, 1  ;;  %s407_s12 = sphi %s430_s12, %s13_s12  }
   0x2   : > { %p138_p1 = scmp.lt.s32.totalorder %s407_s12, 3 }
   0x4   : > { %p139_p2 = pnand %p353_p0, %p138_p1 }
   0x5   : > { %s354_s14 = sshll.u32 (!%p139_p2), %s349_s13, 2 }
   0x6   : > { %142 = sbr.rel (%p139_p2) target bundleno = 295 (0x127), region = 32  ;;  %p163_p3 = scmp.lt.s32.totalorder (!%p139_p2), %s354_s14, 7 }
   0xb   : > { %s485_s14 = smov (!%p163_p3, %s354_s14), 7  ;;  %v409_v6 = vmov 128.0  }
   0xc   : > { %s355_s15 = sshll.u32 %s485_s14, 2  ;;  %391 = vrcp.f32 %v409_v6 }
   0xd   : > { %s166_s18 = scalar_lea.vmem %s480_s0, %s355_s15  ;;  %s172_s25 = scalar_lea.vmem %s483_s3, %s355_s15 }
   0xe   : > { %v378_v0 = vld [vmem:[%s166_s18 + $0x8] sm:$0xff]   ;;  %v361_v1 = vld [vmem:[%s166_s18] sm:$0xff]  }
   0xf   : > { %v366_v2 = vunpack.c.l.bf16 %v378_v0  ;;  %v362_v3 = vunpack.c.l.bf16 %v361_v1  ;;  %v367_v4 = vunpack.c.h.bf16 %v378_v0  ;;  %v363_v5 = vunpack.c.h.bf16 %v361_v1  ;;  %v389_v0 = vld [vmem:[%s481_s1] ss:$0 sm:$0xff] }
  0x11   : > { %188 = vadd.xlane.f32.xlu1 %v366_v2  ;;  %184 = vadd.xlane.f32.xlu0 %v362_v3 }
  0x12   : > { %v392_v7 = vpop.eup %391 }
  0x13   : > { %v193_v8 = vmul.f32 128.0, %v392_v7  ;;  %vm197_vm0 = vweird.f32 %v392_v7 }
  0x15   : > { %v194_v9 = vsub.f32 1.0, %v193_v8 }
  0x17   : > { %v195_v10 = vmul.f32 %v392_v7, %v194_v9 }
  0x19   : > { %190 = vadd.xlane.f32.xlu1 %v367_v4  ;;  %186 = vadd.xlane.f32.xlu0 %v363_v5  ;;  %v196_v11 = vadd.f32 %v392_v7, %v195_v10 }
  0x1b   : > { %v198_v12 = vsel %vm197_vm0, %v392_v7, %v196_v11  ;;  %v390_v7 = vld [vmem:[%s482_s2] ss:$0 sm:$0xff] }
  0x84   : > { %v189_v13 = vpop.xlane.xlu1 %188  ;;  %v185_v14 = vpop.xlane.xlu0 %184 }
  0x85   : > { %v201_v15 = vmul.f32 %v198_v12, %v189_v13  ;;  %v199_v16 = vmul.f32 %v198_v12, %v185_v14 }
  0x87   : > { %v446_v17 = vsub.f32 %v366_v2, %v201_v15  ;;  %v448_v18 = vsub.f32 %v362_v3, %v199_v16 }
  0x89   : > { %v209_v19 = vmul.f32 %v446_v17, %v446_v17  ;;  %v207_v20 = vmul.f32 %v448_v18, %v448_v18 }
  0x8b   : > { %215 = vadd.xlane.f32.xlu0 %v209_v19  ;;  %211 = vadd.xlane.f32.xlu2 %v207_v20 }
  0x8c   : > { %v191_v21 = vpop.xlane.xlu1 %190  ;;  %v187_v22 = vpop.xlane.xlu0 %186 }
  0x8d   : > { %v202_v23 = vmul.f32 %v198_v12, %v191_v21  ;;  %v200_v24 = vmul.f32 %v198_v12, %v187_v22 }
  0x8f   : > { %v454_v25 = vsub.f32 %v367_v4, %v202_v23  ;;  %v456_v26 = vsub.f32 %v363_v5, %v200_v24 }
  0x91   : > { %v210_v27 = vmul.f32 %v454_v25, %v454_v25  ;;  %v208_v28 = vmul.f32 %v456_v26, %v456_v26 }
  0x93   : > { %217 = vadd.xlane.f32.xlu1 %v210_v27  ;;  %213 = vadd.xlane.f32.xlu2 %v208_v28 }
  0xfe   : > { %v212_v29 = vpop.xlane.xlu2 %211  ;;  %v216_v30 = vpop.xlane.xlu0 %215 }
  0xff   : > { %v219_v31 = vmul.f32 %v212_v29, %v198_v12  ;;  %v221_v32 = vmul.f32 %v216_v30, %v198_v12 }
 0x101   : > { %v223_v33 = vadd.f32 1e-05, %v219_v31  ;;  %v225_v34 = vadd.f32 1e-05, %v221_v32 }
 0x103   : > { %393 = vrsqrt.f32 %v223_v33  ;;  %vm253_vm3 = vweird.f32 %v225_v34  ;;  %vm233_vm4 = vweird.f32 %v223_v33 }
 0x104   : > { %395 = vrsqrt.f32 %v225_v34 }
 0x106   : > { %v218_v35 = vpop.xlane.xlu1 %217  ;;  %v214_v36 = vpop.xlane.xlu2 %213 }
 0x107   : > { %v222_v37 = vmul.f32 %v218_v35, %v198_v12  ;;  %v220_v38 = vmul.f32 %v214_v36, %v198_v12 }
 0x109   : > { %v394_v39 = vpop.eup %393  ;;  %v226_v40 = vadd.f32 1e-05, %v222_v37  ;;  %v224_v41 = vadd.f32 1e-05, %v220_v38 }
 0x10a   : > { %v396_v42 = vpop.eup %395  ;;  %v228_v43 = vmul.f32 %v394_v39, %v223_v33  ;;  %vm234_vm2 = vweird.f32 %v394_v39 }
 0x10b   : > { %v248_v44 = vmul.f32 %v396_v42, %v225_v34  ;;  %397 = vrsqrt.f32 %v226_v40  ;;  %vm254_vm1 = vweird.f32 %v396_v42  ;;  %vm235_vm6 = vmor %vm233_vm4, %vm234_vm2  ;;  %vm263_vm9 = vweird.f32 %v226_v40 }
 0x10c   : > { %v229_v45 = vmul.f32 %v394_v39, %v228_v43  ;;  %399 = vrsqrt.f32 %v224_v41  ;;  %vm255_vm5 = vmor %vm253_vm3, %vm254_vm1  ;;  %vm243_vm11 = vweird.f32 %v224_v41 }
 0x10d   : > { %v249_v46 = vmul.f32 %v396_v42, %v248_v44 }
 0x10e   : > { %v230_v47 = vmul.f32 0.5, %v229_v45 }
 0x10f   : > { %v250_v48 = vmul.f32 0.5, %v249_v46 }
 0x110   : > { %v231_v49 = vsub.f32 1.5, %v230_v47 }
 0x111   : > { %v398_v50 = vpop.eup %397  ;;  %v251_v51 = vsub.f32 1.5, %v250_v48 }
 0x112   : > { %v400_v52 = vpop.eup %399  ;;  %v258_v53 = vmul.f32 %v398_v50, %v226_v40  ;;  %v232_v54 = vmul.f32 %v394_v39, %v231_v49  ;;  %vm264_vm7 = vweird.f32 %v398_v50 }
 0x113   : > { %v252_v55 = vmul.f32 %v396_v42, %v251_v51  ;;  %v238_v56 = vmul.f32 %v400_v52, %v224_v41  ;;  %vm244_vm8 = vweird.f32 %v400_v52  ;;  %vm265_vm10 = vmor %vm263_vm9, %vm264_vm7 }
 0x114   : > { %v259_v57 = vmul.f32 %v398_v50, %v258_v53  ;;  %v236_v61 = vsel %vm235_vm6, %v394_v39, %v232_v54  ;;  %vm245_vm12 = vmor %vm243_vm11, %vm244_vm8 }
 0x115   : > { %v239_v58 = vmul.f32 %v400_v52, %v238_v56  ;;  %v256_v59 = vsel %vm255_vm5, %v396_v42, %v252_v55  ;;  %v267_v3 = vmul.f32 %v236_v61, %v448_v18 }
 0x116   : > { %v260_v60 = vmul.f32 0.5, %v259_v57  ;;  %v269_v1 = vmul.f32 %v256_v59, %v446_v17 }
 0x117   : > { %v240_v62 = vmul.f32 0.5, %v239_v58  ;;  %v274_v11 = vmul.f32 %v389_v0, %v267_v3 }
 0x118   : > { %v261_v63 = vsub.f32 1.5, %v260_v60  ;;  %v276_v8 = vmul.f32 %v389_v0, %v269_v1 }
 0x119   : > { %v241_v2 = vsub.f32 1.5, %v240_v62  ;;  %v281_v17 = vadd.f32 %v390_v7, %v274_v11 }
 0x11a   : > { %v262_v4 = vmul.f32 %v398_v50, %v261_v63  ;;  %v283_v15 = vadd.f32 %v390_v7, %v276_v8 }
 0x11b   : > { %v242_v5 = vmul.f32 %v400_v52, %v241_v2 }
 0x11c   : > { %v266_v6 = vsel %vm265_vm10, %v398_v50, %v262_v4 }
 0x11d   : > { %v270_v9 = vmul.f32 %v266_v6, %v454_v25  ;;  %v246_v10 = vsel %vm245_vm12, %v400_v52, %v242_v5 }
 0x11e   : > { %v268_v12 = vmul.f32 %v246_v10, %v456_v26 }
 0x11f   : > { %v277_v13 = vmul.f32 %v389_v0, %v270_v9 }
 0x120   : > { %v275_v14 = vmul.f32 %v389_v0, %v268_v12 }
 0x121   : > { %v284_v16 = vadd.f32 %v390_v7, %v277_v13 }
 0x122   : > { %v282_v18 = vadd.f32 %v390_v7, %v275_v14 }
 0x123   : > { %v376_v19 = vpack.c.bf16 %v284_v16, %v283_v15 }
 0x124   : > { %v371_v20 = vpack.c.bf16 %v282_v18, %v281_v17 }
 0x125   : > { %379 = vst [vmem:[%s172_s25 + $0x8] sm:$0xff] %v376_v19  }
 0x126   : > { %372 = vst [vmem:[%s172_s25] sm:$0xff] %v371_v20  }
 0x127 PF: > { %s13_s12 = sadd.s32 1, %s407_s12  }
 0x128   : > { %p10_p4 = scmp.ge.s32.totalorder %s13_s12, 4  }
 0x12a   :  { %12 = sbr.rel (!%p10_p4) target bundleno = 1 (0x1), region = 62 }

// kernel: vietocr_forward.13
= control target key start
LH: loop header
LB: loop body
LE: loop exit
PB: predicated region body
PF: predicated region fallthrough
CT: control target
= control target key end

     0   :  { %s1432_s21 = smov 0   ;;  %s1434_s22 = smov 0   ;;  %s1599_s0 = inlined_call_operand.vmem [shape: bf16[2,8,128], index: 0, kind: input, shape index: {}]   ;;  %s1600_s1 = inlined_call_operand.vmem [shape: bf16[4,128,32], index: 1, kind: input, shape index: {}]   ;;  %s1601_s2 = inlined_call_operand.vmem [shape: f32[4,1,32], index: 2, kind: input, shape index: {}]   ;;  %s1602_s3 = inlined_call_operand.vmem [shape: bf16[4,128,32], index: 3, kind: input, shape index: {}]   ;;  %s1603_s4 = inlined_call_operand.vmem [shape: f32[4,1,32], index: 4, kind: input, shape index: {}]   ;;  %s1604_s5 = inlined_call_operand.vmem [shape: bf16[4,128,32], index: 5, kind: input, shape index: {}]   ;;  %s1605_s6 = inlined_call_operand.vmem [shape: f32[4,1,32], index: 6, kind: input, shape index: {}]   ;;  %s1606_s7 = inlined_call_operand.vmem [shape: bf16[4,32,128], index: 7, kind: input, shape index: {}]   ;;  %s1607_s8 = inlined_call_operand.vmem [shape: f32[1,128], index: 8, kind: input, shape index: {}]   ;;  %s1608_s9 = inlined_call_operand.vmem [shape: f32[1,128], index: 9, kind: input, shape index: {}]   ;;  %s1609_s10 = inlined_call_operand.vmem [shape: f32[1,128], index: 10, kind: input, shape index: {}]   ;;  %s1610_s11 = inlined_call_operand.vmem [shape: f32[2,1,8], index: 11, kind: input, shape index: {}]   ;;  %s1611_s12 = inlined_call_operand.vmem [shape: bf16[2,8,128], index: 12, kind: output, shape index: {}]  }
   0x1   :  { %1615 = sst [smem:[#allocation8_spill]] %s1599_s0  ;;  %s1436_s23 = smov 0  }
   0x2   :  { %1616 = sst [smem:[#allocation9_spill]] %s1600_s1  ;;  %s1438_s24 = smov 0  }
   0x3   :  { %1617 = sst [smem:[#allocation10_spill]] %s1602_s3  ;;  %s1440_s25 = smov 0  }
   0x4   :  { %1618 = sst [smem:[#allocation11_spill]] %s1610_s11 }
   0x5 LB: > { %1619 = sst [smem:[#allocation3_spill]] %s1354_s23  ;;  %s31_s26 = sadd.s32 1, %s1354_s23  ;;  %s1362_s25 = sphi %s1440_s25, %s22_s25   ;;  %s1358_s24 = sphi %s1438_s24, %s1633_s24   ;;  %s1354_s23 = sphi %s1436_s23, %s1632_s23   ;;  %s1350_s22 = sphi %s1434_s22, %s1631_s22   ;;  %s1346_s21 = sphi %s1432_s21, %s1630_s21  }
   0x6   : > { %1620 = sst [smem:[#allocation4_spill]] %s1358_s24  ;;  %s34_s27 = sadd.s32 1, %s1358_s24 }
   0x7   : > { %1621 = sst [smem:[#allocation5_spill]] %s1362_s25  ;;  %p32_p0 = scmp.ge.s32.totalorder %s31_s26, 4 }
   0x8   : > { %p1115_p1 = scmp.ge.s32.totalorder %s1362_s25, 1  ;;  %p445_p2 = scmp.lt.s32.totalorder %s1362_s25, 9 }
   0x9   : > { %s1635_s26 = smov (%p32_p0, %s31_s26), 0  ;;  %s1637_s27 = smov (!%p32_p0, %s34_s27), %s1358_s24 }
   0xa   : > { %1622 = sst [smem:[#allocation6_spill]] %s1635_s26  ;;  %p446_p3 = pnand %p1115_p1, %p445_p2 }
   0xb   : > { %p36_p4 = scmp.ge.s32.totalorder %s1637_s27, 2  ;;  %p517_p5 = scmp.lt.s32.totalorder (!%p446_p3), %s1350_s22, 1 }
   0xc   : > { %449 = sbr.rel (%p446_p3) target bundleno = 1146 (0x47a), region = 68  ;;  %p521_p6 = scmp.lt.s32.totalorder (!%p446_p3), %s1346_s21, 3 }
   0xd   : > { %s1639_s27 = smov (%p36_p4, %s1637_s27), 0  ;;  %s1624_s11 = sld [smem:[#allocation11_spill]] (!%p446_p3) }
   0xe   : > { %1623 = sst [smem:[#allocation7_spill]] %s1639_s27  ;;  %p1126_p7 = scmp.ne.s32.totalorder (!%p446_p3), %s1346_s21, 0 }
   0xf   : > { %s1625_s0 = sld [smem:[#allocation8_spill]] (!%p446_p3) }
  0x10   : > { %s1626_s1 = sld [smem:[#allocation9_spill]] (!%p446_p3) }
  0x11   : > { %s1641_s22 = smov (!%p517_p5, %s1350_s22), 1  ;;  %s1627_s3 = sld [smem:[#allocation10_spill]] }
  0x12   : > { %s1466_s28 = scalar_select %p521_p6, %s1346_s21, 3 }
  0x13   : > { %s1116_s29 = sshll.u32 %s1641_s22, 2  ;;  %s552_s14 = scalar_lea.vmem %s1624_s11, %s1641_s22 }
  0x14   : > { %s1237_s18 = sshll.u32 %s1466_s28, 6  ;;  %v1477_v0 = vld [vmem:[%s552_s14] sm:$0x1]  ;;  %s536_s16 = scalar_lea.vmem %s1603_s4, %s1466_s28 }
  0x15   : > { %s1474_s17 = scalar_lea.vmem %s1625_s0, %s1116_s29  ;;  %s1500_s11 = scalar_lea.vmem %s1604_s5, %s1237_s18 }
  0x16   : > { %s1482_s27 = scalar_lea.vmem %s1626_s1, %s1237_s18  ;;  %s544_s1 = scalar_lea.vmem %s1605_s6, %s1466_s28 }
  0x17   : > { %s1491_s22 = scalar_lea.vmem %s1627_s3, %s1237_s18  ;;  %s1240_s24 = sshll.u32 %s1466_s28, 4 }
  0x18   : > { %s1510_s25 = scalar_lea.vmem %s1611_s12, %s1116_s29  ;;  %s1515_s13 = scalar_lea.vmem %s1606_s7, %s1240_s24 }
  0x19   : > { %562 = sbr.rel (%p1126_p7) target bundleno = 32 (0x20), region = 72 }
  0x1e   : > { %v1364_v1 = vmov 0.0  }
  0x1f   : > { %563 = vst [vmem:[#allocation2] sm:$0xff] %v1364_v1 }
  0x20 PF: > { %v1248_v2 = vld [vmem:[%s1482_s27 + $0x38] sm:$0xff]  ;;  %v1247_v4 = vld [vmem:[%s1482_s27 + $0x30] sm:$0xff]  ;;  %v1246_v6 = vld [vmem:[%s1482_s27 + $0x28] sm:$0xff]  ;;  %s1628_s29 = scalar_lea.vmem %s1601_s2, %s1466_s28  ;;  %vm811_vm0 = vcmask 261120   ;;  %v836_v35 = vlaneseq  ;;  %v833_v40 = vperm.slane %v1477_v0, 0  ;;  %v1365_v43 = vmov 0.0  }
  0x21   : > { %v1256_v3 = vld [vmem:[%s1491_s22 + $0x38] sm:$0xff]  ;;  %667 = vmatpush.bf16.msra.mxu0 %v1248_v2  ;;  %v1255_v5 = vld [vmem:[%s1491_s22 + $0x30] sm:$0xff]  ;;  %v1254_v7 = vld [vmem:[%s1491_s22 + $0x28] sm:$0xff]  ;;  %vm843_vm2 = vcmask 64512   ;;  %vm859_vm3 = vcmask 1043456   ;;  %p1234_p8 = scmp.ne.s32.totalorder %s1346_s21, 3 }
  0x22   : > { %732 = vmatpush.bf16.msra.mxu1 %v1256_v3  ;;  %v1245_v8 = vld [vmem:[%s1482_s27 + $0x20] sm:$0xff]  ;;  %v1244_v10 = vld [vmem:[%s1482_s27 + $0x18] sm:$0xff]  ;;  %v1243_v12 = vld [vmem:[%s1482_s27 + $0x10] sm:$0xff]  ;;  %v837_v37 = vshrl.u32 %v836_v35, 7  ;;  %v839_v38 = vand.u32 127, %v836_v35 }
  0x23   : > { %v1253_v9 = vld [vmem:[%s1491_s22 + $0x20] sm:$0xff]  ;;  %v1252_v11 = vld [vmem:[%s1491_s22 + $0x18] sm:$0xff]  ;;  %v1251_v13 = vld [vmem:[%s1491_s22 + $0x10] sm:$0xff] }
  0x24   : > { %v1242_v14 = vld [vmem:[%s1482_s27 + $0x8] sm:$0xff]  ;;  %v1241_v16 = vld [vmem:[%s1482_s27] sm:$0xff]  ;;  %v1264_v30 = vld [vmem:[%s1500_s11 + $0x38] sm:$0xff]  ;;  %vm840_vm1 = vcmp.gt.s32.totalorder %v839_v38, %v837_v37 }
  0x25   : > { %668 = vmatpush.bf16.msra.mxu0 %v1247_v4  ;;  %v1250_v15 = vld [vmem:[%s1491_s22 + $0x8] sm:$0xff]  ;;  %v1249_v17 = vld [vmem:[%s1491_s22] sm:$0xff]  ;;  %797 = vmatpush.bf16.msra.mxu2 %v1264_v30  ;;  %v1263_v31 = vld [vmem:[%s1500_s11 + $0x30] sm:$0xff]  ;;  %v841_v44 = vsel %vm840_vm1, -1e+09, %v1365_v43 }
  0x26   : > { %733 = vmatpush.bf16.msra.mxu1 %v1255_v5  ;;  %v1535_v18 = vld [vmem:[%s1474_s17] sm:$0xf]  ;;  %v1262_v32 = vld [vmem:[%s1500_s11 + $0x28] sm:$0xff]  ;;  %v1260_v34 = vld [vmem:[%s1500_s11 + $0x18] sm:$0xff] }
  0x27   : > { %v1311_v19 = vld [vmem:[%s536_s16] ss:$0 sm:$0xff]  ;;  %v1259_v36 = vld [vmem:[%s1500_s11 + $0x10] sm:$0xff]  ;;  %v1258_v39 = vld [vmem:[%s1500_s11 + $0x8] sm:$0xff] }
  0x28   : > { %v1310_v22 = vld [vmem:[%s1628_s29] ss:$0 sm:$0xff]  ;;  %v1266_v61 = vld [vmem:[%s1515_s13 + $0x8] sm:$0xff] }
  0x29   : > { %669 = vmatpush.bf16.msra.mxu0 %v1246_v6  ;;  %798 = vmatpush.bf16.msra.mxu2 %v1263_v31  ;;  %v1261_v33 = vld [vmem:[%s1500_s11 + $0x20] sm:$0xff] }
  0x2a   : > { %734 = vmatpush.bf16.msra.mxu1 %v1254_v7  ;;  %v1257_v45 = vld [vmem:[%s1500_s11] sm:$0xff] }
  0x2b   : > { %v1312_v55 = vld [vmem:[%s544_s1] ss:$0 sm:$0xff] }
  0x2c   : > { %v1265_v62 = vld [vmem:[%s1515_s13] sm:$0xff] }
  0x2d   : > { %670 = vmatpush.bf16.msra.mxu0 %v1245_v8  ;;  %799 = vmatpush.bf16.msra.mxu2 %v1262_v32  ;;  %v876_v6 = vld [vmem:[#allocation2] sm:$0xff] }
  0x2e   : > { %735 = vmatpush.bf16.msra.mxu1 %v1253_v9 }
  0x31   : > { %671 = vmatpush.bf16.msra.mxu0 %v1244_v10  ;;  %800 = vmatpush.bf16.msra.mxu2 %v1261_v33 }
  0x32   : > { %736 = vmatpush.bf16.msra.mxu1 %v1252_v11 }
  0x35   : > { %672 = vmatpush.bf16.msra.mxu0 %v1243_v12  ;;  %801 = vmatpush.bf16.msra.mxu2 %v1260_v34 }
  0x36   : > { %737 = vmatpush.bf16.msra.mxu1 %v1251_v13 }
  0x39   : > { %673 = vmatpush.bf16.msra.mxu0 %v1242_v14  ;;  %802 = vmatpush.bf16.msra.mxu2 %v1259_v36 }
  0x3a   : > { %738 = vmatpush.bf16.msra.mxu1 %v1250_v15 }
  0x3d   : > { %674 = vmatpush.bf16.msra.mxu0 %v1241_v16  ;;  %803 = vmatpush.bf16.msra.mxu2 %v1258_v39 }
  0x3e   : > { %739 = vmatpush.bf16.msra.mxu1 %v1249_v17 }
  0x40   : > { %675 = vmatmul.bf16.vlgmr.msra.gmra.mxu0 %v1535_v18 }
  0x41   : > { %740 = vmatmul.bf16.vlgmr.msra.gmra.mxu1 %v1535_v18  ;;  %804 = vmatpush.bf16.msra.mxu2 %v1257_v45 }
  0x44   : > { %805 = vmatmul.bf16.vlgmr.msra.gmra.mxu2 %v1535_v18 }
  0xbd   : > { %v676_v20 = vpop.f32.mrf.mxu0 }
  0xbe   : > { %v741_v21 = vpop.f32.mrf.mxu1  ;;  %v677_v25 = vadd.f32 %v1310_v22, %v676_v20 }
  0xbf   : > { %v742_v23 = vadd.f32 %v1311_v19, %v741_v21 }
  0xc0   : > { %v680_v29 = vpack.c.bf16 %v677_v25, %v677_v25 }
  0xc1   : > { %v745_v24 = vpack.c.bf16 %v742_v23, %v742_v23 }
  0xc3   : > { %v816_v26 = vsel %vm811_vm0, %v745_v24, 0 }
  0xc4   : > { %825 = vmatpush.bf16.xpose.msra.mxu3 %v816_v26 }
  0xc5   : > { %v678_v27 = vpop.f32.mrf.mxu0 }
  0xc6   : > { %v743_v28 = vpop.f32.mrf.mxu1 }
  0xc7   : > { %v806_v56 = vpop.f32.mrf.mxu2 }
  0xc8   : > { %v807_v57 = vadd.f32 %v1312_v55, %v806_v56 }
  0xca   : > { %v810_v58 = vpack.c.bf16 %v807_v57, %v807_v57 }
  0xcb   : > { %1223 = vmatmul.msk.bf16.vlgmr.msra.gmra.mxu3 %vm811_vm0, %v680_v29 }
  0xcc   : > { %v861_v59 = vsel %vm859_vm3, %v810_v58, 0 }
  0xcd   : > { %870 = vmatpush.bf16.msrb.mxu3 %v861_v59 }
  0xcf   : > { %v808_v60 = vpop.f32.mrf.mxu2 }
  0xd1   : > { %903 = vmatpush.bf16.msra.mxu3 %v1266_v61 }
  0xd5   : > { %904 = vmatpush.bf16.msra.mxu3 %v1265_v62 }
 0x14e   : > { %v827_v41 = vpop.f32.mrf.mxu3 }
 0x14f   : > { %v831_v42 = vmul.f32 0.17677669, %v827_v41 }
 0x151   : > { %v835_v46 = vadd.f32 %v833_v40, %v831_v42 }
 0x153   : > { %v842_v47 = vadd.f32 %v841_v44, %v835_v46 }
 0x155   : > { %v844_v48 = vsel %vm843_vm2, %v842_v47, -inf }
 0x156   : > { %845 = vmax.xlane.f32.xlu0 %v844_v48  ;;  %v829_v49 = vpop.f32.mrf.mxu3 }
 0x1c9   : > { %v846_v50 = vpop.xlane.xlu0 %845 }
 0x1ca   : > { %v847_v51 = vsub.f32 %v842_v47, %v846_v50 }
 0x1cc   : > { %v848_v52 = vmul.f32 1.442695, %v847_v51 }
 0x1ce   : > { %1313 = vpow2.f32 %v848_v52 }
 0x1d4   : > { %v1314_v53 = vpop.eup %1313 }
 0x1d5   : > { %v850_v54 = vsel %vm843_vm2, %v1314_v53, 0.0 }
 0x1d6   : > { %851 = vadd.xlane.f32.xlu0 %v850_v54 }
 0x249   : > { %v852_v63 = vpop.xlane.xlu0 %851 }
 0x24a   : > { %1315 = vrcp.f32 %v852_v63 }
 0x250   : > { %v1316_v0 = vpop.eup %1315 }
 0x251   : > { %v854_v1 = vmul.f32 %v1316_v0, %v1314_v53 }
 0x253   : > { %v855_v2 = vpack.c.bf16 %v854_v1, %v854_v1 }
 0x255   : > { %1224 = vmatmul.msk.bf16.vlgmr.msrb.gmra.mxu3 %vm843_vm2, %v855_v2 }
 0x2d8   : > { %v872_v3 = vpop.f32.mrf.mxu3 }
 0x2d9   : > { %v877_v4 = vpack.c.bf16 %v872_v3, %v872_v3 }
 0x2db   : > { %1233 = vmatmul.msk.bf16.vlgmr.msra.gmra.mxu3 %vm811_vm0, %v877_v4 }
 0x2e0   : > { %v874_v5 = vpop.f32.mrf.mxu3 }
 0x35e   : > { %v906_v7 = vpop.f32.mrf.mxu3 }
 0x35f   : > { %v910_v8 = vadd.f32 %v906_v7, %v876_v6 }
 0x361   : > { %911 = vst [vmem:[#allocation2] sm:$0xff] %v910_v8 }
 0x362   : > { %915 = sbr.rel (%p1234_p8) target bundleno = 1146 (0x47a), region = 76 }
 0x366   : > { %v908_v9 = vpop.f32.mrf.mxu3 }
 0x367   : > { %v1317_v11 = vld [vmem:[%s1607_s8] ss:$0 sm:$0xff]  ;;  %v922_v12 = vunpack.c.l.bf16 %v1535_v18  ;;  %v1366_v15 = vmov 128.0  }
 0x368   : > { %v916_v10 = vld [vmem:[#allocation2] sm:$0xff]  ;;  %1320 = vrcp.f32 %v1366_v15 }
 0x369   : > { %v921_v13 = vadd.f32 %v1317_v11, %v916_v10  ;;  %v1318_v35 = vld [vmem:[%s1608_s9] ss:$0 sm:$0xff] }
 0x36a   : > { %v1319_v37 = vld [vmem:[%s1609_s10] ss:$0 sm:$0xff] }
 0x36b   : > { %v923_v14 = vadd.f32 %v922_v12, %v921_v13 }
 0x36d   : > { %926 = vadd.xlane.f32.xlu0 %v923_v14 }
 0x36e   : > { %v1321_v16 = vpop.eup %1320 }
 0x36f   : > { %v929_v17 = vmul.f32 128.0, %v1321_v16  ;;  %vm933_vm4 = vweird.f32 %v1321_v16 }
 0x371   : > { %v930_v19 = vsub.f32 1.0, %v929_v17 }
 0x373   : > { %v931_v20 = vmul.f32 %v1321_v16, %v930_v19 }
 0x375   : > { %v932_v21 = vadd.f32 %v1321_v16, %v931_v20 }
 0x377   : > { %v934_v22 = vsel %vm933_vm4, %v1321_v16, %v932_v21 }
 0x3e0   : > { %v927_v23 = vpop.xlane.xlu0 %926 }
 0x3e1   : > { %v935_v24 = vmul.f32 %v934_v22, %v927_v23 }
 0x3e3   : > { %v936_v25 = vsub.f32 %v923_v14, %v935_v24 }
 0x3e5   : > { %v937_v26 = vmul.f32 %v936_v25, %v936_v25 }
 0x3e7   : > { %938 = vadd.xlane.f32.xlu0 %v937_v26 }
 0x45a   : > { %v939_v27 = vpop.xlane.xlu0 %938 }
 0x45b   : > { %v940_v28 = vmul.f32 %v939_v27, %v934_v22 }
 0x45d   : > { %v941_v18 = vadd.f32 1e-05, %v940_v28 }
 0x45f   : > { %1322 = vrsqrt.f32 %v941_v18  ;;  %vm948_vm6 = vweird.f32 %v941_v18 }
 0x465   : > { %v1323_v29 = vpop.eup %1322 }
 0x466   : > { %v943_v30 = vmul.f32 %v1323_v29, %v941_v18  ;;  %vm949_vm5 = vweird.f32 %v1323_v29 }
 0x467   : > { %vm950_vm7 = vmor %vm948_vm6, %vm949_vm5 }
 0x468   : > { %v944_v31 = vmul.f32 %v1323_v29, %v943_v30 }
 0x46a   : > { %v945_v32 = vmul.f32 0.5, %v944_v31 }
 0x46c   : > { %v946_v33 = vsub.f32 1.5, %v945_v32 }
 0x46e   : > { %v947_v34 = vmul.f32 %v1323_v29, %v946_v33 }
 0x470   : > { %v951_v36 = vsel %vm950_vm7, %v1323_v29, %v947_v34 }
 0x471   : > { %v952_v38 = vmul.f32 %v951_v36, %v936_v25 }
 0x473   : > { %v956_v39 = vmul.f32 %v1318_v35, %v952_v38 }
 0x475   : > { %v960_v40 = vadd.f32 %v1319_v37, %v956_v39 }
 0x477   : > { %v961_v41 = vpack.c.bf16 %v960_v40, %v960_v40 }
 0x479   : > { %962 = vst [vmem:[%s1510_s25] sm:$0xf] %v961_v41 }
 0x47a PF: > { %s1629_s16 = sld [smem:[#allocation5_spill]] }
 0x47b   : > { %s1630_s21 = sld [smem:[#allocation3_spill]] }
 0x47c   : > { %s1631_s22 = sld [smem:[#allocation4_spill]] }
 0x47d   : > { %s1632_s23 = sld [smem:[#allocation6_spill]] }
 0x47e   : > { %s1633_s24 = sld [smem:[#allocation7_spill]] }
 0x480   : > { %s22_s25 = sadd.s32 1, %s1629_s16  }
 0x481   : > { %p19_p9 = scmp.ge.s32.totalorder %s22_s25, 10  }
 0x483   :  { %21 = sbr.rel (!%p19_p9) target bundleno = 5 (0x5), region = 130 }

// kernel: vietocr_forward.15
= control target key start
LH: loop header
LB: loop body
LE: loop exit
PB: predicated region body
PF: predicated region fallthrough
CT: control target
= control target key end

     0   :  { %s812_s1 = inlined_call_operand.vmem [shape: bf16[128,256], index: 1, kind: input, shape index: {}]   ;;  %s813_s3 = inlined_call_operand.vmem [shape: bf16[256,128], index: 3, kind: input, shape index: {}]   ;;  %s814_s0 = inlined_call_operand.vmem [shape: bf16[16,128], index: 0, kind: input, shape index: {}]   ;;  %s815_s2 = inlined_call_operand.vmem [shape: f32[1,256], index: 2, kind: input, shape index: {}]   ;;  %s816_s4 = inlined_call_operand.vmem [shape: f32[1,128], index: 4, kind: input, shape index: {}]   ;;  %s817_s5 = inlined_call_operand.vmem [shape: f32[1,128], index: 5, kind: input, shape index: {}]   ;;  %s818_s6 = inlined_call_operand.vmem [shape: f32[1,128], index: 6, kind: input, shape index: {}]   ;;  %s819_s7 = inlined_call_operand.vmem [shape: bf16[16,128], index: 7, kind: output, shape index: {}]  }
   0x1   :  { %v484_v0 = vld [vmem:[%s812_s1 + $0x70] sm:$0xf]  ;;  %v570_v1 = vld [vmem:[%s812_s1 + $0x74] sm:$0xf0]  ;;  %v569_v2 = vld [vmem:[%s812_s1 + $0x74] sm:$0xf] }
   0x2   :  { %v485_v3 = vor.u32 %v570_v1, %v484_v0  ;;  %v486_v4 = vld [vmem:[%s812_s1 + $0x78] sm:$0xf0]  ;;  %v476_v5 = vld [vmem:[%s812_s1 + $0x60] sm:$0xf]  ;;  %v568_v6 = vld [vmem:[%s812_s1 + $0x64] sm:$0xf0] }
   0x3   :  { %v489_v7 = vor.u32 %v569_v2, %v486_v4  ;;  %v567_v8 = vld [vmem:[%s812_s1 + $0x64] sm:$0xf]  ;;  %v478_v9 = vld [vmem:[%s812_s1 + $0x68] sm:$0xf0]  ;;  %v477_v10 = vor.u32 %v568_v6, %v476_v5  ;;  %v468_v12 = vld [vmem:[%s812_s1 + $0x50] sm:$0xf] }
   0x4   :  { %142 = vmatpush.bf16.msra.mxu0 %v485_v3  ;;  %v481_v11 = vor.u32 %v567_v8, %v478_v9  ;;  %v566_v13 = vld [vmem:[%s812_s1 + $0x54] sm:$0xf0]  ;;  %v565_v14 = vld [vmem:[%s812_s1 + $0x54] sm:$0xf]  ;;  %v470_v15 = vld [vmem:[%s812_s1 + $0x58] sm:$0xf0] }
   0x5   :  { %156 = vmatpush.bf16.msra.mxu1 %v489_v7  ;;  %v469_v16 = vor.u32 %v566_v13, %v468_v12  ;;  %v473_v17 = vor.u32 %v565_v14, %v470_v15  ;;  %v460_v18 = vld [vmem:[%s812_s1 + $0x40] sm:$0xf]  ;;  %v564_v19 = vld [vmem:[%s812_s1 + $0x44] sm:$0xf0]  ;;  %v563_v20 = vld [vmem:[%s812_s1 + $0x44] sm:$0xf] }
   0x6   :  { %v462_v21 = vld [vmem:[%s812_s1 + $0x48] sm:$0xf0]  ;;  %v461_v22 = vor.u32 %v564_v19, %v460_v18  ;;  %v578_v23 = vld [vmem:[%s813_s3 + $0x38] sm:$0xff]  ;;  %v452_v26 = vld [vmem:[%s812_s1 + $0x30] sm:$0xf] }
   0x7   :  { %v586_v24 = vld [vmem:[%s813_s3 + $0x78] sm:$0xff]  ;;  %v465_v25 = vor.u32 %v563_v20, %v462_v21  ;;  %v561_v28 = vld [vmem:[%s812_s1 + $0x34] sm:$0xf]  ;;  %306 = vmatpush.bf16.msra.mxu2 %v578_v23  ;;  %v444_v34 = vld [vmem:[%s812_s1 + $0x20] sm:$0xf] }
   0x8   :  { %143 = vmatpush.bf16.msra.mxu0 %v477_v10  ;;  %v562_v27 = vld [vmem:[%s812_s1 + $0x34] sm:$0xf0]  ;;  %v454_v29 = vld [vmem:[%s812_s1 + $0x38] sm:$0xf0]  ;;  %320 = vmatpush.bf16.msra.mxu3 %v586_v24  ;;  %v577_v30 = vld [vmem:[%s813_s3 + $0x30] sm:$0xff] }
   0x9   :  { %157 = vmatpush.bf16.msra.mxu1 %v481_v11  ;;  %v585_v31 = vld [vmem:[%s813_s3 + $0x70] sm:$0xff]  ;;  %v453_v32 = vor.u32 %v562_v27, %v452_v26  ;;  %v457_v33 = vor.u32 %v561_v28, %v454_v29  ;;  %v560_v35 = vld [vmem:[%s812_s1 + $0x24] sm:$0xf0]  ;;  %v559_v36 = vld [vmem:[%s812_s1 + $0x24] sm:$0xf] }
   0xa   :  { %v446_v37 = vld [vmem:[%s812_s1 + $0x28] sm:$0xf0]  ;;  %v445_v40 = vor.u32 %v560_v35, %v444_v34  ;;  %v436_v42 = vld [vmem:[%s812_s1 + $0x10] sm:$0xf]  ;;  %v558_v43 = vld [vmem:[%s812_s1 + $0x14] sm:$0xf0] }
   0xb   :  { %307 = vmatpush.bf16.msra.mxu2 %v577_v30  ;;  %v576_v38 = vld [vmem:[%s813_s3 + $0x28] sm:$0xff]  ;;  %v449_v41 = vor.u32 %v559_v36, %v446_v37  ;;  %v557_v44 = vld [vmem:[%s812_s1 + $0x14] sm:$0xf]  ;;  %v438_v45 = vld [vmem:[%s812_s1 + $0x18] sm:$0xf0]  ;;  %v437_v48 = vor.u32 %v558_v43, %v436_v42 }
   0xc   :  { %144 = vmatpush.bf16.msra.mxu0 %v469_v16  ;;  %321 = vmatpush.bf16.msra.mxu3 %v585_v31  ;;  %v584_v39 = vld [vmem:[%s813_s3 + $0x68] sm:$0xff]  ;;  %v575_v46 = vld [vmem:[%s813_s3 + $0x20] sm:$0xff]  ;;  %v441_v49 = vor.u32 %v557_v44, %v438_v45  ;;  %v574_v57 = vld [vmem:[%s813_s3 + $0x18] sm:$0xff] }
   0xd   :  { %158 = vmatpush.bf16.msra.mxu1 %v473_v17  ;;  %v583_v47 = vld [vmem:[%s813_s3 + $0x60] sm:$0xff]  ;;  %v556_v51 = vld [vmem:[%s812_s1 + $0x4] sm:$0xf0]  ;;  %v430_v53 = vld [vmem:[%s812_s1 + $0x8] sm:$0xf0] }
   0xe   :  { %v428_v50 = vld [vmem:[%s812_s1] sm:$0xf]  ;;  %v555_v52 = vld [vmem:[%s812_s1 + $0x4] sm:$0xf]  ;;  %v582_v58 = vld [vmem:[%s813_s3 + $0x58] sm:$0xff] }
   0xf   :  { %308 = vmatpush.bf16.msra.mxu2 %v576_v38  ;;  %v429_v54 = vor.u32 %v556_v51, %v428_v50  ;;  %v433_v55 = vor.u32 %v555_v52, %v430_v53  ;;  %v554_v56 = vld [vmem:[%s814_s0] sm:$0xff]  ;;  %v573_v59 = vld [vmem:[%s813_s3 + $0x10] sm:$0xff]  ;;  %v572_v61 = vld [vmem:[%s813_s3 + $0x8] sm:$0xff] }
  0x10   :  { %145 = vmatpush.bf16.msra.mxu0 %v461_v22  ;;  %322 = vmatpush.bf16.msra.mxu3 %v584_v39  ;;  %v581_v60 = vld [vmem:[%s813_s3 + $0x50] sm:$0xff]  ;;  %v580_v62 = vld [vmem:[%s813_s3 + $0x48] sm:$0xff]  ;;  %v571_v63 = vld [vmem:[%s813_s3] sm:$0xff] }
  0x11   :  { %159 = vmatpush.bf16.msra.mxu1 %v465_v25  ;;  %v579_v0 = vld [vmem:[%s813_s3 + $0x40] sm:$0xff] }
  0x12   :  { %v50_v1 = vld [vmem:[%s815_s2] sm:$0x3] }
  0x13   :  { %309 = vmatpush.bf16.msra.mxu2 %v575_v46  ;;  %v52_v4 = vperm.slane %v50_v1, 0  ;;  %v53_v5 = vperm.slane %v50_v1, 1  ;;  %v588_v18 = vld [vmem:[%s814_s0] sm:$0xff]  }
  0x14   :  { %146 = vmatpush.bf16.msra.mxu0 %v453_v32  ;;  %323 = vmatpush.bf16.msra.mxu3 %v583_v47  ;;  %v597_v20 = vld [vmem:[%s816_s4] ss:$0 sm:$0xff]  ;;  %v589_v23 = vunpack.c.l.bf16 %v588_v18  ;;  %v590_v29 = vunpack.c.h.bf16 %v588_v18  ;;  %v606_v32 = vmov 128.0  }
  0x15   :  { %160 = vmatpush.bf16.msra.mxu1 %v457_v33  ;;  %600 = vrcp.f32 %v606_v32  ;;  %v598_v1 = vld [vmem:[%s817_s5] ss:$0 sm:$0xff] }
  0x17   :  { %310 = vmatpush.bf16.msra.mxu2 %v574_v57 }
  0x18   :  { %147 = vmatpush.bf16.msra.mxu0 %v445_v40  ;;  %324 = vmatpush.bf16.msra.mxu3 %v582_v58 }
  0x19   :  { %161 = vmatpush.bf16.msra.mxu1 %v449_v41 }
  0x1b   :  { %311 = vmatpush.bf16.msra.mxu2 %v573_v59  ;;  %v601_v33 = vpop.eup %600 }
  0x1c   :  { %148 = vmatpush.bf16.msra.mxu0 %v437_v48  ;;  %325 = vmatpush.bf16.msra.mxu3 %v581_v60  ;;  %v362_v34 = vmul.f32 128.0, %v601_v33  ;;  %vm366_vm0 = vweird.f32 %v601_v33 }
  0x1d   :  { %162 = vmatpush.bf16.msra.mxu1 %v441_v49 }
  0x1e   :  { %v363_v35 = vsub.f32 1.0, %v362_v34 }
  0x1f   :  { %312 = vmatpush.bf16.msra.mxu2 %v572_v61 }
  0x20   :  { %149 = vmatpush.bf16.msra.mxu0 %v429_v54  ;;  %326 = vmatpush.bf16.msra.mxu3 %v580_v62  ;;  %v364_v36 = vmul.f32 %v601_v33, %v363_v35 }
  0x21   :  { %163 = vmatpush.bf16.msra.mxu1 %v433_v55 }
  0x22   :  { %v365_v37 = vadd.f32 %v601_v33, %v364_v36 }
  0x23   :  { %150 = vmatmul.bf16.vlgmr.msra.gmra.mxu0 %v554_v56  ;;  %313 = vmatpush.bf16.msra.mxu2 %v571_v63 }
  0x24   :  { %164 = vmatmul.bf16.vlgmr.msra.gmra.mxu1 %v554_v56  ;;  %327 = vmatpush.bf16.msra.mxu3 %v579_v0  ;;  %v367_v38 = vsel %vm366_vm0, %v601_v33, %v365_v37 }
  0xa0   :  { %v151_v2 = vpop.f32.mrf.mxu0 }
  0xa1   :  { %v165_v3 = vpop.f32.mrf.mxu1  ;;  %v152_v6 = vadd.f32 %v151_v2, %v52_v4 }
  0xa2   :  { %v166_v7 = vadd.f32 %v165_v3, %v53_v5 }
  0xa3   :  { %v170_v12 = vmax.f32 %v152_v6, 0.0 }
  0xa4   :  { %v171_v14 = vmax.f32 %v166_v7, 0.0 }
  0xa8   :  { %v153_v8 = vpop.f32.mrf.mxu0 }
  0xa9   :  { %v154_v9 = vadd.f32 %v153_v8, %v52_v4  ;;  %v167_v10 = vpop.f32.mrf.mxu1 }
  0xaa   :  { %v168_v11 = vadd.f32 %v167_v10, %v53_v5  ;;  %v599_v5 = vld [vmem:[%s818_s6] ss:$0 sm:$0xff] }
  0xab   :  { %v172_v13 = vmax.f32 %v154_v9, 0.0 }
  0xac   :  { %v173_v15 = vmax.f32 %v168_v11, 0.0 }
  0xad   :  { %v176_v16 = vpack.c.bf16 %v172_v13, %v170_v12 }
  0xae   :  { %v177_v17 = vpack.c.bf16 %v173_v15, %v171_v14 }
  0xaf   :  { %314 = vmatmul.bf16.vlgmr.msra.gmra.mxu2 %v176_v16 }
  0xb0   :  { %328 = vmatmul.bf16.vlgmr.msra.gmra.mxu3 %v177_v17 }
 0x132   :  { %v315_v19 = vpop.f32.mrf.mxu2 }
 0x133   :  { %v329_v21 = vpop.f32.mrf.mxu3 }
 0x134   :  { %v330_v22 = vadd.f32 %v329_v21, %v315_v19 }
 0x136   :  { %v347_v24 = vadd.f32 %v597_v20, %v330_v22 }
 0x138   :  { %v353_v25 = vadd.f32 %v589_v23, %v347_v24 }
 0x13a   :  { %357 = vadd.xlane.f32.xlu0 %v353_v25  ;;  %v317_v26 = vpop.f32.mrf.mxu2 }
 0x13b   :  { %v331_v27 = vpop.f32.mrf.mxu3 }
 0x13c   :  { %v332_v28 = vadd.f32 %v331_v27, %v317_v26 }
 0x13e   :  { %v348_v30 = vadd.f32 %v597_v20, %v332_v28 }
 0x140   :  { %v354_v31 = vadd.f32 %v590_v29, %v348_v30 }
 0x142   :  { %359 = vadd.xlane.f32.xlu0 %v354_v31 }
 0x1ad   :  { %v358_v39 = vpop.xlane.xlu0 %357 }
 0x1ae   :  { %v368_v40 = vmul.f32 %v367_v38, %v358_v39 }
 0x1b0   :  { %v370_v41 = vsub.f32 %v353_v25, %v368_v40 }
 0x1b2   :  { %v372_v42 = vmul.f32 %v370_v41, %v370_v41 }
 0x1b4   :  { %374 = vadd.xlane.f32.xlu1 %v372_v42 }
 0x1b5   :  { %v360_v43 = vpop.xlane.xlu0 %359 }
 0x1b6   :  { %v369_v44 = vmul.f32 %v367_v38, %v360_v43 }
 0x1b8   :  { %v371_v45 = vsub.f32 %v354_v31, %v369_v44 }
 0x1ba   :  { %v373_v46 = vmul.f32 %v371_v45, %v371_v45 }
 0x1bc   :  { %376 = vadd.xlane.f32.xlu1 %v373_v46 }
 0x227   :  { %v375_v47 = vpop.xlane.xlu1 %374 }
 0x228   :  { %v378_v48 = vmul.f32 %v375_v47, %v367_v38 }
 0x22a   :  { %v380_v49 = vadd.f32 1e-05, %v378_v48 }
 0x22c   :  { %602 = vrsqrt.f32 %v380_v49  ;;  %vm388_vm2 = vweird.f32 %v380_v49 }
 0x22f   :  { %v377_v50 = vpop.xlane.xlu1 %376 }
 0x230   :  { %v379_v51 = vmul.f32 %v377_v50, %v367_v38 }
 0x232   :  { %v603_v52 = vpop.eup %602  ;;  %v381_v53 = vadd.f32 1e-05, %v379_v51 }
 0x233   :  { %v383_v54 = vmul.f32 %v603_v52, %v380_v49  ;;  %vm389_vm1 = vweird.f32 %v603_v52 }
 0x234   :  { %604 = vrsqrt.f32 %v381_v53  ;;  %vm390_vm3 = vmor %vm388_vm2, %vm389_vm1  ;;  %vm398_vm5 = vweird.f32 %v381_v53 }
 0x235   :  { %v384_v55 = vmul.f32 %v603_v52, %v383_v54 }
 0x237   :  { %v385_v56 = vmul.f32 0.5, %v384_v55 }
 0x239   :  { %v386_v57 = vsub.f32 1.5, %v385_v56 }
 0x23a   :  { %v605_v58 = vpop.eup %604 }
 0x23b   :  { %v387_v59 = vmul.f32 %v603_v52, %v386_v57  ;;  %v393_v60 = vmul.f32 %v605_v58, %v381_v53  ;;  %vm399_vm4 = vweird.f32 %v605_v58 }
 0x23c   :  { %vm400_vm6 = vmor %vm398_vm5, %vm399_vm4 }
 0x23d   :  { %v394_v61 = vmul.f32 %v605_v58, %v393_v60  ;;  %v391_v62 = vsel %vm390_vm3, %v603_v52, %v387_v59 }
 0x23e   :  { %v402_v2 = vmul.f32 %v391_v62, %v370_v41 }
 0x23f   :  { %v395_v63 = vmul.f32 0.5, %v394_v61 }
 0x240   :  { %v407_v6 = vmul.f32 %v598_v1, %v402_v2 }
 0x241   :  { %v396_v0 = vsub.f32 1.5, %v395_v63 }
 0x242   :  { %v412_v9 = vadd.f32 %v599_v5, %v407_v6 }
 0x243   :  { %v397_v3 = vmul.f32 %v605_v58, %v396_v0 }
 0x245   :  { %v401_v4 = vsel %vm400_vm6, %v605_v58, %v397_v3 }
 0x246   :  { %v403_v7 = vmul.f32 %v401_v4, %v371_v45 }
 0x248   :  { %v408_v8 = vmul.f32 %v598_v1, %v403_v7 }
 0x24a   :  { %v413_v10 = vadd.f32 %v599_v5, %v408_v8 }
 0x24c   :  { %v594_v11 = vpack.c.bf16 %v413_v10, %v412_v9 }
 0x24e   :  { %595 = vst [vmem:[%s819_s7] sm:$0xff] %v594_v11  }

// kernel: vietocr_forward.14
= control target key start
LH: loop header
LB: loop body
LE: loop exit
PB: predicated region body
PF: predicated region fallthrough
CT: control target
= control target key end

     0   :  { %s1468_s21 = smov 0   ;;  %s1470_s22 = smov 0   ;;  %s1635_s0 = inlined_call_operand.vmem [shape: bf16[2,8,128], index: 0, kind: input, shape index: {}]   ;;  %s1636_s1 = inlined_call_operand.vmem [shape: bf16[2,32,128], index: 1, kind: input, shape index: {}]   ;;  %s1637_s2 = inlined_call_operand.vmem [shape: bf16[4,128,32], index: 2, kind: input, shape index: {}]   ;;  %s1638_s3 = inlined_call_operand.vmem [shape: f32[4,1,32], index: 3, kind: input, shape index: {}]   ;;  %s1639_s4 = inlined_call_operand.vmem [shape: bf16[4,128,32], index: 4, kind: input, shape index: {}]   ;;  %s1640_s5 = inlined_call_operand.vmem [shape: f32[4,1,32], index: 5, kind: input, shape index: {}]   ;;  %s1641_s6 = inlined_call_operand.vmem [shape: bf16[4,128,32], index: 6, kind: input, shape index: {}]   ;;  %s1642_s7 = inlined_call_operand.vmem [shape: f32[4,1,32], index: 7, kind: input, shape index: {}]   ;;  %s1643_s8 = inlined_call_operand.vmem [shape: bf16[4,32,128], index: 8, kind: input, shape index: {}]   ;;  %s1644_s9 = inlined_call_operand.vmem [shape: f32[1,128], index: 9, kind: input, shape index: {}]   ;;  %s1645_s10 = inlined_call_operand.vmem [shape: f32[1,128], index: 10, kind: input, shape index: {}]   ;;  %s1646_s11 = inlined_call_operand.vmem [shape: f32[1,128], index: 11, kind: input, shape index: {}]   ;;  %s1647_s12 = inlined_call_operand.vmem [shape: bf16[2,8,128], index: 12, kind: output, shape index: {}]  }
   0x1   :  { %1651 = sst [smem:[#allocation8_spill]] %s1635_s0  ;;  %s1472_s23 = smov 0  }
   0x2   :  { %1652 = sst [smem:[#allocation9_spill]] %s1636_s1  ;;  %s1474_s24 = smov 0  }
   0x3   :  { %1653 = sst [smem:[#allocation10_spill]] %s1637_s2  ;;  %s1476_s25 = smov 0  }
   0x4   :  { %1654 = sst [smem:[#allocation11_spill]] %s1639_s4 }
   0x5   :  { %1655 = sst [smem:[#allocation12_spill]] %s1646_s11 }
   0x6 LB: > { %1656 = sst [smem:[#allocation3_spill]] %s1391_s23  ;;  %s31_s26 = sadd.s32 1, %s1391_s23  ;;  %s1399_s25 = sphi %s1476_s25, %s22_s25   ;;  %s1395_s24 = sphi %s1474_s24, %s1671_s24   ;;  %s1391_s23 = sphi %s1472_s23, %s1670_s23   ;;  %s1387_s22 = sphi %s1470_s22, %s1669_s22   ;;  %s1383_s21 = sphi %s1468_s21, %s1668_s21  }
   0x7   : > { %1657 = sst [smem:[#allocation4_spill]] %s1395_s24  ;;  %s34_s27 = sadd.s32 1, %s1395_s24 }
   0x8   : > { %1658 = sst [smem:[#allocation5_spill]] %s1399_s25  ;;  %p32_p0 = scmp.ge.s32.totalorder %s31_s26, 4 }
   0x9   : > { %p1140_p1 = scmp.ge.s32.totalorder %s1399_s25, 1  ;;  %p447_p2 = scmp.lt.s32.totalorder %s1399_s25, 9 }
   0xa   : > { %s1673_s26 = smov (%p32_p0, %s31_s26), 0  ;;  %s1675_s27 = smov (!%p32_p0, %s34_s27), %s1395_s24 }
   0xb   : > { %1659 = sst [smem:[#allocation6_spill]] %s1673_s26  ;;  %p448_p3 = pnand %p1140_p1, %p447_p2 }
   0xc   : > { %p36_p4 = scmp.ge.s32.totalorder %s1675_s27, 2  ;;  %p521_p5 = scmp.lt.s32.totalorder (!%p448_p3), %s1387_s22, 1 }
   0xd   : > { %451 = sbr.rel (%p448_p3) target bundleno = 1168 (0x490), region = 68  ;;  %p530_p6 = scmp.lt.s32.totalorder (!%p448_p3), %s1383_s21, 3 }
   0xe   : > { %s1677_s27 = smov (%p36_p4, %s1675_s27), 0  ;;  %s1661_s0 = sld [smem:[#allocation8_spill]] (!%p448_p3) }
   0xf   : > { %1660 = sst [smem:[#allocation7_spill]] %s1677_s27  ;;  %p1153_p7 = scmp.ne.s32.totalorder (!%p448_p3), %s1383_s21, 0 }
  0x10   : > { %s1662_s1 = sld [smem:[#allocation9_spill]] (!%p448_p3) }
  0x11   : > { %s1663_s2 = sld [smem:[#allocation10_spill]] (!%p448_p3) }
  0x12   : > { %s1679_s22 = smov (!%p521_p5, %s1387_s22), 1  ;;  %s1664_s4 = sld [smem:[#allocation11_spill]] }
  0x13   : > { %s1502_s28 = scalar_select %p530_p6, %s1383_s21, 3 }
  0x14   : > { %s1141_s29 = sshll.u32 %s1679_s22, 2  ;;  %s1272_s30 = sshll.u32 %s1679_s22, 4 }
  0x15   : > { %s1507_s15 = scalar_lea.vmem %s1661_s0, %s1141_s29  ;;  %s1273_s19 = sshll.u32 %s1502_s28, 6 }
  0x16   : > { %s1512_s18 = scalar_lea.vmem %s1662_s1, %s1272_s30  ;;  %s545_s30 = scalar_lea.vmem %s1640_s5, %s1502_s28 }
  0x17   : > { %s1522_s25 = scalar_lea.vmem %s1663_s2, %s1273_s19  ;;  %s1536_s1 = scalar_lea.vmem %s1641_s6, %s1273_s19 }
  0x18   : > { %s1527_s13 = scalar_lea.vmem %s1664_s4, %s1273_s19  ;;  %s553_s23 = scalar_lea.vmem %s1642_s7, %s1502_s28 }
  0x19   : > { %s1276_s24 = sshll.u32 %s1502_s28, 4  ;;  %s1551_s0 = scalar_lea.vmem %s1647_s12, %s1141_s29 }
  0x1a   : > { %s1546_s11 = scalar_lea.vmem %s1643_s8, %s1276_s24  ;;  %567 = sbr.rel (%p1153_p7) target bundleno = 33 (0x21), region = 72 }
  0x1f   : > { %v1401_v0 = vmov 0.0  }
  0x20   : > { %568 = vst [vmem:[#allocation2] sm:$0xff] %v1401_v0 }
  0x21 PF: > { %v1294_v1 = vld [vmem:[%s1527_s13 + $0x38] sm:$0xff]  ;;  %v1293_v2 = vld [vmem:[%s1527_s13 + $0x30] sm:$0xff]  ;;  %v1292_v5 = vld [vmem:[%s1527_s13 + $0x28] sm:$0xff]  ;;  %vm846_vm0 = vcmask 261120   ;;  %s1665_s29 = scalar_lea.vmem %s1638_s3, %s1502_s28  ;;  %p1269_p8 = scmp.ne.s32.totalorder %s1383_s21, 3 }
  0x22   : > { %753 = vmatpush.bf16.msra.mxu1 %v1294_v1  ;;  %v1286_v3 = vld [vmem:[%s1522_s25 + $0x38] sm:$0xff]  ;;  %v1285_v4 = vld [vmem:[%s1522_s25 + $0x30] sm:$0xff]  ;;  %v1284_v6 = vld [vmem:[%s1522_s25 + $0x28] sm:$0xff] }
  0x23   : > { %676 = vmatpush.bf16.msra.mxu0 %v1286_v3  ;;  %v1291_v7 = vld [vmem:[%s1527_s13 + $0x20] sm:$0xff]  ;;  %v1290_v9 = vld [vmem:[%s1527_s13 + $0x18] sm:$0xff]  ;;  %v1289_v11 = vld [vmem:[%s1527_s13 + $0x10] sm:$0xff] }
  0x24   : > { %v1283_v8 = vld [vmem:[%s1522_s25 + $0x20] sm:$0xff]  ;;  %v1282_v10 = vld [vmem:[%s1522_s25 + $0x18] sm:$0xff]  ;;  %v1281_v12 = vld [vmem:[%s1522_s25 + $0x10] sm:$0xff] }
  0x25   : > { %v1288_v13 = vld [vmem:[%s1527_s13 + $0x8] sm:$0xff]  ;;  %v1287_v15 = vld [vmem:[%s1527_s13] sm:$0xff]  ;;  %v1302_v38 = vld [vmem:[%s1536_s1 + $0x38] sm:$0xff] }
  0x26   : > { %754 = vmatpush.bf16.msra.mxu1 %v1293_v2  ;;  %v1280_v14 = vld [vmem:[%s1522_s25 + $0x8] sm:$0xff]  ;;  %v1277_v16 = vld [vmem:[%s1512_s18] sm:$0xff]  ;;  %825 = vmatpush.bf16.msra.mxu2 %v1302_v38  ;;  %v1301_v39 = vld [vmem:[%s1536_s1 + $0x30] sm:$0xff] }
  0x27   : > { %677 = vmatpush.bf16.msra.mxu0 %v1285_v4  ;;  %v1279_v17 = vld [vmem:[%s1522_s25] sm:$0xff]  ;;  %v1278_v19 = vld [vmem:[%s1512_s18 + $0x8] sm:$0xff]  ;;  %v1298_v42 = vld [vmem:[%s1536_s1 + $0x18] sm:$0xff] }
  0x28   : > { %v1572_v18 = vld [vmem:[%s1507_s15] sm:$0xf]  ;;  %v1300_v40 = vld [vmem:[%s1536_s1 + $0x28] sm:$0xff]  ;;  %v1297_v43 = vld [vmem:[%s1536_s1 + $0x10] sm:$0xff] }
  0x29   : > { %v1347_v25 = vld [vmem:[%s545_s30] ss:$0 sm:$0xff]  ;;  %v1296_v44 = vld [vmem:[%s1536_s1 + $0x8] sm:$0xff]  ;;  %s1666_s30 = sld [smem:[#allocation12_spill]] (!%p1269_p8) }
  0x2a   : > { %755 = vmatpush.bf16.msra.mxu1 %v1292_v5  ;;  %v1348_v33 = vld [vmem:[%s1665_s29] ss:$0 sm:$0xff]  ;;  %826 = vmatpush.bf16.msra.mxu2 %v1301_v39  ;;  %v1304_v2 = vld [vmem:[%s1546_s11 + $0x8] sm:$0xff] }
  0x2b   : > { %678 = vmatpush.bf16.msra.mxu0 %v1284_v6  ;;  %v1299_v41 = vld [vmem:[%s1536_s1 + $0x20] sm:$0xff] }
  0x2c   : > { %v1295_v47 = vld [vmem:[%s1536_s1] sm:$0xff] }
  0x2d   : > { %v1349_v58 = vld [vmem:[%s553_s23] ss:$0 sm:$0xff] }
  0x2e   : > { %756 = vmatpush.bf16.msra.mxu1 %v1291_v7  ;;  %827 = vmatpush.bf16.msra.mxu2 %v1300_v40  ;;  %v1303_v3 = vld [vmem:[%s1546_s11] sm:$0xff] }
  0x2f   : > { %679 = vmatpush.bf16.msra.mxu0 %v1283_v8 }
  0x32   : > { %757 = vmatpush.bf16.msra.mxu1 %v1290_v9  ;;  %828 = vmatpush.bf16.msra.mxu2 %v1299_v41 }
  0x33   : > { %680 = vmatpush.bf16.msra.mxu0 %v1282_v10 }
  0x36   : > { %758 = vmatpush.bf16.msra.mxu1 %v1289_v11  ;;  %829 = vmatpush.bf16.msra.mxu2 %v1298_v42  ;;  %v898_v11 = vld [vmem:[#allocation2] sm:$0xff] }
  0x37   : > { %681 = vmatpush.bf16.msra.mxu0 %v1281_v12 }
  0x3a   : > { %759 = vmatpush.bf16.msra.mxu1 %v1288_v13  ;;  %830 = vmatpush.bf16.msra.mxu2 %v1297_v43 }
  0x3b   : > { %682 = vmatpush.bf16.msra.mxu0 %v1280_v14 }
  0x3e   : > { %760 = vmatpush.bf16.msra.mxu1 %v1287_v15  ;;  %831 = vmatpush.bf16.msra.mxu2 %v1296_v44 }
  0x3f   : > { %683 = vmatpush.bf16.msra.mxu0 %v1279_v17 }
  0x41   : > { %761 = vmatmul.bf16.vlgmr.msra.gmra.mxu1 %v1277_v16 }
  0x42   : > { %684 = vmatmul.bf16.vlgmr.msra.gmra.mxu0 %v1572_v18  ;;  %832 = vmatpush.bf16.msra.mxu2 %v1295_v47 }
  0x43   : > { %925 = vmatpush.bf16.msrb.mxu0 %v1304_v2 }
  0x45   : > { %833 = vmatmul.bf16.vlgmr.msra.gmra.mxu2 %v1277_v16 }
  0x47   : > { %926 = vmatpush.bf16.msrb.mxu0 %v1303_v3 }
  0x51   : > { %766 = vmatmul.bf16.gmra.mxu1 %v1278_v19 }
  0x55   : > { %838 = vmatmul.bf16.gmra.mxu2 %v1278_v19 }
  0xbe   : > { %v762_v20 = vpop.f32.mrf.mxu1 }
  0xbf   : > { %v685_v21 = vpop.f32.mrf.mxu0  ;;  %v763_v32 = vadd.f32 %v1347_v25, %v762_v20 }
  0xc0   : > { %v686_v35 = vadd.f32 %v1348_v33, %v685_v21 }
  0xc2   : > { %v689_v37 = vpack.c.bf16 %v686_v35, %v686_v35 }
  0xc6   : > { %v764_v22 = vpop.f32.mrf.mxu1 }
  0xc7   : > { %v687_v23 = vpop.f32.mrf.mxu0  ;;  %v765_v30 = vadd.f32 %v1347_v25, %v764_v22 }
  0xc8   : > { %v834_v55 = vpop.f32.mrf.mxu2 }
  0xc9   : > { %v772_v34 = vpack.c.bf16 %v765_v30, %v763_v32  ;;  %v835_v61 = vadd.f32 %v1349_v58, %v834_v55 }
  0xcb   : > { %v851_v36 = vsel %vm846_vm0, %v772_v34, 0 }
  0xce   : > { %v767_v24 = vpop.f32.mrf.mxu1 }
  0xcf   : > { %v768_v27 = vadd.f32 %v1347_v25, %v767_v24 }
  0xd0   : > { %v836_v56 = vpop.f32.mrf.mxu2 }
  0xd1   : > { %v837_v62 = vadd.f32 %v1349_v58, %v836_v56 }
  0xd3   : > { %v844_v1 = vpack.c.bf16 %v837_v62, %v835_v61 }
  0xd6   : > { %v769_v26 = vpop.f32.mrf.mxu1 }
  0xd7   : > { %v770_v28 = vadd.f32 %v1347_v25, %v769_v26 }
  0xd8   : > { %v839_v57 = vpop.f32.mrf.mxu2 }
  0xd9   : > { %v773_v29 = vpack.c.bf16 %v770_v28, %v768_v27  ;;  %v840_v59 = vadd.f32 %v1349_v58, %v839_v57 }
  0xdb   : > { %v854_v31 = vsel %vm846_vm0, %v773_v29, 0 }
  0xdc   : > { %862 = vmatpush.bf16.xpose.msra.mxu3 %v854_v31 }
  0xe0   : > { %v841_v60 = vpop.f32.mrf.mxu2 }
  0xe1   : > { %v842_v63 = vadd.f32 %v1349_v58, %v841_v60 }
  0xe3   : > { %v845_v0 = vpack.c.bf16 %v842_v63, %v840_v59 }
  0xe4   : > { %863 = vmatpush.bf16.xpose.msra.mxu3 %v851_v36 }
  0xeb   : > { %1258 = vmatmul.msk.bf16.vlgmr.msra.gmra.mxu3 %vm846_vm0, %v689_v37 }
  0xec   : > { %891 = vmatpush.bf16.msrb.mxu3 %v845_v0 }
  0xf0   : > { %892 = vmatpush.bf16.msrb.mxu3 %v844_v1 }
 0x16e   : > { %v865_v45 = vpop.f32.mrf.mxu3 }
 0x16f   : > { %v869_v46 = vmul.f32 0.17677669, %v865_v45 }
 0x171   : > { %v870_v48 = vsel %vm846_vm0, %v869_v46, -inf }
 0x172   : > { %871 = vmax.xlane.f32.xlu0 %v870_v48 }
 0x176   : > { %v867_v49 = vpop.f32.mrf.mxu3 }
 0x1e5   : > { %v872_v50 = vpop.xlane.xlu0 %871 }
 0x1e6   : > { %v873_v51 = vsub.f32 %v869_v46, %v872_v50 }
 0x1e8   : > { %v874_v52 = vmul.f32 1.442695, %v873_v51 }
 0x1ea   : > { %1350 = vpow2.f32 %v874_v52 }
 0x1f0   : > { %v1351_v53 = vpop.eup %1350 }
 0x1f1   : > { %v876_v54 = vsel %vm846_vm0, %v1351_v53, 0.0 }
 0x1f2   : > { %877 = vadd.xlane.f32.xlu0 %v876_v54 }
 0x265   : > { %v878_v4 = vpop.xlane.xlu0 %877 }
 0x266   : > { %1352 = vrcp.f32 %v878_v4 }
 0x26c   : > { %v1353_v5 = vpop.eup %1352 }
 0x26d   : > { %v880_v6 = vmul.f32 %v1353_v5, %v1351_v53 }
 0x26f   : > { %v881_v7 = vpack.c.bf16 %v880_v6, %v880_v6 }
 0x271   : > { %1259 = vmatmul.msk.bf16.vlgmr.msrb.gmra.mxu3 %vm846_vm0, %v881_v7 }
 0x2f4   : > { %v894_v8 = vpop.f32.mrf.mxu3 }
 0x2f5   : > { %v899_v9 = vpack.c.bf16 %v894_v8, %v894_v8 }
 0x2f7   : > { %1268 = vmatmul.msk.bf16.vlgmr.msrb.gmra.mxu0 %vm846_vm0, %v899_v9 }
 0x2fc   : > { %v896_v10 = vpop.f32.mrf.mxu3 }
 0x374   : > { %v928_v12 = vpop.f32.mrf.mxu0 }
 0x375   : > { %v932_v13 = vadd.f32 %v928_v12, %v898_v11 }
 0x377   : > { %933 = vst [vmem:[#allocation2] sm:$0xff] %v932_v13 }
 0x378   : > { %937 = sbr.rel (%p1269_p8) target bundleno = 1168 (0x490), region = 76 }
 0x37c   : > { %v930_v14 = vpop.f32.mrf.mxu0 }
 0x37d   : > { %v1354_v16 = vld [vmem:[%s1644_s9] ss:$0 sm:$0xff]  ;;  %v944_v17 = vunpack.c.l.bf16 %v1572_v18  ;;  %v1402_v21 = vmov 128.0  }
 0x37e   : > { %v938_v15 = vld [vmem:[#allocation2] sm:$0xff]  ;;  %1357 = vrcp.f32 %v1402_v21 }
 0x37f   : > { %v943_v19 = vadd.f32 %v1354_v16, %v938_v15  ;;  %v1355_v40 = vld [vmem:[%s1645_s10] ss:$0 sm:$0xff] }
 0x380   : > { %v1356_v42 = vld [vmem:[%s1666_s30] ss:$0 sm:$0xff] }
 0x381   : > { %v945_v20 = vadd.f32 %v944_v17, %v943_v19 }
 0x383   : > { %948 = vadd.xlane.f32.xlu0 %v945_v20 }
 0x384   : > { %v1358_v22 = vpop.eup %1357 }
 0x385   : > { %v951_v23 = vmul.f32 128.0, %v1358_v22  ;;  %vm955_vm1 = vweird.f32 %v1358_v22 }
 0x387   : > { %v952_v24 = vsub.f32 1.0, %v951_v23 }
 0x389   : > { %v953_v25 = vmul.f32 %v1358_v22, %v952_v24 }
 0x38b   : > { %v954_v26 = vadd.f32 %v1358_v22, %v953_v25 }
 0x38d   : > { %v956_v27 = vsel %vm955_vm1, %v1358_v22, %v954_v26 }
 0x3f6   : > { %v949_v28 = vpop.xlane.xlu0 %948 }
 0x3f7   : > { %v957_v29 = vmul.f32 %v956_v27, %v949_v28 }
 0x3f9   : > { %v958_v30 = vsub.f32 %v945_v20, %v957_v29 }
 0x3fb   : > { %v959_v31 = vmul.f32 %v958_v30, %v958_v30 }
 0x3fd   : > { %960 = vadd.xlane.f32.xlu0 %v959_v31 }
 0x470   : > { %v961_v32 = vpop.xlane.xlu0 %960 }
 0x471   : > { %v962_v33 = vmul.f32 %v961_v32, %v956_v27 }
 0x473   : > { %v963_v18 = vadd.f32 1e-05, %v962_v33 }
 0x475   : > { %1359 = vrsqrt.f32 %v963_v18  ;;  %vm970_vm3 = vweird.f32 %v963_v18 }
 0x47b   : > { %v1360_v34 = vpop.eup %1359 }
 0x47c   : > { %v965_v35 = vmul.f32 %v1360_v34, %v963_v18  ;;  %vm971_vm2 = vweird.f32 %v1360_v34 }
 0x47d   : > { %vm972_vm4 = vmor %vm970_vm3, %vm971_vm2 }
 0x47e   : > { %v966_v36 = vmul.f32 %v1360_v34, %v965_v35 }
 0x480   : > { %v967_v37 = vmul.f32 0.5, %v966_v36 }
 0x482   : > { %v968_v38 = vsub.f32 1.5, %v967_v37 }
 0x484   : > { %v969_v39 = vmul.f32 %v1360_v34, %v968_v38 }
 0x486   : > { %v973_v41 = vsel %vm972_vm4, %v1360_v34, %v969_v39 }
 0x487   : > { %v974_v43 = vmul.f32 %v973_v41, %v958_v30 }
 0x489   : > { %v978_v44 = vmul.f32 %v1355_v40, %v974_v43 }
 0x48b   : > { %v982_v45 = vadd.f32 %v1356_v42, %v978_v44 }
 0x48d   : > { %v983_v46 = vpack.c.bf16 %v982_v45, %v982_v45 }
 0x48f   : > { %984 = vst [vmem:[%s1551_s0] sm:$0xf] %v983_v46 }
 0x490 PF: > { %s1667_s16 = sld [smem:[#allocation5_spill]] }
 0x491   : > { %s1668_s21 = sld [smem:[#allocation3_spill]] }
 0x492   : > { %s1669_s22 = sld [smem:[#allocation4_spill]] }
 0x493   : > { %s1670_s23 = sld [smem:[#allocation6_spill]] }
 0x494   : > { %s1671_s24 = sld [smem:[#allocation7_spill]] }
 0x496   : > { %s22_s25 = sadd.s32 1, %s1667_s16  }
 0x497   : > { %p19_p9 = scmp.ge.s32.totalorder %s22_s25, 10  }
 0x499   :  { %21 = sbr.rel (!%p19_p9) target bundleno = 6 (0x6), region = 130 }

// kernel: vietocr_forward.16
= control target key start
LH: loop header
LB: loop body
LE: loop exit
PB: predicated region body
PF: predicated region fallthrough
CT: control target
= control target key end

     0   :  { %v103_v3 = vmov 128.0   ;;  %s136_s0 = inlined_call_operand.vmem [shape: bf16[16,128], index: 0, kind: input, shape index: {}]   ;;  %s137_s1 = inlined_call_operand.vmem [shape: f32[1,128], index: 1, kind: input, shape index: {}]   ;;  %s138_s2 = inlined_call_operand.vmem [shape: f32[1,128], index: 2, kind: input, shape index: {}]   ;;  %s139_s3 = inlined_call_operand.vmem [shape: bf16[16,128], index: 3, kind: output, shape index: {}]  }
   0x1   :  { %v86_v0 = vld [vmem:[%s136_s0] sm:$0xff]   ;;  %97 = vrcp.f32 %v103_v3 }
   0x2   :  { %v87_v1 = vunpack.c.l.bf16 %v86_v0  ;;  %v88_v2 = vunpack.c.h.bf16 %v86_v0  ;;  %v95_v36 = vld [vmem:[%s137_s1] ss:$0 sm:$0xff] }
   0x3   :  { %v96_v40 = vld [vmem:[%s138_s2] ss:$0 sm:$0xff] }
   0x4   :  { %20 = vadd.xlane.f32.xlu0 %v87_v1 }
   0x7   :  { %v98_v4 = vpop.eup %97 }
   0x8   :  { %v25_v5 = vmul.f32 128.0, %v98_v4  ;;  %vm29_vm0 = vweird.f32 %v98_v4 }
   0xa   :  { %v26_v6 = vsub.f32 1.0, %v25_v5 }
   0xc   :  { %22 = vadd.xlane.f32.xlu0 %v88_v2  ;;  %v27_v7 = vmul.f32 %v98_v4, %v26_v6 }
   0xe   :  { %v28_v8 = vadd.f32 %v98_v4, %v27_v7 }
  0x10   :  { %v30_v9 = vsel %vm29_vm0, %v98_v4, %v28_v8 }
  0x77   :  { %v21_v10 = vpop.xlane.xlu0 %20 }
  0x78   :  { %v31_v11 = vmul.f32 %v30_v9, %v21_v10 }
  0x7a   :  { %v33_v12 = vsub.f32 %v87_v1, %v31_v11 }
  0x7c   :  { %v35_v13 = vmul.f32 %v33_v12, %v33_v12 }
  0x7e   :  { %37 = vadd.xlane.f32.xlu1 %v35_v13 }
  0x7f   :  { %v23_v14 = vpop.xlane.xlu0 %22 }
  0x80   :  { %v32_v15 = vmul.f32 %v30_v9, %v23_v14 }
  0x82   :  { %v34_v16 = vsub.f32 %v88_v2, %v32_v15 }
  0x84   :  { %v36_v17 = vmul.f32 %v34_v16, %v34_v16 }
  0x86   :  { %39 = vadd.xlane.f32.xlu1 %v36_v17 }
  0xf1   :  { %v38_v18 = vpop.xlane.xlu1 %37 }
  0xf2   :  { %v41_v19 = vmul.f32 %v38_v18, %v30_v9 }
  0xf4   :  { %v43_v20 = vadd.f32 1e-05, %v41_v19 }
  0xf6   :  { %99 = vrsqrt.f32 %v43_v20  ;;  %vm51_vm2 = vweird.f32 %v43_v20 }
  0xf9   :  { %v40_v21 = vpop.xlane.xlu1 %39 }
  0xfa   :  { %v42_v22 = vmul.f32 %v40_v21, %v30_v9 }
  0xfc   :  { %v100_v23 = vpop.eup %99  ;;  %v44_v24 = vadd.f32 1e-05, %v42_v22 }
  0xfd   :  { %v46_v25 = vmul.f32 %v100_v23, %v43_v20  ;;  %vm52_vm1 = vweird.f32 %v100_v23 }
  0xfe   :  { %101 = vrsqrt.f32 %v44_v24  ;;  %vm53_vm3 = vmor %vm51_vm2, %vm52_vm1  ;;  %vm61_vm5 = vweird.f32 %v44_v24 }
  0xff   :  { %v47_v26 = vmul.f32 %v100_v23, %v46_v25 }
 0x101   :  { %v48_v27 = vmul.f32 0.5, %v47_v26 }
 0x103   :  { %v49_v28 = vsub.f32 1.5, %v48_v27 }
 0x104   :  { %v102_v29 = vpop.eup %101 }
 0x105   :  { %v50_v30 = vmul.f32 %v100_v23, %v49_v28  ;;  %v56_v31 = vmul.f32 %v102_v29, %v44_v24  ;;  %vm62_vm4 = vweird.f32 %v102_v29 }
 0x106   :  { %vm63_vm6 = vmor %vm61_vm5, %vm62_vm4 }
 0x107   :  { %v57_v32 = vmul.f32 %v102_v29, %v56_v31  ;;  %v54_v33 = vsel %vm53_vm3, %v100_v23, %v50_v30 }
 0x108   :  { %v65_v37 = vmul.f32 %v54_v33, %v33_v12 }
 0x109   :  { %v58_v34 = vmul.f32 0.5, %v57_v32 }
 0x10a   :  { %v70_v41 = vmul.f32 %v95_v36, %v65_v37 }
 0x10b   :  { %v59_v35 = vsub.f32 1.5, %v58_v34 }
 0x10c   :  { %v75_v44 = vadd.f32 %v96_v40, %v70_v41 }
 0x10d   :  { %v60_v38 = vmul.f32 %v102_v29, %v59_v35 }
 0x10f   :  { %v64_v39 = vsel %vm63_vm6, %v102_v29, %v60_v38 }
 0x110   :  { %v66_v42 = vmul.f32 %v64_v39, %v34_v16 }
 0x112   :  { %v71_v43 = vmul.f32 %v95_v36, %v66_v42 }
 0x114   :  { %v76_v45 = vadd.f32 %v96_v40, %v71_v43 }
 0x116   :  { %v92_v46 = vpack.c.bf16 %v76_v45, %v75_v44 }
 0x118   :  { %93 = vst [vmem:[%s139_s3] sm:$0xff] %v92_v46  }

// kernel: vietocr_forward.17
= control target key start
LH: loop header
LB: loop body
LE: loop exit
PB: predicated region body
PF: predicated region fallthrough
CT: control target
= control target key end

     0   :  { %s231_s1 = inlined_call_operand.vmem [shape: bf16[128,128], index: 1, kind: input, shape index: {}]   ;;  %s232_s2 = inlined_call_operand.vmem [shape: f32[1,128], index: 2, kind: input, shape index: {}]   ;;  %s233_s0 = inlined_call_operand.vmem [shape: bf16[16,128], index: 0, kind: input, shape index: {}]   ;;  %s234_s3 = inlined_call_operand.vmem [shape: f32[16,128], index: 3, kind: output, shape index: {}]  }
   0x1   :  { %v173_v0 = vld [vmem:[%s231_s1 + $0x38] sm:$0xff]  ;;  %v172_v1 = vld [vmem:[%s231_s1 + $0x30] sm:$0xff]  ;;  %v171_v2 = vld [vmem:[%s231_s1 + $0x28] sm:$0xff] }
   0x2   :  { %94 = vmatpush.bf16.msra.mxu0 %v173_v0  ;;  %v170_v3 = vld [vmem:[%s231_s1 + $0x20] sm:$0xff]  ;;  %v169_v4 = vld [vmem:[%s231_s1 + $0x18] sm:$0xff]  ;;  %v168_v5 = vld [vmem:[%s231_s1 + $0x10] sm:$0xff] }
   0x3   :  { %v167_v6 = vld [vmem:[%s231_s1 + $0x8] sm:$0xff]  ;;  %v166_v7 = vld [vmem:[%s231_s1] sm:$0xff] }
   0x4   :  { %v165_v8 = vld [vmem:[%s233_s0] sm:$0xff] }
   0x5   :  { %v174_v9 = vld [vmem:[%s232_s2] ss:$0 sm:$0xff] }
   0x6   :  { %95 = vmatpush.bf16.msra.mxu0 %v172_v1 }
   0xa   :  { %96 = vmatpush.bf16.msra.mxu0 %v171_v2 }
   0xe   :  { %97 = vmatpush.bf16.msra.mxu0 %v170_v3 }
  0x12   :  { %98 = vmatpush.bf16.msra.mxu0 %v169_v4 }
  0x16   :  { %99 = vmatpush.bf16.msra.mxu0 %v168_v5 }
  0x1a   :  { %100 = vmatpush.bf16.msra.mxu0 %v167_v6 }
  0x1e   :  { %101 = vmatpush.bf16.msra.mxu0 %v166_v7 }
  0x21   :  { %102 = vmatmul.bf16.vlgmr.msra.gmra.mxu0 %v165_v8 }
  0x9e   :  { %v103_v10 = vpop.f32.mrf.mxu0 }
  0x9f   :  { %v121_v11 = vadd.f32 %v174_v9, %v103_v10 }
  0xa1   :  { %123 = vst [vmem:[%s234_s3] sm:$0xff] %v121_v11 }
  0xa6   :  { %v105_v12 = vpop.f32.mrf.mxu0 }
  0xa7   :  { %v122_v13 = vadd.f32 %v174_v9, %v105_v12 }
  0xa9   :  { %124 = vst [vmem:[%s234_s3 + $0x8] sm:$0xff] %v122_v13 }

</bundles_post_ra>
